<compile_context>
chip_gen: v5e
topology: v5e:2x2
jax: 0.10.0
libtpu: 0.0.40
codegen_flags: <defaults>
</compile_context>

<pallas_src>
import functools

import jax
import jax.numpy as jnp
from jax import lax
from jax.experimental import pallas as pl
from jax.experimental.pallas import tpu as pltpu

BN_EPS = 1e-5
_PAD = 8                          # halo offset: keeps interior store tile-aligned
_VMEM_LIMIT = 32 * 1024 * 1024    # explicit scoped-VMEM budget, safe on v5e/v6e/v7x


def _squeeze_kernel(x_ref, w_ref, b_ref, y_ref, sum_ref, ssq_ref):
    """1x1 conv + bias + ReLU; accumulates global BN stats across the grid.

    x: (1, H, W, Cin) bf16   w: (Cin, S) bf16   b: (1, S) f32
    y: (1, H, W, S) f32      sum/ssq: (1, S) f32 resident accumulators
    """
    _, H, W, Cin = x_ref.shape
    S = w_ref.shape[1]

    x2 = x_ref[0].reshape(H * W, Cin)                       # layout-preserving
    y = jnp.dot(x2, w_ref[...], preferred_element_type=jnp.float32)
    y = jnp.maximum(y + b_ref[...], 0.0)                    # f32 (H*W, S)
    y_ref[0] = y.reshape(H, W, S)

    @pl.when(pl.program_id(0) == 0)
    def _init():
        sum_ref[...] = jnp.zeros_like(sum_ref)
        ssq_ref[...] = jnp.zeros_like(ssq_ref)

    # Single-pass stats: sum and sum-of-squares (var derived in the wrapper).
    sum_ref[...] += jnp.sum(y, axis=0, keepdims=True)
    ssq_ref[...] += jnp.sum(y * y, axis=0, keepdims=True)


def _expand_kernel(y_ref, scale_ref, shift_ref, w_ref, b_ref, o_ref, pad_ref,
                   *, H, W, S, E):
    """BN affine + fused (left 1x1 | right 3x3, pad=1) conv + ReLU.

    y: (1, H, W, S) f32               scale/shift: (1, S) f32
    w: (9, S, 2E) bf16 (left 1x1 folded into centre tap)   b: (1, 2E) f32
    o: (1, H, W, 2E) f32              pad_ref: (H+_PAD+1, W+_PAD+1, S) f32 VMEM
    """
    # In-kernel zero padding: zero the scratch, then write the image interior
    # at a sublane-tile-aligned offset so the store is unmasked.
    pad_ref[...] = jnp.zeros_like(pad_ref)
    y_hat = y_ref[0] * scale_ref[...] + shift_ref[...]      # BN affine, f32
    pad_ref[_PAD:_PAD + H, _PAD:_PAD + W, :] = y_hat

    # 3x3 conv (+ fused left 1x1 at the centre tap) as 9 MXU matmuls
    # accumulated in f32; one output covers both branches' 2E channels.
    acc = jnp.zeros((H * W, 2 * E), jnp.float32)
    for t in range(9):
        dh, dw = t // 3, t % 3
        patch = pad_ref[_PAD - 1 + dh:_PAD - 1 + dh + H,
                        _PAD - 1 + dw:_PAD - 1 + dw + W, :]
        patch = patch.reshape(H * W, S).astype(jnp.bfloat16)
        acc = acc + jnp.dot(patch, w_ref[t],
                            preferred_element_type=jnp.float32)

    out = jnp.maximum(acc + b_ref[...], 0.0)                # bias + ReLU, f32
    o_ref[0] = out.reshape(H, W, 2 * E)


def fire_module_forward(x_nchw, params):
    """FireModule forward. Input NCHW, output NCHW with 2*expand channels."""
    N, Cin, H, W = x_nchw.shape
    S = params["w_sq"].shape[1]
    E = params["w_l"].shape[1]

    # NCHW -> NHWC; bf16 feeds the MXU (accumulation / elementwise stay f32).
    x = jnp.transpose(x_nchw, (0, 2, 3, 1)).astype(jnp.bfloat16)
    w_sq = params["w_sq"].astype(jnp.bfloat16)

    y, ysum, yssq = pl.pallas_call(
        _squeeze_kernel,
        grid=(N,),
        in_specs=[
            pl.BlockSpec((1, H, W, Cin), lambda n: (n, 0, 0, 0)),
            pl.BlockSpec((Cin, S), lambda n: (0, 0)),
            pl.BlockSpec((1, S), lambda n: (0, 0)),
        ],
        out_specs=(
            pl.BlockSpec((1, H, W, S), lambda n: (n, 0, 0, 0)),
            pl.BlockSpec((1, S), lambda n: (0, 0)),   # resident sum accumulator
            pl.BlockSpec((1, S), lambda n: (0, 0)),   # resident sumsq accumulator
        ),
        out_shape=(
            jax.ShapeDtypeStruct((N, H, W, S), jnp.float32),
            jax.ShapeDtypeStruct((1, S), jnp.float32),
            jax.ShapeDtypeStruct((1, S), jnp.float32),
        ),
        compiler_params=pltpu.CompilerParams(
            dimension_semantics=("arbitrary",),       # stats reduce over the grid
            vmem_limit_bytes=_VMEM_LIMIT),
    )(x, w_sq, params["b_sq"])

    # BN affine terms from the *global* batch stats (tiny (1, S) vectors).
    count = float(N * H * W)
    mean = ysum / count
    var = jnp.maximum(yssq / count - mean * mean, 0.0)      # biased, single-pass
    scale = params["gamma"] * lax.rsqrt(var + BN_EPS)
    shift = params["beta"] - mean * scale

    # Fused expand weight (kh, kw, S, 2E): right 3x3 taps everywhere, the left
    # 1x1 conv folded into the centre tap's first E output channels.
    w_comb = jnp.zeros((3, 3, S, 2 * E), jnp.float32)
    w_comb = w_comb.at[:, :, :, E:].set(params["w_r"])
    w_comb = w_comb.at[1, 1, :, :E].set(params["w_l"])
    w_comb = w_comb.reshape(9, S, 2 * E).astype(jnp.bfloat16)
    b_comb = jnp.concatenate([params["b_l"], params["b_r"]], axis=1)  # (1, 2E)

    kern = functools.partial(_expand_kernel, H=H, W=W, S=S, E=E)
    out_nhwc = pl.pallas_call(
        kern,
        grid=(N,),
        in_specs=[
            pl.BlockSpec((1, H, W, S), lambda n: (n, 0, 0, 0)),
            pl.BlockSpec((1, S), lambda n: (0, 0)),
            pl.BlockSpec((1, S), lambda n: (0, 0)),
            pl.BlockSpec((9, S, 2 * E), lambda n: (0, 0, 0)),
            pl.BlockSpec((1, 2 * E), lambda n: (0, 0)),
        ],
        out_specs=pl.BlockSpec((1, H, W, 2 * E), lambda n: (n, 0, 0, 0)),
        out_shape=jax.ShapeDtypeStruct((N, H, W, 2 * E), jnp.float32),
        scratch_shapes=[pltpu.VMEM((H + _PAD + 1, W + _PAD + 1, S),
                                   jnp.float32)],
        compiler_params=pltpu.CompilerParams(
            dimension_semantics=("parallel",),
            vmem_limit_bytes=_VMEM_LIMIT),
    )(y, scale, shift, w_comb, b_comb)

    # Single transpose of the fused output back to NCHW (== torch.cat dim=1).
    return jnp.transpose(out_nhwc, (0, 3, 1, 2))


def init_params(key, in_channels, squeeze, expand):
    """Deterministic synthetic parameters (shapes match the PyTorch module)."""
    k1, k2, k3, k4, k5, k6 = jax.random.split(key, 6)
    return {
        # Conv2d(in_channels, squeeze, 1x1): weight stored as (Cin, S)
        "w_sq": 0.1 * jax.random.normal(k1, (in_channels, squeeze), jnp.float32),
        "b_sq": 0.1 * jax.random.normal(k2, (1, squeeze), jnp.float32),
        # BatchNorm2d(squeeze) affine params (PyTorch default init)
        "gamma": jnp.ones((1, squeeze), jnp.float32),
        "beta": jnp.zeros((1, squeeze), jnp.float32),
        # Conv2d(squeeze, expand, 1x1): (S, E)
        "w_l": 0.1 * jax.random.normal(k3, (squeeze, expand), jnp.float32),
        "b_l": 0.1 * jax.random.normal(k4, (1, expand), jnp.float32),
        # Conv2d(squeeze, expand, 3x3): (3, 3, S, E)  (HWIO)
        "w_r": 0.1 * jax.random.normal(k5, (3, 3, squeeze, expand), jnp.float32),
        "b_r": 0.1 * jax.random.normal(k6, (1, expand), jnp.float32),
    }


# TODO(synk): PyTorch BatchNorm2d(train) also updates running_mean/running_var
# buffers; this forward only produces the normalized output.

if __name__ == "__main__":
    key = jax.random.PRNGKey(0)
    k_x, k_p = jax.random.split(key)

    N, Cin, H, W = 2, 4, 16, 16
    squeeze, expand = 8, 16

    x = jax.random.normal(k_x, (N, Cin, H, W), jnp.float32)
    params = init_params(k_p, Cin, squeeze, expand)

    fwd = jax.jit(fire_module_forward)
    out = jax.block_until_ready(fwd(x, params))
    assert out.shape == (N, 2 * expand, H, W), out.shape
    print("KERNEL_OK")
</pallas_src>

<mosaic_0001>
module attributes {stable_mosaic.version = 11 : i64} {
  func.func @_squeeze_kernel(%arg0: i32, %arg1: memref<1x16x16x4xbf16, #tpu.memory_space<vmem>>, %arg2: memref<4x8xbf16, #tpu.memory_space<vmem>>, %arg3: memref<1x8xf32, #tpu.memory_space<vmem>>, %arg4: memref<1x16x16x8xf32, #tpu.memory_space<vmem>>, %arg5: memref<1x8xf32, #tpu.memory_space<vmem>>, %arg6: memref<1x8xf32, #tpu.memory_space<vmem>>) attributes {dimension_semantics = [#tpu.dimension_semantics<arbitrary>], iteration_bounds = array<i64: 2>, scalar_prefetch = 0 : i64, scratch_operands = 0 : i64, tpu.core_type = #tpu.core_type<tc>, window_params = [{transform_indices = @transform_0, window_bounds = array<i64: 1, 16, 16, 4>}, {pipeline_mode = #tpu.pipeline_mode<synchronous>, transform_indices = @transform_1, window_bounds = array<i64: 4, 8>}, {pipeline_mode = #tpu.pipeline_mode<synchronous>, transform_indices = @transform_2, window_bounds = array<i64: 1, 8>}, {transform_indices = @transform_3, window_bounds = array<i64: 1, 16, 16, 8>}, {pipeline_mode = #tpu.pipeline_mode<synchronous>, transform_indices = @transform_4, window_bounds = array<i64: 1, 8>}, {pipeline_mode = #tpu.pipeline_mode<synchronous>, transform_indices = @transform_5, window_bounds = array<i64: 1, 8>}]} {
    %c0 = arith.constant 0 : index
    %c0_0 = arith.constant 0 : index
    %c0_1 = arith.constant 0 : index
    %c0_2 = arith.constant 0 : index
    %0 = vector.load %arg1[%c0, %c0_0, %c0_1, %c0_2] : memref<1x16x16x4xbf16, #tpu.memory_space<vmem>>, vector<1x16x16x4xbf16>
    %1 = vector.shape_cast %0 : vector<1x16x16x4xbf16> to vector<16x16x4xbf16>
    %2 = vector.shape_cast %1 : vector<16x16x4xbf16> to vector<256x4xbf16>
    %c0_3 = arith.constant 0 : index
    %c0_4 = arith.constant 0 : index
    %3 = vector.load %arg2[%c0_3, %c0_4] : memref<4x8xbf16, #tpu.memory_space<vmem>>, vector<4x8xbf16>
    %cst = arith.constant dense<0.000000e+00> : vector<256x8xf32>
    %4 = tpu.matmul %2, %3, %cst {dimension_numbers = #tpu.dot_dimension_numbers<[1], [0], [0], [1], [0, 0, 1, 1], [], []>} : vector<256x4xbf16>, vector<4x8xbf16>, vector<256x8xf32> -> vector<256x8xf32>
    %c0_5 = arith.constant 0 : index
    %c0_6 = arith.constant 0 : index
    %5 = vector.load %arg3[%c0_5, %c0_6] : memref<1x8xf32, #tpu.memory_space<vmem>>, vector<1x8xf32>
    %6 = vector.broadcast %5 : vector<1x8xf32> to vector<256x8xf32>
    %7 = arith.addf %4, %6 : vector<256x8xf32>
    %cst_7 = arith.constant 0.000000e+00 : f32
    %8 = vector.broadcast %cst_7 : f32 to vector<256x8xf32>
    %9 = arith.maximumf %7, %8 : vector<256x8xf32>
    %10 = vector.shape_cast %9 : vector<256x8xf32> to vector<16x16x8xf32>
    %c0_8 = arith.constant 0 : index
    %c0_9 = arith.constant 0 : index
    %c0_10 = arith.constant 0 : index
    %c0_11 = arith.constant 0 : index
    %11 = vector.load %arg4[%c0_8, %c0_9, %c0_10, %c0_11] : memref<1x16x16x8xf32, #tpu.memory_space<vmem>>, vector<1x16x16x8xf32>
    %12 = vector.shape_cast %11 : vector<1x16x16x8xf32> to vector<16x16x8xf32>
    %13 = vector.shape_cast %10 : vector<16x16x8xf32> to vector<1x16x16x8xf32>
    tpu.vector_store %arg4[%c0_8, %c0_9, %c0_10, %c0_11], %13 {strides = array<i32>} : memref<1x16x16x8xf32, #tpu.memory_space<vmem>>, vector<1x16x16x8xf32>,
    %c0_i32 = arith.constant 0 : i32
    %14 = arith.cmpi eq, %arg0, %c0_i32 : i32
    %15 = arith.extui %14 : i1 to i32
    %c0_i32_12 = arith.constant 0 : i32
    %16 = arith.cmpi ne, %15, %c0_i32_12 : i32
    scf.if %16 {
      %cst_23 = arith.constant 0.000000e+00 : f32
      %28 = vector.broadcast %cst_23 : f32 to vector<1x8xf32>
      %c0_24 = arith.constant 0 : index
      %c0_25 = arith.constant 0 : index
      %29 = vector.load %arg5[%c0_24, %c0_25] : memref<1x8xf32, #tpu.memory_space<vmem>>, vector<1x8xf32>
      tpu.vector_store %arg5[%c0_24, %c0_25], %28 {strides = array<i32>} : memref<1x8xf32, #tpu.memory_space<vmem>>, vector<1x8xf32>,
      %cst_26 = arith.constant 0.000000e+00 : f32
      %30 = vector.broadcast %cst_26 : f32 to vector<1x8xf32>
      %c0_27 = arith.constant 0 : index
      %c0_28 = arith.constant 0 : index
      %31 = vector.load %arg6[%c0_27, %c0_28] : memref<1x8xf32, #tpu.memory_space<vmem>>, vector<1x8xf32>
      tpu.vector_store %arg6[%c0_27, %c0_28], %30 {strides = array<i32>} : memref<1x8xf32, #tpu.memory_space<vmem>>, vector<1x8xf32>,
    } else {
    }
    %c0_13 = arith.constant 0 : index
    %c0_14 = arith.constant 0 : index
    %17 = vector.load %arg5[%c0_13, %c0_14] : memref<1x8xf32, #tpu.memory_space<vmem>>, vector<1x8xf32>
    %cst_15 = arith.constant dense<0.000000e+00> : vector<8xf32>
    %18 = vector.multi_reduction <add>, %9, %cst_15 [0] : vector<256x8xf32> to vector<8xf32>
    %19 = vector.shape_cast %18 : vector<8xf32> to vector<1x8xf32>
    %20 = arith.addf %17, %19 : vector<1x8xf32>
    %c0_16 = arith.constant 0 : index
    %c0_17 = arith.constant 0 : index
    %21 = vector.load %arg5[%c0_16, %c0_17] : memref<1x8xf32, #tpu.memory_space<vmem>>, vector<1x8xf32>
    tpu.vector_store %arg5[%c0_16, %c0_17], %20 {strides = array<i32>} : memref<1x8xf32, #tpu.memory_space<vmem>>, vector<1x8xf32>,
    %c0_18 = arith.constant 0 : index
    %c0_19 = arith.constant 0 : index
    %22 = vector.load %arg6[%c0_18, %c0_19] : memref<1x8xf32, #tpu.memory_space<vmem>>, vector<1x8xf32>
    %23 = arith.mulf %9, %9 : vector<256x8xf32>
    %cst_20 = arith.constant dense<0.000000e+00> : vector<8xf32>
    %24 = vector.multi_reduction <add>, %23, %cst_20 [0] : vector<256x8xf32> to vector<8xf32>
    %25 = vector.shape_cast %24 : vector<8xf32> to vector<1x8xf32>
    %26 = arith.addf %22, %25 : vector<1x8xf32>
    %c0_21 = arith.constant 0 : index
    %c0_22 = arith.constant 0 : index
    %27 = vector.load %arg6[%c0_21, %c0_22] : memref<1x8xf32, #tpu.memory_space<vmem>>, vector<1x8xf32>
    tpu.vector_store %arg6[%c0_21, %c0_22], %26 {strides = array<i32>} : memref<1x8xf32, #tpu.memory_space<vmem>>, vector<1x8xf32>,
    return
  }
  func.func @transform_0(%arg0: i32) -> (i32, i32, i32, i32) {
    %c0_i32 = arith.constant 0 : i32
    %c0_i32_0 = arith.constant 0 : i32
    %c0_i32_1 = arith.constant 0 : i32
    %c0_i32_2 = arith.constant 0 : i32
    return %arg0, %c0_i32, %c0_i32_0, %c0_i32_1 : i32, i32, i32, i32
  }
  func.func @transform_1(%arg0: i32) -> (i32, i32) {
    %c0_i32 = arith.constant 0 : i32
    %c0_i32_0 = arith.constant 0 : i32
    %c0_i32_1 = arith.constant 0 : i32
    return %c0_i32, %c0_i32_0 : i32, i32
  }
  func.func @transform_2(%arg0: i32) -> (i32, i32) {
    %c0_i32 = arith.constant 0 : i32
    %c0_i32_0 = arith.constant 0 : i32
    %c0_i32_1 = arith.constant 0 : i32
    return %c0_i32, %c0_i32_0 : i32, i32
  }
  func.func @transform_3(%arg0: i32) -> (i32, i32, i32, i32) {
    %c0_i32 = arith.constant 0 : i32
    %c0_i32_0 = arith.constant 0 : i32
    %c0_i32_1 = arith.constant 0 : i32
    %c0_i32_2 = arith.constant 0 : i32
    return %arg0, %c0_i32, %c0_i32_0, %c0_i32_1 : i32, i32, i32, i32
  }
  func.func @transform_4(%arg0: i32) -> (i32, i32) {
    %c0_i32 = arith.constant 0 : i32
    %c0_i32_0 = arith.constant 0 : i32
    %c0_i32_1 = arith.constant 0 : i32
    return %c0_i32, %c0_i32_0 : i32, i32
  }
  func.func @transform_5(%arg0: i32) -> (i32, i32) {
    %c0_i32 = arith.constant 0 : i32
    %c0_i32_0 = arith.constant 0 : i32
    %c0_i32_1 = arith.constant 0 : i32
    return %c0_i32, %c0_i32_0 : i32, i32
  }
}

module attributes {stable_mosaic.version = 11 : i64} {
  func.func @_expand_kernel(%arg0: i32, %arg1: memref<1x16x16x8xf32, #tpu.memory_space<vmem>>, %arg2: memref<1x8xf32, #tpu.memory_space<vmem>>, %arg3: memref<1x8xf32, #tpu.memory_space<vmem>>, %arg4: memref<9x8x32xbf16, #tpu.memory_space<vmem>>, %arg5: memref<1x32xf32, #tpu.memory_space<vmem>>, %arg6: memref<1x16x16x32xf32, #tpu.memory_space<vmem>>, %arg7: memref<25x25x8xf32, #tpu.memory_space<vmem>>) attributes {dimension_semantics = [#tpu.dimension_semantics<parallel>], iteration_bounds = array<i64: 2>, scalar_prefetch = 0 : i64, scratch_operands = 1 : i64, tpu.core_type = #tpu.core_type<tc>, window_params = [{transform_indices = @transform_0, window_bounds = array<i64: 1, 16, 16, 8>}, {pipeline_mode = #tpu.pipeline_mode<synchronous>, transform_indices = @transform_1, window_bounds = array<i64: 1, 8>}, {pipeline_mode = #tpu.pipeline_mode<synchronous>, transform_indices = @transform_2, window_bounds = array<i64: 1, 8>}, {pipeline_mode = #tpu.pipeline_mode<synchronous>, transform_indices = @transform_3, window_bounds = array<i64: 9, 8, 32>}, {pipeline_mode = #tpu.pipeline_mode<synchronous>, transform_indices = @transform_4, window_bounds = array<i64: 1, 32>}, {transform_indices = @transform_5, window_bounds = array<i64: 1, 16, 16, 32>}]} {
    %cst = arith.constant 0.000000e+00 : f32
    %0 = vector.broadcast %cst : f32 to vector<25x25x8xf32>
    %c0 = arith.constant 0 : index
    %c0_0 = arith.constant 0 : index
    %c0_1 = arith.constant 0 : index
    %1 = vector.load %arg7[%c0, %c0_0, %c0_1] : memref<25x25x8xf32, #tpu.memory_space<vmem>>, vector<25x25x8xf32>
    tpu.vector_store %arg7[%c0, %c0_0, %c0_1], %0 {strides = array<i32>} : memref<25x25x8xf32, #tpu.memory_space<vmem>>, vector<25x25x8xf32>,
    %c0_2 = arith.constant 0 : index
    %c0_3 = arith.constant 0 : index
    %c0_4 = arith.constant 0 : index
    %c0_5 = arith.constant 0 : index
    %2 = vector.load %arg1[%c0_2, %c0_3, %c0_4, %c0_5] : memref<1x16x16x8xf32, #tpu.memory_space<vmem>>, vector<1x16x16x8xf32>
    %3 = vector.shape_cast %2 : vector<1x16x16x8xf32> to vector<16x16x8xf32>
    %c0_6 = arith.constant 0 : index
    %c0_7 = arith.constant 0 : index
    %4 = vector.load %arg2[%c0_6, %c0_7] : memref<1x8xf32, #tpu.memory_space<vmem>>, vector<1x8xf32>
    %5 = vector.shape_cast %4 : vector<1x8xf32> to vector<1x1x8xf32>
    %6 = vector.broadcast %5 : vector<1x1x8xf32> to vector<16x16x8xf32>
    %7 = arith.mulf %3, %6 : vector<16x16x8xf32>
    %c0_8 = arith.constant 0 : index
    %c0_9 = arith.constant 0 : index
    %8 = vector.load %arg3[%c0_8, %c0_9] : memref<1x8xf32, #tpu.memory_space<vmem>>, vector<1x8xf32>
    %9 = vector.shape_cast %8 : vector<1x8xf32> to vector<1x1x8xf32>
    %10 = vector.broadcast %9 : vector<1x1x8xf32> to vector<16x16x8xf32>
    %11 = arith.addf %7, %10 : vector<16x16x8xf32>
    %c8 = arith.constant 8 : index
    %c8_10 = arith.constant 8 : index
    %c0_11 = arith.constant 0 : index
    %12 = vector.load %arg7[%c8, %c8_10, %c0_11] : memref<25x25x8xf32, #tpu.memory_space<vmem>>, vector<16x16x8xf32>
    tpu.vector_store %arg7[%c8, %c8_10, %c0_11], %11 {strides = array<i32>} : memref<25x25x8xf32, #tpu.memory_space<vmem>>, vector<16x16x8xf32>,
    %cst_12 = arith.constant 0.000000e+00 : f32
    %13 = vector.broadcast %cst_12 : f32 to vector<256x32xf32>
    %c7 = arith.constant 7 : index
    %c7_13 = arith.constant 7 : index
    %c0_14 = arith.constant 0 : index
    %14 = vector.load %arg7[%c7, %c7_13, %c0_14] : memref<25x25x8xf32, #tpu.memory_space<vmem>>, vector<16x16x8xf32>
    %15 = vector.shape_cast %14 : vector<16x16x8xf32> to vector<256x8xf32>
    %16 = arith.truncf %15 : vector<256x8xf32> to vector<256x8xbf16>
    %c0_15 = arith.constant 0 : index
    %c0_16 = arith.constant 0 : index
    %c0_17 = arith.constant 0 : index
    %17 = vector.load %arg4[%c0_15, %c0_16, %c0_17] : memref<9x8x32xbf16, #tpu.memory_space<vmem>>, vector<1x8x32xbf16>
    %18 = vector.shape_cast %17 : vector<1x8x32xbf16> to vector<8x32xbf16>
    %cst_18 = arith.constant dense<0.000000e+00> : vector<256x32xf32>
    %19 = tpu.matmul %16, %18, %cst_18 {dimension_numbers = #tpu.dot_dimension_numbers<[1], [0], [0], [1], [0, 0, 1, 1], [], []>} : vector<256x8xbf16>, vector<8x32xbf16>, vector<256x32xf32> -> vector<256x32xf32>
    %20 = arith.addf %13, %19 : vector<256x32xf32>
    %c7_19 = arith.constant 7 : index
    %c8_20 = arith.constant 8 : index
    %c0_21 = arith.constant 0 : index
    %21 = vector.load %arg7[%c7_19, %c8_20, %c0_21] : memref<25x25x8xf32, #tpu.memory_space<vmem>>, vector<16x16x8xf32>
    %22 = vector.shape_cast %21 : vector<16x16x8xf32> to vector<256x8xf32>
    %23 = arith.truncf %22 : vector<256x8xf32> to vector<256x8xbf16>
    %c1 = arith.constant 1 : index
    %c0_22 = arith.constant 0 : index
    %c0_23 = arith.constant 0 : index
    %24 = vector.load %arg4[%c1, %c0_22, %c0_23] : memref<9x8x32xbf16, #tpu.memory_space<vmem>>, vector<1x8x32xbf16>
    %25 = vector.shape_cast %24 : vector<1x8x32xbf16> to vector<8x32xbf16>
    %cst_24 = arith.constant dense<0.000000e+00> : vector<256x32xf32>
    %26 = tpu.matmul %23, %25, %cst_24 {dimension_numbers = #tpu.dot_dimension_numbers<[1], [0], [0], [1], [0, 0, 1, 1], [], []>} : vector<256x8xbf16>, vector<8x32xbf16>, vector<256x32xf32> -> vector<256x32xf32>
    %27 = arith.addf %20, %26 : vector<256x32xf32>
    %c7_25 = arith.constant 7 : index
    %c9 = arith.constant 9 : index
    %c0_26 = arith.constant 0 : index
    %28 = vector.load %arg7[%c7_25, %c9, %c0_26] : memref<25x25x8xf32, #tpu.memory_space<vmem>>, vector<16x16x8xf32>
    %29 = vector.shape_cast %28 : vector<16x16x8xf32> to vector<256x8xf32>
    %30 = arith.truncf %29 : vector<256x8xf32> to vector<256x8xbf16>
    %c2 = arith.constant 2 : index
    %c0_27 = arith.constant 0 : index
    %c0_28 = arith.constant 0 : index
    %31 = vector.load %arg4[%c2, %c0_27, %c0_28] : memref<9x8x32xbf16, #tpu.memory_space<vmem>>, vector<1x8x32xbf16>
    %32 = vector.shape_cast %31 : vector<1x8x32xbf16> to vector<8x32xbf16>
    %cst_29 = arith.constant dense<0.000000e+00> : vector<256x32xf32>
    %33 = tpu.matmul %30, %32, %cst_29 {dimension_numbers = #tpu.dot_dimension_numbers<[1], [0], [0], [1], [0, 0, 1, 1], [], []>} : vector<256x8xbf16>, vector<8x32xbf16>, vector<256x32xf32> -> vector<256x32xf32>
    %34 = arith.addf %27, %33 : vector<256x32xf32>
    %c8_30 = arith.constant 8 : index
    %c7_31 = arith.constant 7 : index
    %c0_32 = arith.constant 0 : index
    %35 = vector.load %arg7[%c8_30, %c7_31, %c0_32] : memref<25x25x8xf32, #tpu.memory_space<vmem>>, vector<16x16x8xf32>
    %36 = vector.shape_cast %35 : vector<16x16x8xf32> to vector<256x8xf32>
    %37 = arith.truncf %36 : vector<256x8xf32> to vector<256x8xbf16>
    %c3 = arith.constant 3 : index
    %c0_33 = arith.constant 0 : index
    %c0_34 = arith.constant 0 : index
    %38 = vector.load %arg4[%c3, %c0_33, %c0_34] : memref<9x8x32xbf16, #tpu.memory_space<vmem>>, vector<1x8x32xbf16>
    %39 = vector.shape_cast %38 : vector<1x8x32xbf16> to vector<8x32xbf16>
    %cst_35 = arith.constant dense<0.000000e+00> : vector<256x32xf32>
    %40 = tpu.matmul %37, %39, %cst_35 {dimension_numbers = #tpu.dot_dimension_numbers<[1], [0], [0], [1], [0, 0, 1, 1], [], []>} : vector<256x8xbf16>, vector<8x32xbf16>, vector<256x32xf32> -> vector<256x32xf32>
    %41 = arith.addf %34, %40 : vector<256x32xf32>
    %c8_36 = arith.constant 8 : index
    %c8_37 = arith.constant 8 : index
    %c0_38 = arith.constant 0 : index
    %42 = vector.load %arg7[%c8_36, %c8_37, %c0_38] : memref<25x25x8xf32, #tpu.memory_space<vmem>>, vector<16x16x8xf32>
    %43 = vector.shape_cast %42 : vector<16x16x8xf32> to vector<256x8xf32>
    %44 = arith.truncf %43 : vector<256x8xf32> to vector<256x8xbf16>
    %c4 = arith.constant 4 : index
    %c0_39 = arith.constant 0 : index
    %c0_40 = arith.constant 0 : index
    %45 = vector.load %arg4[%c4, %c0_39, %c0_40] : memref<9x8x32xbf16, #tpu.memory_space<vmem>>, vector<1x8x32xbf16>
    %46 = vector.shape_cast %45 : vector<1x8x32xbf16> to vector<8x32xbf16>
    %cst_41 = arith.constant dense<0.000000e+00> : vector<256x32xf32>
    %47 = tpu.matmul %44, %46, %cst_41 {dimension_numbers = #tpu.dot_dimension_numbers<[1], [0], [0], [1], [0, 0, 1, 1], [], []>} : vector<256x8xbf16>, vector<8x32xbf16>, vector<256x32xf32> -> vector<256x32xf32>
    %48 = arith.addf %41, %47 : vector<256x32xf32>
    %c8_42 = arith.constant 8 : index
    %c9_43 = arith.constant 9 : index
    %c0_44 = arith.constant 0 : index
    %49 = vector.load %arg7[%c8_42, %c9_43, %c0_44] : memref<25x25x8xf32, #tpu.memory_space<vmem>>, vector<16x16x8xf32>
    %50 = vector.shape_cast %49 : vector<16x16x8xf32> to vector<256x8xf32>
    %51 = arith.truncf %50 : vector<256x8xf32> to vector<256x8xbf16>
    %c5 = arith.constant 5 : index
    %c0_45 = arith.constant 0 : index
    %c0_46 = arith.constant 0 : index
    %52 = vector.load %arg4[%c5, %c0_45, %c0_46] : memref<9x8x32xbf16, #tpu.memory_space<vmem>>, vector<1x8x32xbf16>
    %53 = vector.shape_cast %52 : vector<1x8x32xbf16> to vector<8x32xbf16>
    %cst_47 = arith.constant dense<0.000000e+00> : vector<256x32xf32>
    %54 = tpu.matmul %51, %53, %cst_47 {dimension_numbers = #tpu.dot_dimension_numbers<[1], [0], [0], [1], [0, 0, 1, 1], [], []>} : vector<256x8xbf16>, vector<8x32xbf16>, vector<256x32xf32> -> vector<256x32xf32>
    %55 = arith.addf %48, %54 : vector<256x32xf32>
    %c9_48 = arith.constant 9 : index
    %c7_49 = arith.constant 7 : index
    %c0_50 = arith.constant 0 : index
    %56 = vector.load %arg7[%c9_48, %c7_49, %c0_50] : memref<25x25x8xf32, #tpu.memory_space<vmem>>, vector<16x16x8xf32>
    %57 = vector.shape_cast %56 : vector<16x16x8xf32> to vector<256x8xf32>
    %58 = arith.truncf %57 : vector<256x8xf32> to vector<256x8xbf16>
    %c6 = arith.constant 6 : index
    %c0_51 = arith.constant 0 : index
    %c0_52 = arith.constant 0 : index
    %59 = vector.load %arg4[%c6, %c0_51, %c0_52] : memref<9x8x32xbf16, #tpu.memory_space<vmem>>, vector<1x8x32xbf16>
    %60 = vector.shape_cast %59 : vector<1x8x32xbf16> to vector<8x32xbf16>
    %cst_53 = arith.constant dense<0.000000e+00> : vector<256x32xf32>
    %61 = tpu.matmul %58, %60, %cst_53 {dimension_numbers = #tpu.dot_dimension_numbers<[1], [0], [0], [1], [0, 0, 1, 1], [], []>} : vector<256x8xbf16>, vector<8x32xbf16>, vector<256x32xf32> -> vector<256x32xf32>
    %62 = arith.addf %55, %61 : vector<256x32xf32>
    %c9_54 = arith.constant 9 : index
    %c8_55 = arith.constant 8 : index
    %c0_56 = arith.constant 0 : index
    %63 = vector.load %arg7[%c9_54, %c8_55, %c0_56] : memref<25x25x8xf32, #tpu.memory_space<vmem>>, vector<16x16x8xf32>
    %64 = vector.shape_cast %63 : vector<16x16x8xf32> to vector<256x8xf32>
    %65 = arith.truncf %64 : vector<256x8xf32> to vector<256x8xbf16>
    %c7_57 = arith.constant 7 : index
    %c0_58 = arith.constant 0 : index
    %c0_59 = arith.constant 0 : index
    %66 = vector.load %arg4[%c7_57, %c0_58, %c0_59] : memref<9x8x32xbf16, #tpu.memory_space<vmem>>, vector<1x8x32xbf16>
    %67 = vector.shape_cast %66 : vector<1x8x32xbf16> to vector<8x32xbf16>
    %cst_60 = arith.constant dense<0.000000e+00> : vector<256x32xf32>
    %68 = tpu.matmul %65, %67, %cst_60 {dimension_numbers = #tpu.dot_dimension_numbers<[1], [0], [0], [1], [0, 0, 1, 1], [], []>} : vector<256x8xbf16>, vector<8x32xbf16>, vector<256x32xf32> -> vector<256x32xf32>
    %69 = arith.addf %62, %68 : vector<256x32xf32>
    %c9_61 = arith.constant 9 : index
    %c9_62 = arith.constant 9 : index
    %c0_63 = arith.constant 0 : index
    %70 = vector.load %arg7[%c9_61, %c9_62, %c0_63] : memref<25x25x8xf32, #tpu.memory_space<vmem>>, vector<16x16x8xf32>
    %71 = vector.shape_cast %70 : vector<16x16x8xf32> to vector<256x8xf32>
    %72 = arith.truncf %71 : vector<256x8xf32> to vector<256x8xbf16>
    %c8_64 = arith.constant 8 : index
    %c0_65 = arith.constant 0 : index
    %c0_66 = arith.constant 0 : index
    %73 = vector.load %arg4[%c8_64, %c0_65, %c0_66] : memref<9x8x32xbf16, #tpu.memory_space<vmem>>, vector<1x8x32xbf16>
    %74 = vector.shape_cast %73 : vector<1x8x32xbf16> to vector<8x32xbf16>
    %cst_67 = arith.constant dense<0.000000e+00> : vector<256x32xf32>
    %75 = tpu.matmul %72, %74, %cst_67 {dimension_numbers = #tpu.dot_dimension_numbers<[1], [0], [0], [1], [0, 0, 1, 1], [], []>} : vector<256x8xbf16>, vector<8x32xbf16>, vector<256x32xf32> -> vector<256x32xf32>
    %76 = arith.addf %69, %75 : vector<256x32xf32>
    %c0_68 = arith.constant 0 : index
    %c0_69 = arith.constant 0 : index
    %77 = vector.load %arg5[%c0_68, %c0_69] : memref<1x32xf32, #tpu.memory_space<vmem>>, vector<1x32xf32>
    %78 = vector.broadcast %77 : vector<1x32xf32> to vector<256x32xf32>
    %79 = arith.addf %76, %78 : vector<256x32xf32>
    %cst_70 = arith.constant 0.000000e+00 : f32
    %80 = vector.broadcast %cst_70 : f32 to vector<256x32xf32>
    %81 = arith.maximumf %79, %80 : vector<256x32xf32>
    %82 = vector.shape_cast %81 : vector<256x32xf32> to vector<16x16x32xf32>
    %c0_71 = arith.constant 0 : index
    %c0_72 = arith.constant 0 : index
    %c0_73 = arith.constant 0 : index
    %c0_74 = arith.constant 0 : index
    %83 = vector.load %arg6[%c0_71, %c0_72, %c0_73, %c0_74] : memref<1x16x16x32xf32, #tpu.memory_space<vmem>>, vector<1x16x16x32xf32>
    %84 = vector.shape_cast %83 : vector<1x16x16x32xf32> to vector<16x16x32xf32>
    %85 = vector.shape_cast %82 : vector<16x16x32xf32> to vector<1x16x16x32xf32>
    tpu.vector_store %arg6[%c0_71, %c0_72, %c0_73, %c0_74], %85 {strides = array<i32>} : memref<1x16x16x32xf32, #tpu.memory_space<vmem>>, vector<1x16x16x32xf32>,
    return
  }
  func.func @transform_0(%arg0: i32) -> (i32, i32, i32, i32) {
    %c0_i32 = arith.constant 0 : i32
    %c0_i32_0 = arith.constant 0 : i32
    %c0_i32_1 = arith.constant 0 : i32
    %c0_i32_2 = arith.constant 0 : i32
    return %arg0, %c0_i32, %c0_i32_0, %c0_i32_1 : i32, i32, i32, i32
  }
  func.func @transform_1(%arg0: i32) -> (i32, i32) {
    %c0_i32 = arith.constant 0 : i32
    %c0_i32_0 = arith.constant 0 : i32
    %c0_i32_1 = arith.constant 0 : i32
    return %c0_i32, %c0_i32_0 : i32, i32
  }
  func.func @transform_2(%arg0: i32) -> (i32, i32) {
    %c0_i32 = arith.constant 0 : i32
    %c0_i32_0 = arith.constant 0 : i32
    %c0_i32_1 = arith.constant 0 : i32
    return %c0_i32, %c0_i32_0 : i32, i32
  }
  func.func @transform_3(%arg0: i32) -> (i32, i32, i32) {
    %c0_i32 = arith.constant 0 : i32
    %c0_i32_0 = arith.constant 0 : i32
    %c0_i32_1 = arith.constant 0 : i32
    %c0_i32_2 = arith.constant 0 : i32
    return %c0_i32, %c0_i32_0, %c0_i32_1 : i32, i32, i32
  }
  func.func @transform_4(%arg0: i32) -> (i32, i32) {
    %c0_i32 = arith.constant 0 : i32
    %c0_i32_0 = arith.constant 0 : i32
    %c0_i32_1 = arith.constant 0 : i32
    return %c0_i32, %c0_i32_0 : i32, i32
  }
  func.func @transform_5(%arg0: i32) -> (i32, i32, i32, i32) {
    %c0_i32 = arith.constant 0 : i32
    %c0_i32_0 = arith.constant 0 : i32
    %c0_i32_1 = arith.constant 0 : i32
    %c0_i32_2 = arith.constant 0 : i32
    return %arg0, %c0_i32, %c0_i32_0, %c0_i32_1 : i32, i32, i32, i32
  }
}

</mosaic_0001>

<bundles_post_ra>
// kernel: fire_module_forward.2
= control target key start
LH: loop header
LB: loop body
LE: loop exit
PB: predicated region body
PF: predicated region fallthrough
CT: control target
= control target key end

     0   :  { %s958_s18 = smov 0   ;;  %s1374_s0 = inlined_call_operand.vmem [shape: bf16[2,16,16,4], index: 0, kind: input, shape index: {}]   ;;  %s1375_s1 = inlined_call_operand.vmem [shape: bf16[4,8], index: 1, kind: input, shape index: {}]   ;;  %s1376_s2 = inlined_call_operand.vmem [shape: f32[1,8], index: 2, kind: input, shape index: {}]   ;;  %s1377_s3 = inlined_call_operand.vmem [shape: f32[2,16,16,8], index: 3, kind: output, shape index: {0}]   ;;  %s1378_s4 = inlined_call_operand.vmem [shape: f32[1,8], index: 4, kind: output, shape index: {1}]   ;;  %s1379_s5 = inlined_call_operand.vmem [shape: f32[1,8], index: 5, kind: output, shape index: {2}]  }
   0x1 LB: > { %s964_s19 = sadd.s32 4294967295, %s925_s18   ;;  %p800_p0 = scmp.ge.s32.totalorder %s925_s18, 1  ;;  %s925_s18 = sphi %s958_s18, %s16_s18  }
   0x2   : > { %p182_p1 = scmp.lt.s32.totalorder %s925_s18, 3 }
   0x4   : > { %p183_p2 = pnand %p800_p0, %p182_p1 }
   0x5   : > { %p210_p3 = scmp.lt.s32.totalorder (!%p183_p2), %s964_s19, 1  ;;  %p885_p4 = scmp.ne.s32.totalorder (!%p183_p2), %s964_s19, 0 }
   0x6   : > { %186 = sbr.rel (%p183_p2) target bundleno = 297 (0x129), region = 32 }
   0xb   : > { %v253_v0 = vld [vmem:[%s1375_s1] sm:$0x3]  ;;  %vm387_vm0 = vcmask 1041408   ;;  %s973_s22 = scalar_select %p210_p3, %s964_s19, 1  ;;  %vm338_vm1 = vcmask 31744   ;;  %vm512_vm2 = vcmask 64512  }
   0xc   : > { %v389_v1 = vsel %vm387_vm0, %v253_v0, 0  ;;  %v998_v18 = vld [vmem:[%s1376_s2] ss:$0 sm:$0xff] }
   0xd   : > { %398 = vmatpush.bf16.msra.mxu0 %v389_v1  ;;  %906 = vmatpush.bf16.msra.mxu1 %v389_v1  ;;  %s888_s23 = sshll.u32 %s973_s22, 7  ;;  %s889_s29 = sshll.u32 %s973_s22, 8 }
   0xe   : > { %907 = vmatpush.bf16.msra.mxu2 %v389_v1  ;;  %908 = vmatpush.bf16.msra.mxu3 %v389_v1  ;;  %s214_s26 = scalar_lea.vmem %s1374_s0, %s888_s23  ;;  %s1006_s7 = scalar_lea.vmem %s1377_s3, %s889_s29 }
   0xf   : > { %v890_v2 = vld [vmem:[%s214_s26] sm:$0xff]  ;;  %v891_v6 = vld [vmem:[%s214_s26 + $0x8] sm:$0xff]  ;;  %v892_v10 = vld [vmem:[%s214_s26 + $0x10] sm:$0xff] }
  0x10   : > { %v894_v3 = vld [vmem:[%s214_s26 + $0x20] sm:$0xff]  ;;  %869 = vmatmul.msk.bf16.vlgmr.msra.gmra.mxu0 %vm338_vm1, %v890_v2  ;;  %v895_v7 = vld [vmem:[%s214_s26 + $0x28] sm:$0xff]  ;;  %v896_v11 = vld [vmem:[%s214_s26 + $0x30] sm:$0xff] }
  0x11   : > { %v898_v4 = vld [vmem:[%s214_s26 + $0x40] sm:$0xff]  ;;  %873 = vmatmul.msk.bf16.vlgmr.msra.gmra.mxu1 %vm338_vm1, %v894_v3  ;;  %v899_v8 = vld [vmem:[%s214_s26 + $0x48] sm:$0xff]  ;;  %v900_v12 = vld [vmem:[%s214_s26 + $0x50] sm:$0xff] }
  0x12   : > { %v902_v5 = vld [vmem:[%s214_s26 + $0x60] sm:$0xff]  ;;  %877 = vmatmul.msk.bf16.vlgmr.msra.gmra.mxu2 %vm338_vm1, %v898_v4  ;;  %v903_v9 = vld [vmem:[%s214_s26 + $0x68] sm:$0xff]  ;;  %v904_v13 = vld [vmem:[%s214_s26 + $0x70] sm:$0xff] }
  0x13   : > { %881 = vmatmul.msk.bf16.vlgmr.msra.gmra.mxu3 %vm338_vm1, %v902_v5  ;;  %v893_v14 = vld [vmem:[%s214_s26 + $0x18] sm:$0xff] }
  0x14   : > { %v897_v15 = vld [vmem:[%s214_s26 + $0x38] sm:$0xff] }
  0x15   : > { %v901_v16 = vld [vmem:[%s214_s26 + $0x58] sm:$0xff] }
  0x16   : > { %v905_v17 = vld [vmem:[%s214_s26 + $0x78] sm:$0xff] }
  0x20   : > { %870 = vmatmul.msk.bf16.gmra.mxu0 %vm338_vm1, %v891_v6 }
  0x21   : > { %874 = vmatmul.msk.bf16.gmra.mxu1 %vm338_vm1, %v895_v7 }
  0x22   : > { %878 = vmatmul.msk.bf16.gmra.mxu2 %vm338_vm1, %v899_v8 }
  0x23   : > { %882 = vmatmul.msk.bf16.gmra.mxu3 %vm338_vm1, %v903_v9 }
  0x30   : > { %871 = vmatmul.msk.bf16.gmra.mxu0 %vm338_vm1, %v892_v10 }
  0x31   : > { %875 = vmatmul.msk.bf16.gmra.mxu1 %vm338_vm1, %v896_v11 }
  0x32   : > { %879 = vmatmul.msk.bf16.gmra.mxu2 %vm338_vm1, %v900_v12 }
  0x33   : > { %883 = vmatmul.msk.bf16.gmra.mxu3 %vm338_vm1, %v904_v13 }
  0x40   : > { %872 = vmatmul.msk.bf16.gmra.mxu0 %vm338_vm1, %v893_v14 }
  0x41   : > { %876 = vmatmul.msk.bf16.gmra.mxu1 %vm338_vm1, %v897_v15 }
  0x42   : > { %880 = vmatmul.msk.bf16.gmra.mxu2 %vm338_vm1, %v901_v16 }
  0x43   : > { %884 = vmatmul.msk.bf16.gmra.mxu3 %vm338_vm1, %v905_v17 }
  0x8d   : > { %v400_v19 = vpop.f32.mrf.mxu0 }
  0x8e   : > { %v420_v20 = vpop.f32.mrf.mxu1  ;;  %v401_v21 = vadd.f32 %v998_v18, %v400_v19 }
  0x8f   : > { %v421_v22 = vadd.f32 %v998_v18, %v420_v20 }
  0x90   : > { %v1008_v23 = vmax.f32 %v401_v21, 0.0 }
  0x91   : > { %v1010_v24 = vmax.f32 %v421_v22, 0.0 }
  0x92   : > { %513 = vst.msk [vmem:[%s1006_s7] sm:$0xff] %vm512_vm2, %v1008_v23 }
  0x93   : > { %521 = vst.msk [vmem:[%s1006_s7 + $0x40] sm:$0xff] %vm512_vm2, %v1010_v24 }
  0x95   : > { %v440_v25 = vpop.f32.mrf.mxu2  ;;  %v402_v29 = vpop.f32.mrf.mxu0 }
  0x96   : > { %v460_v26 = vpop.f32.mrf.mxu3  ;;  %v441_v27 = vadd.f32 %v998_v18, %v440_v25  ;;  %v422_v30 = vpop.f32.mrf.mxu1  ;;  %v403_v31 = vadd.f32 %v998_v18, %v402_v29 }
  0x97   : > { %v461_v28 = vadd.f32 %v998_v18, %v460_v26  ;;  %v423_v32 = vadd.f32 %v998_v18, %v422_v30 }
  0x98   : > { %v1022_v33 = vmax.f32 %v441_v27, 0.0  ;;  %v1026_v35 = vmax.f32 %v403_v31, 0.0 }
  0x99   : > { %v1024_v34 = vmax.f32 %v461_v28, 0.0  ;;  %v1028_v36 = vmax.f32 %v423_v32, 0.0 }
  0x9a   : > { %529 = vst.msk [vmem:[%s1006_s7 + $0x80] sm:$0xff] %vm512_vm2, %v1022_v33 }
  0x9b   : > { %537 = vst.msk [vmem:[%s1006_s7 + $0xc0] sm:$0xff] %vm512_vm2, %v1024_v34 }
  0x9c   : > { %514 = vst.msk [vmem:[%s1006_s7 + $0x8] sm:$0xff] %vm512_vm2, %v1026_v35 }
  0x9d   : > { %522 = vst.msk [vmem:[%s1006_s7 + $0x48] sm:$0xff] %vm512_vm2, %v1028_v36  ;;  %v442_v37 = vpop.f32.mrf.mxu2  ;;  %v405_v41 = vpop.f32.mrf.mxu0 }
  0x9e   : > { %v462_v38 = vpop.f32.mrf.mxu3  ;;  %v443_v39 = vadd.f32 %v998_v18, %v442_v37  ;;  %v425_v42 = vpop.f32.mrf.mxu1  ;;  %v406_v43 = vadd.f32 %v998_v18, %v405_v41 }
  0x9f   : > { %v463_v40 = vadd.f32 %v998_v18, %v462_v38  ;;  %v426_v44 = vadd.f32 %v998_v18, %v425_v42 }
  0xa0   : > { %v1046_v45 = vmax.f32 %v443_v39, 0.0  ;;  %v1050_v47 = vmax.f32 %v406_v43, 0.0 }
  0xa1   : > { %v1048_v46 = vmax.f32 %v463_v40, 0.0  ;;  %v1052_v48 = vmax.f32 %v426_v44, 0.0 }
  0xa2   : > { %530 = vst.msk [vmem:[%s1006_s7 + $0x88] sm:$0xff] %vm512_vm2, %v1046_v45 }
  0xa3   : > { %538 = vst.msk [vmem:[%s1006_s7 + $0xc8] sm:$0xff] %vm512_vm2, %v1048_v46 }
  0xa4   : > { %515 = vst.msk [vmem:[%s1006_s7 + $0x10] sm:$0xff] %vm512_vm2, %v1050_v47 }
  0xa5   : > { %523 = vst.msk [vmem:[%s1006_s7 + $0x50] sm:$0xff] %vm512_vm2, %v1052_v48  ;;  %v445_v49 = vpop.f32.mrf.mxu2  ;;  %v407_v53 = vpop.f32.mrf.mxu0 }
  0xa6   : > { %v465_v50 = vpop.f32.mrf.mxu3  ;;  %v446_v51 = vadd.f32 %v998_v18, %v445_v49  ;;  %v427_v54 = vpop.f32.mrf.mxu1  ;;  %v408_v55 = vadd.f32 %v998_v18, %v407_v53 }
  0xa7   : > { %v466_v52 = vadd.f32 %v998_v18, %v465_v50  ;;  %v428_v56 = vadd.f32 %v998_v18, %v427_v54 }
  0xa8   : > { %v1070_v57 = vmax.f32 %v446_v51, 0.0  ;;  %v1074_v59 = vmax.f32 %v408_v55, 0.0 }
  0xa9   : > { %v1072_v58 = vmax.f32 %v466_v52, 0.0  ;;  %v1076_v60 = vmax.f32 %v428_v56, 0.0 }
  0xaa   : > { %531 = vst.msk [vmem:[%s1006_s7 + $0x90] sm:$0xff] %vm512_vm2, %v1070_v57 }
  0xab   : > { %539 = vst.msk [vmem:[%s1006_s7 + $0xd0] sm:$0xff] %vm512_vm2, %v1072_v58 }
  0xac   : > { %516 = vst.msk [vmem:[%s1006_s7 + $0x18] sm:$0xff] %vm512_vm2, %v1074_v59 }
  0xad   : > { %524 = vst.msk [vmem:[%s1006_s7 + $0x58] sm:$0xff] %vm512_vm2, %v1076_v60  ;;  %v447_v61 = vpop.f32.mrf.mxu2  ;;  %v410_v1 = vpop.f32.mrf.mxu0 }
  0xae   : > { %v467_v62 = vpop.f32.mrf.mxu3  ;;  %v448_v63 = vadd.f32 %v998_v18, %v447_v61  ;;  %v430_v2 = vpop.f32.mrf.mxu1  ;;  %v411_v3 = vadd.f32 %v998_v18, %v410_v1 }
  0xaf   : > { %v468_v0 = vadd.f32 %v998_v18, %v467_v62  ;;  %v431_v4 = vadd.f32 %v998_v18, %v430_v2 }
  0xb0   : > { %v1094_v5 = vmax.f32 %v448_v63, 0.0  ;;  %v1098_v7 = vmax.f32 %v411_v3, 0.0 }
  0xb1   : > { %v1096_v6 = vmax.f32 %v468_v0, 0.0  ;;  %v1100_v8 = vmax.f32 %v431_v4, 0.0 }
  0xb2   : > { %532 = vst.msk [vmem:[%s1006_s7 + $0x98] sm:$0xff] %vm512_vm2, %v1094_v5 }
  0xb3   : > { %540 = vst.msk [vmem:[%s1006_s7 + $0xd8] sm:$0xff] %vm512_vm2, %v1096_v6 }
  0xb4   : > { %517 = vst.msk [vmem:[%s1006_s7 + $0x20] sm:$0xff] %vm512_vm2, %v1098_v7 }
  0xb5   : > { %525 = vst.msk [vmem:[%s1006_s7 + $0x60] sm:$0xff] %vm512_vm2, %v1100_v8  ;;  %v450_v9 = vpop.f32.mrf.mxu2  ;;  %v412_v13 = vpop.f32.mrf.mxu0 }
  0xb6   : > { %v470_v10 = vpop.f32.mrf.mxu3  ;;  %v451_v11 = vadd.f32 %v998_v18, %v450_v9  ;;  %v432_v14 = vpop.f32.mrf.mxu1  ;;  %v413_v15 = vadd.f32 %v998_v18, %v412_v13 }
  0xb7   : > { %v471_v12 = vadd.f32 %v998_v18, %v470_v10  ;;  %v433_v16 = vadd.f32 %v998_v18, %v432_v14 }
  0xb8   : > { %v1118_v17 = vmax.f32 %v451_v11, 0.0  ;;  %v1122_v20 = vmax.f32 %v413_v15, 0.0 }
  0xb9   : > { %v1120_v19 = vmax.f32 %v471_v12, 0.0  ;;  %v1124_v21 = vmax.f32 %v433_v16, 0.0 }
  0xba   : > { %533 = vst.msk [vmem:[%s1006_s7 + $0xa0] sm:$0xff] %vm512_vm2, %v1118_v17 }
  0xbb   : > { %541 = vst.msk [vmem:[%s1006_s7 + $0xe0] sm:$0xff] %vm512_vm2, %v1120_v19 }
  0xbc   : > { %518 = vst.msk [vmem:[%s1006_s7 + $0x28] sm:$0xff] %vm512_vm2, %v1122_v20 }
  0xbd   : > { %526 = vst.msk [vmem:[%s1006_s7 + $0x68] sm:$0xff] %vm512_vm2, %v1124_v21  ;;  %v452_v22 = vpop.f32.mrf.mxu2  ;;  %v415_v28 = vpop.f32.mrf.mxu0 }
  0xbe   : > { %v472_v25 = vpop.f32.mrf.mxu3  ;;  %v453_v26 = vadd.f32 %v998_v18, %v452_v22  ;;  %v435_v29 = vpop.f32.mrf.mxu1  ;;  %v416_v30 = vadd.f32 %v998_v18, %v415_v28 }
  0xbf   : > { %v473_v27 = vadd.f32 %v998_v18, %v472_v25  ;;  %v436_v31 = vadd.f32 %v998_v18, %v435_v29 }
  0xc0   : > { %v1142_v32 = vmax.f32 %v453_v26, 0.0  ;;  %v1146_v38 = vmax.f32 %v416_v30, 0.0 }
  0xc1   : > { %v1144_v37 = vmax.f32 %v473_v27, 0.0  ;;  %v1148_v39 = vmax.f32 %v436_v31, 0.0 }
  0xc2   : > { %534 = vst.msk [vmem:[%s1006_s7 + $0xa8] sm:$0xff] %vm512_vm2, %v1142_v32 }
  0xc3   : > { %542 = vst.msk [vmem:[%s1006_s7 + $0xe8] sm:$0xff] %vm512_vm2, %v1144_v37 }
  0xc4   : > { %519 = vst.msk [vmem:[%s1006_s7 + $0x30] sm:$0xff] %vm512_vm2, %v1146_v38 }
  0xc5   : > { %527 = vst.msk [vmem:[%s1006_s7 + $0x70] sm:$0xff] %vm512_vm2, %v1148_v39  ;;  %v455_v40 = vpop.f32.mrf.mxu2  ;;  %v417_v44 = vpop.f32.mrf.mxu0 }
  0xc6   : > { %v475_v41 = vpop.f32.mrf.mxu3  ;;  %v456_v42 = vadd.f32 %v998_v18, %v455_v40  ;;  %v437_v49 = vpop.f32.mrf.mxu1  ;;  %v418_v50 = vadd.f32 %v998_v18, %v417_v44 }
  0xc7   : > { %v476_v43 = vadd.f32 %v998_v18, %v475_v41  ;;  %v438_v51 = vadd.f32 %v998_v18, %v437_v49 }
  0xc8   : > { %v1166_v52 = vmax.f32 %v456_v42, 0.0  ;;  %v487_v54 = vmax.f32 %v418_v50, 0.0 }
  0xc9   : > { %v1168_v53 = vmax.f32 %v476_v43, 0.0  ;;  %v1170_v55 = vmax.f32 %v438_v51, 0.0 }
  0xca   : > { %535 = vst.msk [vmem:[%s1006_s7 + $0xb0] sm:$0xff] %vm512_vm2, %v1166_v52 }
  0xcb   : > { %543 = vst.msk [vmem:[%s1006_s7 + $0xf0] sm:$0xff] %vm512_vm2, %v1168_v53 }
  0xcc   : > { %520 = vst.msk [vmem:[%s1006_s7 + $0x38] sm:$0xff] %vm512_vm2, %v487_v54 }
  0xcd   : > { %528 = vst.msk [vmem:[%s1006_s7 + $0x78] sm:$0xff] %vm512_vm2, %v1170_v55  ;;  %v457_v56 = vpop.f32.mrf.mxu2 }
  0xce   : > { %v477_v61 = vpop.f32.mrf.mxu3  ;;  %v458_v62 = vadd.f32 %v998_v18, %v457_v56 }
  0xcf   : > { %v478_v63 = vadd.f32 %v998_v18, %v477_v61  ;;  %548 = sbr.rel (%p885_p4) target bundleno = 215 (0xd7), region = 36 }
  0xd0   : > { %v1185_v0 = vmax.f32 %v458_v62, 0.0 }
  0xd1   : > { %v1187_v1 = vmax.f32 %v478_v63, 0.0 }
  0xd2   : > { %536 = vst.msk [vmem:[%s1006_s7 + $0xb8] sm:$0xff] %vm512_vm2, %v1185_v0 }
  0xd3   : > { %544 = vst.msk [vmem:[%s1006_s7 + $0xf8] sm:$0xff] %vm512_vm2, %v1187_v1 }
  0xd4   : > { %vm549_vm3 = vcmask 57344   ;;  %v927_v2 = vmov 0.0  }
  0xd5   : > { %550 = vst.msk [vmem:[%s1378_s4] sm:$0x1] %vm549_vm3, %v927_v2 }
  0xd6   : > { %551 = vst.msk [vmem:[%s1379_s5] sm:$0x1] %vm549_vm3, %v927_v2 }
  0xd7 PF: > { %v553_v18 = vsel %vm512_vm2, %v1008_v23, 0.0  ;;  %v554_v3 = vsel %vm512_vm2, %v1026_v35, 0.0  ;;  %v556_v4 = vsel %vm512_vm2, %v1050_v47, 0.0  ;;  %v558_v10 = vsel %vm512_vm2, %v1074_v59, 0.0 }
  0xd8   : > { %v555_v9 = vadd.f32 %v554_v3, %v553_v18  ;;  %v560_v12 = vsel %vm512_vm2, %v1098_v7, 0.0  ;;  %v562_v14 = vsel %vm512_vm2, %v1122_v20, 0.0  ;;  %v564_v16 = vsel %vm512_vm2, %v1146_v38, 0.0 }
  0xd9   : > { %v626_v22 = vmul.f32 %v1008_v23, %v1008_v23  ;;  %v627_v26 = vmul.f32 %v1026_v35, %v1026_v35  ;;  %v628_v27 = vmul.f32 %v1050_v47, %v1050_v47  ;;  %v566_v28 = vsel %vm512_vm2, %v487_v54, 0.0 }
  0xda   : > { %v557_v11 = vadd.f32 %v556_v4, %v555_v9  ;;  %v629_v30 = vmul.f32 %v1074_v59, %v1074_v59  ;;  %v568_v31 = vsel %vm512_vm2, %v1010_v24, 0.0  ;;  %v630_v23 = vmul.f32 %v1098_v7, %v1098_v7 }
  0xdb   : > { %v658_v40 = vsel %vm512_vm2, %v626_v22, 0.0  ;;  %v659_v35 = vsel %vm512_vm2, %v627_v26, 0.0  ;;  %v661_v42 = vsel %vm512_vm2, %v628_v27, 0.0  ;;  %v570_v47 = vsel %vm512_vm2, %v1028_v36, 0.0 }
  0xdc   : > { %v559_v13 = vadd.f32 %v558_v10, %v557_v11  ;;  %v660_v43 = vadd.f32 %v659_v35, %v658_v40  ;;  %v631_v59 = vmul.f32 %v1122_v20, %v1122_v20  ;;  %v663_v49 = vsel %vm512_vm2, %v629_v30, 0.0 }
  0xdd   : > { %v572_v50 = vsel %vm512_vm2, %v1052_v48, 0.0  ;;  %v632_v7 = vmul.f32 %v1146_v38, %v1146_v38  ;;  %v665_v61 = vsel %vm512_vm2, %v630_v23, 0.0  ;;  %v574_v62 = vsel %vm512_vm2, %v1076_v60, 0.0 }
  0xde   : > { %v561_v15 = vadd.f32 %v560_v12, %v559_v13  ;;  %v662_v51 = vadd.f32 %v661_v42, %v660_v43  ;;  %v633_v18 = vmul.f32 %v487_v54, %v487_v54  ;;  %v667_v20 = vsel %vm512_vm2, %v631_v59, 0.0 }
  0xdf   : > { %v576_v3 = vsel %vm512_vm2, %v1100_v8, 0.0  ;;  %v634_v10 = vmul.f32 %v1010_v24, %v1010_v24  ;;  %v669_v38 = vsel %vm512_vm2, %v632_v7, 0.0  ;;  %v578_v11 = vsel %vm512_vm2, %v1124_v21, 0.0 }
  0xe0   : > { %v563_v25 = vadd.f32 %v562_v14, %v561_v15  ;;  %v664_v63 = vadd.f32 %v663_v49, %v662_v51  ;;  %v635_v54 = vmul.f32 %v1028_v36, %v1028_v36  ;;  %v671_v14 = vsel %vm512_vm2, %v633_v18, 0.0 }
  0xe1   : > { %v580_v15 = vsel %vm512_vm2, %v1148_v39, 0.0  ;;  %v636_v24 = vmul.f32 %v1052_v48, %v1052_v48  ;;  %v582_v26 = vsel %vm512_vm2, %v1170_v55, 0.0  ;;  %v637_v36 = vmul.f32 %v1076_v60, %v1076_v60 }
  0xe2   : > { %v565_v29 = vadd.f32 %v564_v16, %v563_v25  ;;  %v666_v4 = vadd.f32 %v665_v61, %v664_v63  ;;  %v673_v25 = vsel %vm512_vm2, %v634_v10, 0.0  ;;  %v584_v30 = vsel %vm512_vm2, %v1022_v33, 0.0 }
  0xe3   : > { %v638_v48 = vmul.f32 %v1100_v8, %v1100_v8  ;;  %v586_v23 = vsel %vm512_vm2, %v1046_v45, 0.0  ;;  %v639_v60 = vmul.f32 %v1124_v21, %v1124_v21  ;;  %v588_v43 = vsel %vm512_vm2, %v1070_v57, 0.0 }
  0xe4   : > { %v567_v41 = vadd.f32 %v566_v28, %v565_v29  ;;  %v668_v12 = vadd.f32 %v667_v20, %v666_v4  ;;  %v675_v29 = vsel %vm512_vm2, %v635_v54, 0.0  ;;  %v640_v8 = vmul.f32 %v1148_v39, %v1148_v39 }
  0xe5   : > { %v681_v49 = vsel %vm512_vm2, %v638_v48, 0.0  ;;  %v641_v21 = vmul.f32 %v1170_v55, %v1170_v55  ;;  %v683_v7 = vsel %vm512_vm2, %v639_v60, 0.0  ;;  %v592_v61 = vsel %vm512_vm2, %v1118_v17, 0.0 }
  0xe6   : > { %v569_v44 = vadd.f32 %v568_v31, %v567_v41  ;;  %v670_v16 = vadd.f32 %v669_v38, %v668_v12  ;;  %v677_v41 = vsel %vm512_vm2, %v636_v24, 0.0  ;;  %v642_v39 = vmul.f32 %v1022_v33, %v1022_v33 }
  0xe7   : > { %v594_v18 = vsel %vm512_vm2, %v1142_v32, 0.0  ;;  %v643_v55 = vmul.f32 %v1046_v45, %v1046_v45  ;;  %v687_v4 = vsel %vm512_vm2, %v641_v21, 0.0  ;;  %v644_v33 = vmul.f32 %v1070_v57, %v1070_v57 }
  0xe8   : > { %v571_v56 = vadd.f32 %v570_v47, %v569_v44  ;;  %v672_v27 = vadd.f32 %v671_v14, %v670_v16  ;;  %v679_v47 = vsel %vm512_vm2, %v637_v36, 0.0  ;;  %v598_v12 = vsel %vm512_vm2, %v1185_v0, 0.0 }
  0xe9   : > { %v645_v45 = vmul.f32 %v1094_v5, %v1094_v5  ;;  %v691_v14 = vsel %vm512_vm2, %v643_v55, 0.0  ;;  %v646_v57 = vmul.f32 %v1118_v17, %v1118_v17  ;;  %v693_v24 = vsel %vm512_vm2, %v644_v33, 0.0 }
  0xea   : > { %v573_v2 = vadd.f32 %v572_v50, %v571_v56  ;;  %v674_v31 = vadd.f32 %v673_v25, %v672_v27  ;;  %v590_v50 = vsel %vm512_vm2, %v1094_v5, 0.0  ;;  %v602_v25 = vsel %vm512_vm2, %v1048_v46, 0.0 }
  0xeb   : > { %v647_v5 = vmul.f32 %v1142_v32, %v1142_v32  ;;  %v604_v36 = vsel %vm512_vm2, %v1072_v58, 0.0  ;;  %v648_v17 = vmul.f32 %v1166_v52, %v1166_v52  ;;  %v649_v32 = vmul.f32 %v1185_v0, %v1185_v0 }
  0xec   : > { %v575_v9 = vadd.f32 %v574_v62, %v573_v2  ;;  %v676_v35 = vadd.f32 %v675_v29, %v674_v31  ;;  %v685_v2 = vsel %vm512_vm2, %v640_v8, 0.0  ;;  %v697_v31 = vsel %vm512_vm2, %v646_v57, 0.0 }
  0xed   : > { %v651_v0 = vmul.f32 %v1048_v46, %v1048_v46  ;;  %v703_v8 = vsel %vm512_vm2, %v649_v32, 0.0  ;;  %v614_v21 = vsel %vm512_vm2, %v1187_v1, 0.0  ;;  %v653_v46 = vmul.f32 %v1096_v6, %v1096_v6 }
  0xee   : > { %v577_v13 = vadd.f32 %v576_v3, %v575_v9  ;;  %v678_v44 = vadd.f32 %v677_v41, %v676_v35  ;;  %v596_v9 = vsel %vm512_vm2, %v1166_v52, 0.0  ;;  %v608_v35 = vsel %vm512_vm2, %v1120_v19, 0.0 }
  0xef   : > { %v650_v52 = vmul.f32 %v1024_v34, %v1024_v34  ;;  %v711_v55 = vsel %vm512_vm2, %v653_v46, 0.0  ;;  %vm623_vm4 = vcmask 57344  }
  0xf0   : > { %v579_v22 = vadd.f32 %v578_v11, %v577_v13  ;;  %v680_v51 = vadd.f32 %v679_v47, %v678_v44  ;;  %v689_v11 = vsel %vm512_vm2, %v642_v39, 0.0  ;;  %v701_v47 = vsel %vm512_vm2, %v648_v17, 0.0 }
  0xf2   : > { %v581_v28 = vadd.f32 %v580_v15, %v579_v22  ;;  %v682_v62 = vadd.f32 %v681_v49, %v680_v51  ;;  %v600_v15 = vsel %vm512_vm2, %v1024_v34, 0.0  ;;  %v612_v49 = vsel %vm512_vm2, %v1168_v53, 0.0 }
  0xf3   : > { %v652_v34 = vmul.f32 %v1072_v58, %v1072_v58 }
  0xf4   : > { %v583_v40 = vadd.f32 %v582_v26, %v581_v28  ;;  %v684_v20 = vadd.f32 %v683_v7, %v682_v62  ;;  %v695_v28 = vsel %vm512_vm2, %v645_v45, 0.0  ;;  %v707_v62 = vsel %vm512_vm2, %v651_v0, 0.0 }
  0xf6   : > { %v585_v42 = vadd.f32 %v584_v30, %v583_v40  ;;  %v686_v10 = vadd.f32 %v685_v2, %v684_v20  ;;  %v606_v40 = vsel %vm512_vm2, %v1096_v6, 0.0  ;;  %v654_v2 = vmul.f32 %v1120_v19, %v1120_v19 }
  0xf7   : > { %v656_v6 = vmul.f32 %v1168_v53, %v1168_v53  ;;  %v657_v19 = vmul.f32 %v1187_v1, %v1187_v1  ;;  %v552_v53 = vld [vmem:[%s1378_s4] sm:$0x1] }
  0xf8   : > { %v587_v59 = vadd.f32 %v586_v23, %v585_v42  ;;  %v688_v13 = vadd.f32 %v687_v4, %v686_v10  ;;  %v699_v23 = vsel %vm512_vm2, %v647_v5, 0.0  ;;  %v713_v10 = vsel %vm512_vm2, %v654_v2, 0.0  ;;  %v625_v5 = vld [vmem:[%s1379_s5] sm:$0x1] }
  0xfa   : > { %v589_v56 = vadd.f32 %v588_v43, %v587_v59  ;;  %v690_v16 = vadd.f32 %v689_v11, %v688_v13  ;;  %v610_v43 = vsel %vm512_vm2, %v1144_v37, 0.0 }
  0xfc   : > { %v591_v63 = vadd.f32 %v590_v50, %v589_v56  ;;  %v692_v26 = vadd.f32 %v691_v14, %v690_v16  ;;  %v705_v56 = vsel %vm512_vm2, %v650_v52, 0.0  ;;  %v719_v14 = vsel %vm512_vm2, %v657_v19, 0.0 }
  0xfe   : > { %v593_v3 = vadd.f32 %v592_v61, %v591_v63  ;;  %v694_v29 = vadd.f32 %v693_v24, %v692_v26 }
 0x100   : > { %v595_v38 = vadd.f32 %v594_v18, %v593_v3  ;;  %v696_v48 = vadd.f32 %v695_v28, %v694_v29  ;;  %v709_v18 = vsel %vm512_vm2, %v652_v34, 0.0  ;;  %v655_v3 = vmul.f32 %v1144_v37, %v1144_v37 }
 0x101   : > { %v717_v37 = vsel %vm512_vm2, %v656_v6, 0.0 }
 0x102   : > { %v597_v54 = vadd.f32 %v596_v9, %v595_v38  ;;  %v698_v42 = vadd.f32 %v697_v31, %v696_v48  ;;  %v715_v11 = vsel %vm512_vm2, %v655_v3, 0.0 }
 0x104   : > { %v599_v22 = vadd.f32 %v598_v12, %v597_v54  ;;  %v700_v44 = vadd.f32 %v699_v23, %v698_v42 }
 0x106   : > { %v601_v27 = vadd.f32 %v600_v15, %v599_v22  ;;  %v702_v50 = vadd.f32 %v701_v47, %v700_v44 }
 0x108   : > { %v603_v30 = vadd.f32 %v602_v25, %v601_v27  ;;  %v704_v7 = vadd.f32 %v703_v8, %v702_v50 }
 0x10a   : > { %v605_v41 = vadd.f32 %v604_v36, %v603_v30  ;;  %v706_v63 = vadd.f32 %v705_v56, %v704_v7 }
 0x10c   : > { %v607_v60 = vadd.f32 %v606_v40, %v605_v41  ;;  %v708_v58 = vadd.f32 %v707_v62, %v706_v63 }
 0x10e   : > { %v609_v59 = vadd.f32 %v608_v35, %v607_v60  ;;  %v710_v4 = vadd.f32 %v709_v18, %v708_v58 }
 0x110   : > { %v611_v51 = vadd.f32 %v610_v43, %v609_v59  ;;  %v712_v38 = vadd.f32 %v711_v55, %v710_v4 }
 0x112   : > { %v613_v61 = vadd.f32 %v612_v49, %v611_v51  ;;  %v714_v12 = vadd.f32 %v713_v10, %v712_v38 }
 0x114   : > { %v615_v39 = vadd.f32 %v614_v21, %v613_v61  ;;  %v716_v54 = vadd.f32 %v715_v11, %v714_v12 }
 0x116   : > { %v616_v20 = vrot.slane %v615_v39, 4  ;;  %v718_v15 = vadd.f32 %v717_v37, %v716_v54 }
 0x118   : > { %v617_v9 = vadd.f32 %v616_v20, %v615_v39  ;;  %v720_v22 = vadd.f32 %v719_v14, %v718_v15 }
 0x11a   : > { %v618_v33 = vrot.slane %v617_v9, 2  ;;  %v721_v1 = vrot.slane %v720_v22, 4 }
 0x11c   : > { %v619_v13 = vadd.f32 %v618_v33, %v617_v9  ;;  %v722_v24 = vadd.f32 %v721_v1, %v720_v22 }
 0x11e   : > { %v620_v45 = vrot.slane %v619_v13, 1  ;;  %v723_v25 = vrot.slane %v722_v24, 2 }
 0x120   : > { %v621_v16 = vadd.f32 %v620_v45, %v619_v13  ;;  %v724_v26 = vadd.f32 %v723_v25, %v722_v24 }
 0x122   : > { %v622_v57 = vadd.f32 %v621_v16, %v552_v53  ;;  %v725_v27 = vrot.slane %v724_v26, 1 }
 0x124   : > { %624 = vst.msk [vmem:[%s1378_s4] sm:$0x1] %vm623_vm4, %v622_v57  ;;  %v726_v28 = vadd.f32 %v725_v27, %v724_v26 }
 0x126   : > { %v727_v36 = vadd.f32 %v726_v28, %v625_v5 }
 0x128   : > { %728 = vst.msk [vmem:[%s1379_s5] sm:$0x1] %vm623_vm4, %v727_v36 }
 0x129 PF: > { %s16_s18 = sadd.s32 1, %s925_s18  }
 0x12a   : > { %p13_p5 = scmp.ge.s32.totalorder %s16_s18, 4  }
 0x12c   :  { %15 = sbr.rel (!%p13_p5) target bundleno = 1 (0x1), region = 82 }

// kernel: fire_module_forward.3
= control target key start
LH: loop header
LB: loop body
LE: loop exit
PB: predicated region body
PF: predicated region fallthrough
CT: control target
= control target key end

     0   :  { %10 = vsyncpa [#allocation4], 0  ;;  %s3947_s0 = inlined_call_operand.vmem [shape: f32[2,16,16,8], index: 0, kind: input, shape index: {}]   ;;  %s3948_s1 = inlined_call_operand.vmem [shape: f32[1,8], index: 1, kind: input, shape index: {}]   ;;  %s3949_s2 = inlined_call_operand.vmem [shape: f32[1,8], index: 2, kind: input, shape index: {}]   ;;  %s3950_s3 = inlined_call_operand.vmem [shape: bf16[9,8,32], index: 3, kind: input, shape index: {}]   ;;  %s3951_s4 = inlined_call_operand.vmem [shape: f32[1,32], index: 4, kind: input, shape index: {}]   ;;  %s3952_s5 = inlined_call_operand.hbm [shape: f32[2,16,16,32], index: 5, kind: output, shape index: {}]  }
   0x1   :  { %12 = vsyncpa [#allocation4 + $0x1], 0  ;;  %s2891_s18 = smov 0   ;;  %s2893_s19 = smov 0  }
   0x2   :  { %s2895_s20 = smov 0   ;;  %s2897_s21 = smov 0  }
   0x3 LB: > { %s2912_s22 = sadd.s32 4294967295, %s2856_s21   ;;  %s2578_s23 = sadd.s32 4294967294, %s2856_s21   ;;  %s2856_s21 = sphi %s2897_s21, %s4004_s21   ;;  %s2852_s20 = sphi %s2895_s20, %s4003_s20   ;;  %s2848_s19 = sphi %s2893_s19, %s4002_s19   ;;  %s2844_s18 = sphi %s2891_s18, %s4001_s18  }
   0x4   : > { %s2916_s24 = sadd.s32 1, %s2856_s21   ;;  %s135_s25 = sadd.s32 1, %s2852_s20 }
   0x5   : > { %s132_s26 = ssub.s32 %s2856_s21, %s2916_s24  ;;  %p145_p0 = scmp.ne.s32.totalorder %s2852_s20, %s2848_s19 }
   0x6   : > { %p133_p1 = scmp.eq.s32.totalorder %s132_s26, 0  ;;  %p146_p2 = scmp.eq.s32.totalorder %s2912_s22, 1 }
   0x7   : > { %p151_p3 = scmp.ne.s32.totalorder %s2848_s19, %s2844_s18  ;;  %p152_p4 = scmp.eq.s32.totalorder %s2578_s23, 1 }
   0x8   : > { %s2927_s27 = scalar_select %p133_p1, %s2852_s20, %s135_s25  }
   0x9   : > { %p2929_p5 = por %p146_p2, %p145_p0  ;;  %p2933_p6 = por %p152_p4, %p151_p3 }
   0xa   : > { %p2581_p7 = scmp.ge.s32.totalorder %s2856_s21, 1  ;;  %p190_p8 = scmp.lt.s32.totalorder %s2856_s21, 3 }
   0xc   : > { %p191_p9 = pnand %p2581_p7, %p190_p8 }
   0xe   : > { %194 = sbr.rel (%p191_p9) target bundleno = 801 (0x321), region = 40 }
  0x13   : > { %v2585_v0 = vld [vmem:[%s3950_s3 + $0x4] sm:$0xf]  ;;  %vm611_vm0 = vcmask 1043456   ;;  %p218_p10 = scmp.lt.s32.totalorder %s2912_s22, 1  ;;  %vm224_vm1 = vcmask 64512   ;;  %v2858_v2 = vmov 0.0  }
  0x14   : > { %v613_v1 = vsel %vm611_vm0, %v2585_v0, 0  ;;  %271 = vst.msk [vmem:[#allocation2 + $0x168] sm:$0xff] %vm224_vm1, %v2858_v2  ;;  %v2952_v3 = vld [vmem:[%s3948_s1] ss:$0 sm:$0xff]  ;;  %v2618_v16 = vld [vmem:[%s3950_s3 + $0x8] sm:$0xf] }
  0x15   : > { %2744 = vmatpush.bf16.msra.mxu1 %v613_v1  ;;  %2745 = vmatpush.bf16.msra.mxu2 %v613_v1  ;;  %s219_s7 = scalar_select %p218_p10, %s2912_s22, 1  ;;  %272 = vst.msk [vmem:[#allocation2 + $0x170] sm:$0xff] %vm224_vm1, %v2858_v2  ;;  %v2962_v4 = vld [vmem:[%s3949_s2] ss:$0 sm:$0xff]  ;;  %v2635_v18 = vld [vmem:[%s3950_s3 + $0xc] sm:$0xf] }
  0x16   : > { %2746 = vmatpush.bf16.msra.mxu3 %v613_v1  ;;  %622 = vmatpush.bf16.msra.mxu0 %v613_v1  ;;  %254 = vst.msk [vmem:[#allocation2 + $0xe0] sm:$0xff] %vm224_vm1, %v2858_v2  ;;  %v943_v19 = vsel %vm611_vm0, %v2618_v16, 0  ;;  %v1165_v20 = vsel %vm611_vm0, %v2635_v18, 0  ;;  %v512_v21 = vld [vmem:[%s3950_s3] sm:$0xf]  ;;  %vm228_vm2 = vcmask 57344  }
  0x17   : > { %s2742_s10 = sshll.u32 %s219_s7, 8  ;;  %255 = vst.msk [vmem:[#allocation2 + $0xe8] sm:$0xff] %vm224_vm1, %v2858_v2  ;;  %v753_v22 = vsel %vm611_vm0, %v512_v21, 0  ;;  %v2652_v23 = vld [vmem:[%s3950_s3 + $0x10] sm:$0xf]  ;;  %vm2467_vm3 = vcmask 261120  }
  0x18   : > { %s2957_s13 = scalar_lea.vmem %s3947_s0, %s2742_s10  ;;  %256 = vst.msk [vmem:[#allocation2 + $0xf0] sm:$0xff] %vm224_vm1, %v2858_v2  ;;  %v1387_v24 = vsel %vm611_vm0, %v2652_v23, 0  ;;  %s2743_s9 = sshll.u32 %s2912_s22, 8 }
  0x19   : > { %v332_v5 = vld [vmem:[%s2957_s13 + $0x30] sm:$0xff]  ;;  %v333_v6 = vld [vmem:[%s2957_s13 + $0x38] sm:$0xff]  ;;  %258 = vst.msk [vmem:[#allocation2 + $0x100] sm:$0xff] %vm224_vm1, %v2858_v2  ;;  %952 = vmatpush.bf16.msrb.mxu2 %v943_v19  ;;  %762 = vmatpush.bf16.msrb.mxu1 %v753_v22  ;;  %v334_v31 = vld [vmem:[%s2957_s13 + $0x40] sm:$0xff]  ;;  %s2512_s12 = scalar_lea.hbm %s3952_s5, %s2743_s9  ;;  %s2814_s26 = scalar_lea.hbm %s3952_s5, 512 }
  0x1a   : > { %v368_v7 = vmul.f32 %v2952_v3, %v332_v5  ;;  %v369_v8 = vmul.f32 %v2952_v3, %v333_v6  ;;  %259 = vst.msk [vmem:[#allocation2 + $0x108] sm:$0xff] %vm224_vm1, %v2858_v2  ;;  %1174 = vmatpush.bf16.msrb.mxu3 %v1165_v20  ;;  %1396 = vmatpush.bf16.msrb.mxu0 %v1387_v24  ;;  %v340_v25 = vld [vmem:[%s2957_s13 + $0x70] sm:$0xff]  ;;  %v341_v26 = vld [vmem:[%s2957_s13 + $0x78] sm:$0xff]  ;;  %v335_v33 = vld [vmem:[%s2957_s13 + $0x48] sm:$0xff]  ;;  %s2515_s15 = sshll.u32 %s2512_s12, 4  ;;  %s2516_s15 = int_to_ptr.hbm [resolvable:$true] %s2515_s15 }
  0x1b   : > { %260 = vst.msk [vmem:[#allocation2 + $0x110] sm:$0xff] %vm224_vm1, %v2858_v2  ;;  %v348_v27 = vld [vmem:[%s2957_s13 + $0xb0] sm:$0xff]  ;;  %v376_v28 = vmul.f32 %v2952_v3, %v340_v25  ;;  %v349_v29 = vld [vmem:[%s2957_s13 + $0xb8] sm:$0xff]  ;;  %v377_v30 = vmul.f32 %v2952_v3, %v341_v26  ;;  %v342_v35 = vld [vmem:[%s2957_s13 + $0x80] sm:$0xff]  ;;  %v370_v37 = vmul.f32 %v2952_v3, %v334_v31  ;;  %v371_v40 = vmul.f32 %v2952_v3, %v335_v33  ;;  %s2808_s16 = sshra.s32 %s2516_s15, 4  ;;  %s2809_s16 = int_to_ptr.hbm [resolvable:$true] %s2808_s16 }
  0x1c   : > { %v404_v9 = vadd.f32 %v2962_v4, %v368_v7  ;;  %v405_v10 = vadd.f32 %v2962_v4, %v369_v8  ;;  %262 = vst.msk [vmem:[#allocation2 + $0x120] sm:$0xff] %vm224_vm1, %v2858_v2  ;;  %v384_v32 = vmul.f32 %v2952_v3, %v348_v27  ;;  %v385_v34 = vmul.f32 %v2952_v3, %v349_v29  ;;  %v343_v38 = vld [vmem:[%s2957_s13 + $0x88] sm:$0xff]  ;;  %v350_v41 = vld [vmem:[%s2957_s13 + $0xc0] sm:$0xff]  ;;  %v336_v53 = vld [vmem:[%s2957_s13 + $0x50] sm:$0xff]  ;;  %s2810_s17 = scalar_lea.hbm %s2809_s16, 256  ;;  %p2815_p0 = scmp.lt.s32.totalorder %s2809_s16, %s3952_s5 }
  0x1d   : > { %263 = vst.msk [vmem:[#allocation2 + $0x128] sm:$0xff] %vm224_vm1, %v2858_v2  ;;  %v412_v36 = vadd.f32 %v2962_v4, %v376_v28  ;;  %v413_v39 = vadd.f32 %v2962_v4, %v377_v30  ;;  %v378_v43 = vmul.f32 %v2952_v3, %v342_v35  ;;  %v351_v44 = vld [vmem:[%s2957_s13 + $0xc8] sm:$0xff]  ;;  %v379_v46 = vmul.f32 %v2952_v3, %v343_v38  ;;  %v326_v47 = vld [vmem:[%s2957_s13] sm:$0xff]  ;;  %v337_v56 = vld [vmem:[%s2957_s13 + $0x58] sm:$0xff]  ;;  %p2811_p11 = scmp.ne.s32.totalorder %s2809_s16, %s2810_s17  ;;  %p2816_p1 = scmp.lt.s32.totalorder %s2814_s26, %s2810_s17 }
  0x1e   : > { %437 = vst.msk [vmem:[#allocation2 + $0x168] sm:$0xff] %vm224_vm1, %v404_v9  ;;  %v513_v14 = vld [vmem:[#allocation2 + $0xe8] sm:$0xff]  ;;  %v420_v42 = vadd.f32 %v2962_v4, %v384_v32  ;;  %v421_v45 = vadd.f32 %v2962_v4, %v385_v34  ;;  %v406_v48 = vadd.f32 %v2962_v4, %v370_v37  ;;  %v386_v49 = vmul.f32 %v2952_v3, %v350_v41  ;;  %v344_v59 = vld [vmem:[%s2957_s13 + $0x90] sm:$0xff]  ;;  %v345_v62 = vld [vmem:[%s2957_s13 + $0x98] sm:$0xff] }
  0x1f   : > { %438 = vst.msk [vmem:[#allocation2 + $0x170] sm:$0xff] %vm224_vm1, %v405_v10  ;;  %v514_v15 = vld [vmem:[#allocation2 + $0xf0] sm:$0xff]  ;;  %v327_v50 = vld [vmem:[%s2957_s13 + $0x8] sm:$0xff]  ;;  %v407_v51 = vadd.f32 %v2962_v4, %v371_v40  ;;  %v387_v52 = vmul.f32 %v2952_v3, %v351_v44  ;;  %v414_v54 = vadd.f32 %v2962_v4, %v378_v43  ;;  %v362_v55 = vmul.f32 %v2952_v3, %v326_v47  ;;  %v353_v7 = vld [vmem:[%s2957_s13 + $0xd8] sm:$0xff]  ;;  %p2812_p12 = pnand %p2811_p11, %p2929_p5  ;;  %p2817_p2 = por %p2816_p1, %p2815_p0 }
  0x20   : > { %264 = vst.msk [vmem:[#allocation2 + $0x130] sm:$0xff] %vm224_vm1, %v2858_v2  ;;  %v545_v17 = vpack.c.bf16 %v514_v15, %v513_v14  ;;  %v415_v57 = vadd.f32 %v2962_v4, %v379_v46  ;;  %v363_v58 = vmul.f32 %v2952_v3, %v327_v50  ;;  %v422_v60 = vadd.f32 %v2962_v4, %v386_v49  ;;  %v352_v1 = vld [vmem:[%s2957_s13 + $0xd0] sm:$0xff]  ;;  %v329_v16 = vld [vmem:[%s2957_s13 + $0x18] sm:$0xff]  ;;  %v338_v32 = vld [vmem:[%s2957_s13 + $0x60] sm:$0xff] }
  0x21   : > { %266 = vst.msk [vmem:[#allocation2 + $0x140] sm:$0xff] %vm224_vm1, %v2858_v2  ;;  %v372_v61 = vmul.f32 %v2952_v3, %v336_v53  ;;  %v423_v63 = vadd.f32 %v2962_v4, %v387_v52  ;;  %v373_v0 = vmul.f32 %v2952_v3, %v337_v56  ;;  %v398_v5 = vadd.f32 %v2962_v4, %v362_v55  ;;  %v339_v33 = vld [vmem:[%s2957_s13 + $0x68] sm:$0xff]  ;;  %v346_v37 = vld [vmem:[%s2957_s13 + $0xa0] sm:$0xff]  ;;  %p2813_p13 = pneg %p2812_p12 }
  0x22   : > { %267 = vst.msk [vmem:[#allocation2 + $0x148] sm:$0xff] %vm224_vm1, %v2858_v2  ;;  %2586 = vmatmul.msk.bf16.vlgmr.msra.gmra.mxu0 %vm224_vm1, %v545_v17  ;;  %v380_v6 = vmul.f32 %v2952_v3, %v344_v59  ;;  %v399_v9 = vadd.f32 %v2962_v4, %v363_v58  ;;  %v381_v10 = vmul.f32 %v2952_v3, %v345_v62  ;;  %v347_v38 = vld [vmem:[%s2957_s13 + $0xa8] sm:$0xff]  ;;  %v330_v46 = vld [vmem:[%s2957_s13 + $0x20] sm:$0xff] }
  0x23   : > { %268 = vst.msk [vmem:[#allocation2 + $0x150] sm:$0xff] %vm224_vm1, %v2858_v2  ;;  %v408_v14 = vadd.f32 %v2962_v4, %v372_v61  ;;  %v388_v15 = vmul.f32 %v2952_v3, %v352_v1  ;;  %v409_v19 = vadd.f32 %v2962_v4, %v373_v0  ;;  %v389_v20 = vmul.f32 %v2952_v3, %v353_v7  ;;  %v355_v43 = vld [vmem:[%s2957_s13 + $0xe8] sm:$0xff]  ;;  %p2818_p3 = pnand %p2817_p2, %p2813_p13 }
  0x24   : > { %270 = vst.msk [vmem:[#allocation2 + $0x160] sm:$0xff] %vm224_vm1, %v2858_v2  ;;  %v416_v22 = vadd.f32 %v2962_v4, %v380_v6  ;;  %v417_v26 = vadd.f32 %v2962_v4, %v381_v10  ;;  %v365_v27 = vmul.f32 %v2952_v3, %v329_v16  ;;  %v374_v35 = vmul.f32 %v2952_v3, %v338_v32  ;;  %v331_v47 = vld [vmem:[%s2957_s13 + $0x28] sm:$0xff] }
  0x25   : > { %v521_v11 = vld [vmem:[#allocation2 + $0x168] sm:$0xff]  ;;  %274 = vst.msk [vmem:[#allocation2 + $0x180] sm:$0xff] %vm224_vm1, %v2858_v2  ;;  %v424_v29 = vadd.f32 %v2962_v4, %v388_v15  ;;  %v425_v31 = vadd.f32 %v2962_v4, %v389_v20  ;;  %v382_v40 = vmul.f32 %v2952_v3, %v346_v37  ;;  %v383_v41 = vmul.f32 %v2952_v3, %v347_v38 }
  0x26   : > { %v522_v12 = vld [vmem:[#allocation2 + $0x170] sm:$0xff]  ;;  %275 = vst.msk [vmem:[#allocation2 + $0x188] sm:$0xff] %vm224_vm1, %v2858_v2  ;;  %v410_v44 = vadd.f32 %v2962_v4, %v374_v35  ;;  %v391_v50 = vmul.f32 %v2952_v3, %v355_v43  ;;  %v366_v53 = vmul.f32 %v2952_v3, %v330_v46  ;;  %v367_v56 = vmul.f32 %v2952_v3, %v331_v47 }
  0x27   : > { %v2972_v13 = vpack.c.bf16 %v522_v12, %v521_v11  ;;  %276 = vst.msk [vmem:[#allocation2 + $0x190] sm:$0xff] %vm224_vm1, %v2858_v2  ;;  %v328_v11 = vld [vmem:[%s2957_s13 + $0x10] sm:$0xff]  ;;  %v418_v52 = vadd.f32 %v2962_v4, %v382_v40  ;;  %v419_v55 = vadd.f32 %v2962_v4, %v383_v41 }
  0x28   : > { %278 = vst.msk [vmem:[#allocation2 + $0x1a0] sm:$0xff] %vm224_vm1, %v2858_v2  ;;  %v364_v23 = vmul.f32 %v2952_v3, %v328_v11  ;;  %v403_v0 = vadd.f32 %v2962_v4, %v367_v56  ;;  %v465_v40 = vld [vmem:[#allocation2 + $0xef] sm:$0xff] }
  0x29   : > { %2590 = vmatmul.msk.bf16.vlgmr.msra.gmra.mxu1 %vm224_vm1, %v2972_v13  ;;  %279 = vst.msk [vmem:[#allocation2 + $0x1a8] sm:$0xff] %vm224_vm1, %v2858_v2  ;;  %v844_v43 = vld [vmem:[#allocation2 + $0xe9] sm:$0xff] }
  0x2a   : > { %280 = vst.msk [vmem:[#allocation2 + $0x1b0] sm:$0xff] %vm224_vm1, %v2858_v2  ;;  %v400_v34 = vadd.f32 %v2962_v4, %v364_v23 }
  0x2b   : > { %282 = vst.msk [vmem:[#allocation2 + $0x1c0] sm:$0xff] %vm224_vm1, %v2858_v2 }
  0x2c   : > { %283 = vst.msk [vmem:[#allocation2 + $0x1c8] sm:$0xff] %vm224_vm1, %v2858_v2 }
  0x2d   : > { %284 = vst.msk [vmem:[#allocation2 + $0x1d0] sm:$0xff] %vm224_vm1, %v2858_v2 }
  0x2e   : > { %286 = vst.msk [vmem:[#allocation2 + $0x1e0] sm:$0xff] %vm224_vm1, %v2858_v2 }
  0x2f   : > { %287 = vst.msk [vmem:[#allocation2 + $0x1e8] sm:$0xff] %vm224_vm1, %v2858_v2 }
  0x30   : > { %288 = vst.msk [vmem:[#allocation2 + $0x1f0] sm:$0xff] %vm224_vm1, %v2858_v2 }
  0x31   : > { %290 = vst.msk [vmem:[#allocation2 + $0x200] sm:$0xff] %vm224_vm1, %v2858_v2 }
  0x32   : > { %291 = vst.msk [vmem:[#allocation2 + $0x208] sm:$0xff] %vm224_vm1, %v2858_v2 }
  0x33   : > { %292 = vst.msk [vmem:[#allocation2 + $0x210] sm:$0xff] %vm224_vm1, %v2858_v2 }
  0x34   : > { %294 = vst.msk [vmem:[#allocation2 + $0x220] sm:$0xff] %vm224_vm1, %v2858_v2 }
  0x35   : > { %295 = vst.msk [vmem:[#allocation2 + $0x228] sm:$0xff] %vm224_vm1, %v2858_v2 }
  0x36   : > { %296 = vst.msk [vmem:[#allocation2 + $0x230] sm:$0xff] %vm224_vm1, %v2858_v2 }
  0x37   : > { %298 = vst.msk [vmem:[#allocation2 + $0x240] sm:$0xff] %vm224_vm1, %v2858_v2 }
  0x38   : > { %299 = vst.msk [vmem:[#allocation2 + $0x248] sm:$0xff] %vm224_vm1, %v2858_v2 }
  0x39   : > { %300 = vst.msk [vmem:[#allocation2 + $0x250] sm:$0xff] %vm224_vm1, %v2858_v2 }
  0x3a   : > { %302 = vst.msk [vmem:[#allocation2 + $0x260] sm:$0xff] %vm224_vm1, %v2858_v2 }
  0x3b   : > { %303 = vst.msk [vmem:[#allocation2 + $0x268] sm:$0xff] %vm224_vm1, %v2858_v2 }
  0x3c   : > { %304 = vst.msk [vmem:[#allocation2 + $0x270] sm:$0xff] %vm224_vm1, %v2858_v2 }
  0x3d   : > { %306 = vst.msk [vmem:[#allocation2 + $0x280] sm:$0xff] %vm224_vm1, %v2858_v2 }
  0x3e   : > { %307 = vst.msk [vmem:[#allocation2 + $0x288] sm:$0xff] %vm224_vm1, %v2858_v2 }
  0x3f   : > { %308 = vst.msk [vmem:[#allocation2 + $0x290] sm:$0xff] %vm224_vm1, %v2858_v2 }
  0x40   : > { %310 = vst.msk [vmem:[#allocation2 + $0x2a0] sm:$0xff] %vm224_vm1, %v2858_v2 }
  0x41   : > { %311 = vst.msk [vmem:[#allocation2 + $0x2a8] sm:$0xff] %vm224_vm1, %v2858_v2 }
  0x42   : > { %312 = vst.msk [vmem:[#allocation2 + $0x2b0] sm:$0xff] %vm224_vm1, %v2858_v2 }
  0x43   : > { %314 = vst.msk [vmem:[#allocation2 + $0x2c0] sm:$0xff] %vm224_vm1, %v2858_v2 }
  0x44   : > { %315 = vst.msk [vmem:[#allocation2 + $0x2c8] sm:$0xff] %vm224_vm1, %v2858_v2 }
  0x45   : > { %316 = vst.msk [vmem:[#allocation2 + $0x2d0] sm:$0xff] %vm224_vm1, %v2858_v2 }
  0x46   : > { %318 = vst.msk [vmem:[#allocation2 + $0x2e0] sm:$0xff] %vm224_vm1, %v2858_v2 }
  0x47   : > { %319 = vst.msk [vmem:[#allocation2 + $0x2e8] sm:$0xff] %vm224_vm1, %v2858_v2 }
  0x48   : > { %320 = vst.msk [vmem:[#allocation2 + $0x2f0] sm:$0xff] %vm224_vm1, %v2858_v2 }
  0x49   : > { %322 = vst.msk [vmem:[#allocation2 + $0x300] sm:$0xff] %vm224_vm1, %v2858_v2 }
  0x4a   : > { %323 = vst.msk [vmem:[#allocation2 + $0x308] sm:$0xff] %vm224_vm1, %v2858_v2 }
  0x4b   : > { %324 = vst.msk [vmem:[#allocation2 + $0x310] sm:$0xff] %vm224_vm1, %v2858_v2 }
  0x4c   : > { %445 = vst.msk [vmem:[#allocation2 + $0x1e8] sm:$0xff] %vm224_vm1, %v412_v36  ;;  %v375_v36 = vmul.f32 %v2952_v3, %v339_v33 }
  0x4d   : > { %446 = vst.msk [vmem:[#allocation2 + $0x1f0] sm:$0xff] %vm224_vm1, %v413_v39  ;;  %v401_v39 = vadd.f32 %v2962_v4, %v365_v27 }
  0x4e   : > { %453 = vst.msk [vmem:[#allocation2 + $0x268] sm:$0xff] %vm224_vm1, %v420_v42  ;;  %v354_v42 = vld [vmem:[%s2957_s13 + $0xe0] sm:$0xff]  ;;  %v411_v49 = vadd.f32 %v2962_v4, %v375_v36 }
  0x4f   : > { %454 = vst.msk [vmem:[#allocation2 + $0x270] sm:$0xff] %vm224_vm1, %v421_v45  ;;  %v390_v45 = vmul.f32 %v2952_v3, %v354_v42 }
  0x50   : > { %439 = vst.msk [vmem:[#allocation2 + $0x188] sm:$0xff] %vm224_vm1, %v406_v48 }
  0x51   : > { %440 = vst.msk [vmem:[#allocation2 + $0x190] sm:$0xff] %vm224_vm1, %v407_v51  ;;  %v426_v59 = vadd.f32 %v2962_v4, %v390_v45 }
  0x52   : > { %447 = vst.msk [vmem:[#allocation2 + $0x208] sm:$0xff] %vm224_vm1, %v414_v54 }
  0x53   : > { %v529_v8 = vld [vmem:[#allocation2 + $0x1e8] sm:$0xff]  ;;  %448 = vst.msk [vmem:[#allocation2 + $0x210] sm:$0xff] %vm224_vm1, %v415_v57 }
  0x54   : > { %v530_v12 = vld [vmem:[#allocation2 + $0x1f0] sm:$0xff]  ;;  %455 = vst.msk [vmem:[#allocation2 + $0x288] sm:$0xff] %vm224_vm1, %v422_v60  ;;  %v427_v60 = vadd.f32 %v2962_v4, %v391_v50 }
  0x55   : > { %v3156_v17 = vpack.c.bf16 %v530_v12, %v529_v8  ;;  %v537_v18 = vld [vmem:[#allocation2 + $0x268] sm:$0xff]  ;;  %456 = vst.msk [vmem:[#allocation2 + $0x290] sm:$0xff] %vm224_vm1, %v423_v63  ;;  %v402_v63 = vadd.f32 %v2962_v4, %v366_v53 }
  0x56   : > { %v538_v21 = vld [vmem:[#allocation2 + $0x270] sm:$0xff]  ;;  %431 = vst.msk [vmem:[#allocation2 + $0x108] sm:$0xff] %vm224_vm1, %v398_v5 }
  0x57   : > { %2594 = vmatmul.msk.bf16.vlgmr.msra.gmra.mxu2 %vm224_vm1, %v3156_v17  ;;  %v3166_v24 = vpack.c.bf16 %v538_v21, %v537_v18  ;;  %v523_v25 = vld [vmem:[#allocation2 + $0x188] sm:$0xff]  ;;  %432 = vst.msk [vmem:[#allocation2 + $0x110] sm:$0xff] %vm224_vm1, %v399_v9  ;;  %v2686_v21 = vld [vmem:[%s3950_s3 + $0x18] sm:$0xf] }
  0x58   : > { %v524_v28 = vld [vmem:[#allocation2 + $0x190] sm:$0xff]  ;;  %441 = vst.msk [vmem:[#allocation2 + $0x1a8] sm:$0xff] %vm224_vm1, %v408_v14 }
  0x59   : > { %2598 = vmatmul.msk.bf16.vlgmr.msra.gmra.mxu3 %vm224_vm1, %v3166_v24  ;;  %v3175_v30 = vpack.c.bf16 %v524_v28, %v523_v25  ;;  %442 = vst.msk [vmem:[#allocation2 + $0x1b0] sm:$0xff] %vm224_vm1, %v409_v19  ;;  %v531_v57 = vld [vmem:[#allocation2 + $0x208] sm:$0xff]  ;;  %v2669_v28 = vld [vmem:[%s3950_s3 + $0x14] sm:$0xf] }
  0x5a   : > { %449 = vst.msk [vmem:[#allocation2 + $0x228] sm:$0xff] %vm224_vm1, %v416_v22  ;;  %v532_v58 = vld [vmem:[#allocation2 + $0x210] sm:$0xff]  ;;  %v2703_v22 = vld [vmem:[%s3950_s3 + $0x1c] sm:$0xf] }
  0x5b   : > { %2591 = vmatmul.msk.bf16.gmra.mxu1 %vm224_vm1, %v3175_v30  ;;  %450 = vst.msk [vmem:[#allocation2 + $0x230] sm:$0xff] %vm224_vm1, %v417_v26  ;;  %v539_v61 = vld [vmem:[#allocation2 + $0x288] sm:$0xff]  ;;  %v3219_v3 = vpack.c.bf16 %v532_v58, %v531_v57  ;;  %v1832_v26 = vsel %vm611_vm0, %v2686_v21, 0  ;;  %v2054_v27 = vsel %vm611_vm0, %v2703_v22, 0 }
  0x5c   : > { %457 = vst.msk [vmem:[#allocation2 + $0x2a8] sm:$0xff] %vm224_vm1, %v424_v29  ;;  %v540_v62 = vld [vmem:[#allocation2 + $0x290] sm:$0xff]  ;;  %1841 = vmatpush.bf16.msra.mxu2 %v1832_v26  ;;  %v2720_v29 = vld [vmem:[%s3950_s3 + $0x20] sm:$0xf]  ;;  %2063 = vmatpush.bf16.msra.mxu3 %v2054_v27 }
  0x5d   : > { %v515_v48 = vld [vmem:[#allocation2 + $0x108] sm:$0xff]  ;;  %458 = vst.msk [vmem:[#allocation2 + $0x2b0] sm:$0xff] %vm224_vm1, %v425_v31  ;;  %v3224_v6 = vpack.c.bf16 %v540_v62, %v539_v61  ;;  %v1609_v31 = vsel %vm611_vm0, %v2669_v28, 0  ;;  %v2276_v32 = vsel %vm611_vm0, %v2720_v29, 0 }
  0x5e   : > { %v516_v51 = vld [vmem:[#allocation2 + $0x110] sm:$0xff]  ;;  %433 = vst.msk [vmem:[#allocation2 + $0x128] sm:$0xff] %vm224_vm1, %v400_v34  ;;  %1618 = vmatpush.bf16.msra.mxu1 %v1609_v31  ;;  %2285 = vmatpush.bf16.msra.mxu0 %v2276_v32  ;;  %v1066_v45 = vld [vmem:[#allocation2 + $0x107] sm:$0xff] }
  0x5f   : > { %v3206_v54 = vpack.c.bf16 %v516_v51, %v515_v48  ;;  %434 = vst.msk [vmem:[#allocation2 + $0x130] sm:$0xff] %vm224_vm1, %v401_v39  ;;  %v525_v1 = vld [vmem:[#allocation2 + $0x1a8] sm:$0xff] }
  0x60   : > { %443 = vst.msk [vmem:[#allocation2 + $0x1c8] sm:$0xff] %vm224_vm1, %v410_v44  ;;  %v526_v5 = vld [vmem:[#allocation2 + $0x1b0] sm:$0xff]  ;;  %v464_v39 = vld [vmem:[#allocation2 + $0xe7] sm:$0xff] }
  0x61   : > { %2587 = vmatmul.msk.bf16.gmra.mxu0 %vm224_vm1, %v3206_v54  ;;  %444 = vst.msk [vmem:[#allocation2 + $0x1d0] sm:$0xff] %vm224_vm1, %v411_v49  ;;  %v3230_v7 = vpack.c.bf16 %v526_v5, %v525_v1  ;;  %v533_v10 = vld [vmem:[#allocation2 + $0x228] sm:$0xff]  ;;  %v496_v42 = vpack.c.bf16 %v465_v40, %v464_v39 }
  0x62   : > { %451 = vst.msk [vmem:[#allocation2 + $0x248] sm:$0xff] %vm224_vm1, %v418_v52  ;;  %v534_v11 = vld [vmem:[#allocation2 + $0x230] sm:$0xff]  ;;  %v1072_v62 = vld [vmem:[#allocation2 + $0x167] sm:$0xff] }
  0x63   : > { %452 = vst.msk [vmem:[#allocation2 + $0x250] sm:$0xff] %vm224_vm1, %v419_v55  ;;  %v541_v12 = vld [vmem:[#allocation2 + $0x2a8] sm:$0xff]  ;;  %v3241_v15 = vpack.c.bf16 %v534_v11, %v533_v10 }
  0x64   : > { %459 = vst.msk [vmem:[#allocation2 + $0x2c8] sm:$0xff] %vm224_vm1, %v426_v59  ;;  %v542_v14 = vld [vmem:[#allocation2 + $0x2b0] sm:$0xff]  ;;  %v1074_v11 = vld [vmem:[#allocation2 + $0x187] sm:$0xff] }
  0x65   : > { %460 = vst.msk [vmem:[#allocation2 + $0x2d0] sm:$0xff] %vm224_vm1, %v427_v60  ;;  %v517_v4 = vld [vmem:[#allocation2 + $0x128] sm:$0xff]  ;;  %v3247_v19 = vpack.c.bf16 %v542_v14, %v541_v12 }
  0x66   : > { %435 = vst.msk [vmem:[#allocation2 + $0x148] sm:$0xff] %vm224_vm1, %v402_v63  ;;  %v518_v8 = vld [vmem:[#allocation2 + $0x130] sm:$0xff]  ;;  %v1068_v50 = vld [vmem:[#allocation2 + $0x127] sm:$0xff] }
  0x67   : > { %2595 = vmatmul.msk.bf16.gmra.mxu2 %vm224_vm1, %v3219_v3  ;;  %436 = vst.msk [vmem:[#allocation2 + $0x150] sm:$0xff] %vm224_vm1, %v403_v0  ;;  %v3237_v9 = vpack.c.bf16 %v518_v8, %v517_v4  ;;  %v527_v16 = vld [vmem:[#allocation2 + $0x1c8] sm:$0xff] }
  0x68   : > { %257 = vst.msk [vmem:[#allocation2 + $0xf8] sm:$0x1] %vm228_vm2, %v2858_v2  ;;  %v528_v18 = vld [vmem:[#allocation2 + $0x1d0] sm:$0xff]  ;;  %v1076_v29 = vld [vmem:[#allocation2 + $0x1a7] sm:$0xff] }
  0x69   : > { %2599 = vmatmul.msk.bf16.gmra.mxu3 %vm224_vm1, %v3224_v6  ;;  %261 = vst.msk [vmem:[#allocation2 + $0x118] sm:$0x1] %vm228_vm2, %v2858_v2  ;;  %v3255_v20 = vpack.c.bf16 %v528_v18, %v527_v16  ;;  %v535_v34 = vld [vmem:[#allocation2 + $0x248] sm:$0xff] }
  0x6a   : > { %265 = vst.msk [vmem:[#allocation2 + $0x138] sm:$0x1] %vm228_vm2, %v2858_v2  ;;  %v536_v35 = vld [vmem:[#allocation2 + $0x250] sm:$0xff] }
  0x6b   : > { %2592 = vmatmul.msk.bf16.gmra.mxu1 %vm224_vm1, %v3230_v7  ;;  %269 = vst.msk [vmem:[#allocation2 + $0x158] sm:$0x1] %vm228_vm2, %v2858_v2  ;;  %v543_v36 = vld [vmem:[#allocation2 + $0x2c8] sm:$0xff]  ;;  %v3305_v38 = vpack.c.bf16 %v536_v35, %v535_v34 }
  0x6c   : > { %273 = vst.msk [vmem:[#allocation2 + $0x178] sm:$0x1] %vm228_vm2, %v2858_v2  ;;  %v544_v37 = vld [vmem:[#allocation2 + $0x2d0] sm:$0xff] }
  0x6d   : > { %277 = vst.msk [vmem:[#allocation2 + $0x198] sm:$0x1] %vm228_vm2, %v2858_v2  ;;  %v519_v23 = vld [vmem:[#allocation2 + $0x148] sm:$0xff]  ;;  %v3311_v41 = vpack.c.bf16 %v544_v37, %v543_v36 }
  0x6e   : > { %281 = vst.msk [vmem:[#allocation2 + $0x1b8] sm:$0x1] %vm228_vm2, %v2858_v2  ;;  %v520_v25 = vld [vmem:[#allocation2 + $0x150] sm:$0xff]  ;;  %v1070_v56 = vld [vmem:[#allocation2 + $0x147] sm:$0xff] }
  0x6f   : > { %285 = vst.msk [vmem:[#allocation2 + $0x1d8] sm:$0x1] %vm228_vm2, %v2858_v2  ;;  %v3289_v33 = vpack.c.bf16 %v520_v25, %v519_v23  ;;  %v845_v44 = vld [vmem:[#allocation2 + $0xf1] sm:$0xff]  ;;  %v846_v48 = vld [vmem:[#allocation2 + $0x109] sm:$0xff] }
  0x70   : > { %289 = vst.msk [vmem:[#allocation2 + $0x1f8] sm:$0x1] %vm228_vm2, %v2858_v2  ;;  %v1067_v46 = vld [vmem:[#allocation2 + $0x10f] sm:$0xff]  ;;  %v876_v47 = vpack.c.bf16 %v845_v44, %v844_v43 }
  0x71   : > { %2588 = vmatmul.msk.bf16.gmra.mxu0 %vm224_vm1, %v3237_v9  ;;  %293 = vst.msk [vmem:[#allocation2 + $0x218] sm:$0x1] %vm228_vm2, %v2858_v2  ;;  %v847_v49 = vld [vmem:[#allocation2 + $0x111] sm:$0xff]  ;;  %v850_v60 = vld [vmem:[#allocation2 + $0x149] sm:$0xff] }
  0x72   : > { %297 = vst.msk [vmem:[#allocation2 + $0x238] sm:$0x1] %vm228_vm2, %v2858_v2  ;;  %v1069_v51 = vld [vmem:[#allocation2 + $0x12f] sm:$0xff]  ;;  %v3325_v52 = vpack.c.bf16 %v847_v49, %v846_v48 }
  0x73   : > { %301 = vst.msk [vmem:[#allocation2 + $0x258] sm:$0x1] %vm228_vm2, %v2858_v2  ;;  %v3327_v53 = vpack.c.bf16 %v1069_v51, %v1068_v50  ;;  %v849_v55 = vld [vmem:[#allocation2 + $0x131] sm:$0xff]  ;;  %v852_v8 = vld [vmem:[#allocation2 + $0x169] sm:$0xff] }
  0x74   : > { %305 = vst.msk [vmem:[#allocation2 + $0x278] sm:$0x1] %vm228_vm2, %v2858_v2  ;;  %v1071_v57 = vld [vmem:[#allocation2 + $0x14f] sm:$0xff] }
  0x75   : > { %309 = vst.msk [vmem:[#allocation2 + $0x298] sm:$0x1] %vm228_vm2, %v2858_v2  ;;  %v3339_v59 = vpack.c.bf16 %v1071_v57, %v1070_v56  ;;  %v851_v61 = vld [vmem:[#allocation2 + $0x151] sm:$0xff]  ;;  %v854_v25 = vld [vmem:[#allocation2 + $0x189] sm:$0xff] }
  0x76   : > { %313 = vst.msk [vmem:[#allocation2 + $0x2b8] sm:$0x1] %vm228_vm2, %v2858_v2  ;;  %v1073_v63 = vld [vmem:[#allocation2 + $0x16f] sm:$0xff]  ;;  %v3349_v0 = vpack.c.bf16 %v851_v61, %v850_v60 }
  0x77   : > { %2596 = vmatmul.msk.bf16.gmra.mxu2 %vm224_vm1, %v3241_v15  ;;  %317 = vst.msk [vmem:[#allocation2 + $0x2d8] sm:$0x1] %vm228_vm2, %v2858_v2  ;;  %v3353_v5 = vpack.c.bf16 %v1073_v63, %v1072_v62  ;;  %v853_v10 = vld [vmem:[#allocation2 + $0x171] sm:$0xff]  ;;  %v858_v56 = vld [vmem:[#allocation2 + $0x1c9] sm:$0xff] }
  0x78   : > { %321 = vst.msk [vmem:[#allocation2 + $0x2f8] sm:$0x1] %vm228_vm2, %v2858_v2  ;;  %v1075_v12 = vld [vmem:[#allocation2 + $0x18f] sm:$0xff]  ;;  %v3367_v14 = vpack.c.bf16 %v853_v10, %v852_v8  ;;  %v1080_v62 = vld [vmem:[#allocation2 + $0x1e7] sm:$0xff] }
  0x79   : > { %2600 = vmatmul.msk.bf16.gmra.mxu3 %vm224_vm1, %v3247_v19  ;;  %325 = vst.msk [vmem:[#allocation2 + $0x318] sm:$0x1] %vm228_vm2, %v2858_v2  ;;  %v1098_v2 = vpack.c.bf16 %v1067_v46, %v1066_v45  ;;  %v3371_v18 = vpack.c.bf16 %v1075_v12, %v1074_v11  ;;  %v855_v26 = vld [vmem:[#allocation2 + $0x191] sm:$0xff]  ;;  %v1078_v46 = vld [vmem:[#allocation2 + $0x1c7] sm:$0xff] }
  0x7a   : > { %v1077_v31 = vld [vmem:[#allocation2 + $0x1af] sm:$0xff]  ;;  %v3393_v32 = vpack.c.bf16 %v855_v26, %v854_v25 }
  0x7b   : > { %2593 = vmatmul.msk.bf16.gmra.mxu1 %vm224_vm1, %v3255_v20  ;;  %v3397_v35 = vpack.c.bf16 %v1077_v31, %v1076_v29  ;;  %v857_v43 = vld [vmem:[#allocation2 + $0x1b1] sm:$0xff]  ;;  %v860_v31 = vld [vmem:[#allocation2 + $0x1e9] sm:$0xff] }
  0x7c   : > { %v859_v57 = vld [vmem:[#allocation2 + $0x1d1] sm:$0xff] }
  0x7d   : > { %v1081_v63 = vld [vmem:[#allocation2 + $0x1ef] sm:$0xff]  ;;  %v3449_v8 = vpack.c.bf16 %v859_v57, %v858_v56  ;;  %v1082_v56 = vld [vmem:[#allocation2 + $0x207] sm:$0xff] }
  0x7e   : > { %v3453_v11 = vpack.c.bf16 %v1081_v63, %v1080_v62  ;;  %v1083_v57 = vld [vmem:[#allocation2 + $0x20f] sm:$0xff] }
  0x80   : > { %3965 = vst [vmem:[#allocation10_spill] sm:$0xff] %v3453_v11 }
  0x81   : > { %2589 = vmatmul.msk.bf16.gmra.mxu0 %vm224_vm1, %v3289_v33 }
  0x87   : > { %2597 = vmatmul.msk.bf16.gmra.mxu2 %vm224_vm1, %v3305_v38 }
  0x89   : > { %2601 = vmatmul.msk.bf16.gmra.mxu3 %vm224_vm1, %v3311_v41 }
  0x8b   : > { %2602 = vmatmul.msk.bf16.vlgmr.msrb.gmra.mxu1 %vm224_vm1, %v496_v42  ;;  %v856_v42 = vld [vmem:[#allocation2 + $0x1a9] sm:$0xff] }
  0x91   : > { %2653 = vmatmul.msk.bf16.vlgmr.msrb.gmra.mxu0 %vm224_vm1, %v3206_v54  ;;  %v848_v54 = vld [vmem:[#allocation2 + $0x129] sm:$0xff] }
  0x92   : > { %v3337_v58 = vpack.c.bf16 %v849_v55, %v848_v54 }
  0x97   : > { %2619 = vmatmul.msk.bf16.vlgmr.msrb.gmra.mxu2 %vm224_vm1, %v876_v47  ;;  %v1079_v47 = vld [vmem:[#allocation2 + $0x1cf] sm:$0xff] }
  0x98   : > { %v3425_v49 = vpack.c.bf16 %v1079_v47, %v1078_v46 }
  0x99   : > { %2636 = vmatmul.msk.bf16.vlgmr.msrb.gmra.mxu3 %vm224_vm1, %v1098_v2 }
  0x9b   : > { %2603 = vmatmul.msk.bf16.gmra.mxu1 %vm224_vm1, %v1098_v2  ;;  %v3421_v2 = vpack.c.bf16 %v857_v43, %v856_v42  ;;  %v861_v42 = vld [vmem:[#allocation2 + $0x1f1] sm:$0xff] }
  0x9c   : > { %v3472_v62 = vpack.c.bf16 %v861_v42, %v860_v31 }
  0x9e   : > { %3967 = vst [vmem:[#allocation12_spill] sm:$0xff] %v3472_v62 }
  0x9f   : > { %v3359_v4 = vpop.f32.mrf.mxu0 }
  0xa1   : > { %2654 = vmatmul.msk.bf16.gmra.mxu0 %vm224_vm1, %v3237_v9 }
  0xa6   : > { %v3351_v1 = vpop.f32.mrf.mxu1 }
  0xa7   : > { %2620 = vmatmul.msk.bf16.gmra.mxu2 %vm224_vm1, %v3325_v52  ;;  %v3369_v16 = vpop.f32.mrf.mxu0 }
  0xa9   : > { %2637 = vmatmul.msk.bf16.gmra.mxu3 %vm224_vm1, %v3327_v53 }
  0xab   : > { %2604 = vmatmul.msk.bf16.gmra.mxu1 %vm224_vm1, %v3327_v53 }
  0xb1   : > { %2655 = vmatmul.msk.bf16.gmra.mxu0 %vm224_vm1, %v3289_v33 }
  0xb7   : > { %2621 = vmatmul.msk.bf16.gmra.mxu2 %vm224_vm1, %v3337_v58 }
  0xb9   : > { %2638 = vmatmul.msk.bf16.gmra.mxu3 %vm224_vm1, %v3339_v59 }
  0xbb   : > { %2605 = vmatmul.msk.bf16.gmra.mxu1 %vm224_vm1, %v3339_v59 }
  0xc1   : > { %2656 = vmatmul.msk.bf16.gmra.mxu0 %vm224_vm1, %v2972_v13  ;;  %v3363_v13 = vpop.f32.mrf.mxu1 }
  0xc7   : > { %2622 = vmatmul.msk.bf16.gmra.mxu2 %vm224_vm1, %v3349_v0 }
  0xc9   : > { %2639 = vmatmul.msk.bf16.gmra.mxu3 %vm224_vm1, %v3353_v5 }
  0xcb   : > { %2606 = vmatmul.msk.bf16.gmra.mxu1 %vm224_vm1, %v3353_v5 }
  0xd1   : > { %2657 = vmatmul.msk.bf16.gmra.mxu0 %vm224_vm1, %v3175_v30 }
  0xd7   : > { %2623 = vmatmul.msk.bf16.gmra.mxu2 %vm224_vm1, %v3367_v14 }
  0xd8   : > { %v3375_v21 = vpop.f32.mrf.mxu1 }
  0xd9   : > { %2640 = vmatmul.msk.bf16.gmra.mxu3 %vm224_vm1, %v3371_v18 }
  0xda   : > { %v3379_v22 = vpop.f32.mrf.mxu2 }
  0xdb   : > { %2607 = vmatmul.msk.bf16.gmra.mxu1 %vm224_vm1, %v3371_v18 }
  0xdc   : > { %v3383_v30 = vpop.f32.mrf.mxu3 }
  0xde   : > { %v3385_v23 = vpop.f32.mrf.mxu0 }
  0xe0   : > { %v3387_v27 = vpop.f32.mrf.mxu1 }
  0xe1   : > { %2658 = vmatmul.msk.bf16.gmra.mxu0 %vm224_vm1, %v3230_v7 }
  0xe2   : > { %v3391_v28 = vpop.f32.mrf.mxu2 }
  0xe4   : > { %v3395_v34 = vpop.f32.mrf.mxu3 }
  0xe6   : > { %v3399_v36 = vpop.f32.mrf.mxu0 }
  0xe7   : > { %2624 = vmatmul.msk.bf16.gmra.mxu2 %vm224_vm1, %v3393_v32 }
  0xe8   : > { %v3403_v37 = vpop.f32.mrf.mxu1 }
  0xe9   : > { %2641 = vmatmul.msk.bf16.gmra.mxu3 %vm224_vm1, %v3397_v35 }
  0xea   : > { %v3407_v7 = vpop.f32.mrf.mxu2 }
  0xeb   : > { %2608 = vmatmul.msk.bf16.gmra.mxu1 %vm224_vm1, %v3397_v35 }
  0xec   : > { %v3411_v39 = vpop.f32.mrf.mxu3 }
  0xed   : > { %3961 = vst [vmem:[#allocation6_spill] sm:$0xff] %v3411_v39 }
  0xee   : > { %v3413_v40 = vpop.f32.mrf.mxu0 }
  0xf0   : > { %v3415_v44 = vpop.f32.mrf.mxu1 }
  0xf1   : > { %2659 = vmatmul.msk.bf16.gmra.mxu0 %vm224_vm1, %v3255_v20 }
  0xf2   : > { %v3419_v45 = vpop.f32.mrf.mxu2 }
  0xf4   : > { %v3423_v48 = vpop.f32.mrf.mxu3 }
  0xf5   : > { %3962 = vst [vmem:[#allocation7_spill] sm:$0xff] %v3423_v48 }
  0xf6   : > { %v3427_v50 = vpop.f32.mrf.mxu0 }
  0xf7   : > { %2625 = vmatmul.msk.bf16.gmra.mxu2 %vm224_vm1, %v3421_v2 }
  0xf8   : > { %v3431_v51 = vpop.f32.mrf.mxu1 }
  0xf9   : > { %2642 = vmatmul.msk.bf16.gmra.mxu3 %vm224_vm1, %v3425_v49 }
  0xfa   : > { %v3435_v20 = vpop.f32.mrf.mxu2 }
  0xfb   : > { %2609 = vmatmul.msk.bf16.gmra.mxu1 %vm224_vm1, %v3425_v49 }
  0xfc   : > { %v3439_v54 = vpop.f32.mrf.mxu3 }
  0xfd   : > { %3963 = vst [vmem:[#allocation8_spill] sm:$0xff] %v3439_v54 }
  0xfe   : > { %v3441_v55 = vpop.f32.mrf.mxu0 }
 0x100   : > { %v3443_v60 = vpop.f32.mrf.mxu1 }
 0x101   : > { %2660 = vmatmul.msk.bf16.gmra.mxu0 %vm224_vm1, %v3156_v17 }
 0x102   : > { %v3447_v61 = vpop.f32.mrf.mxu2 }
 0x104   : > { %v3451_v10 = vpop.f32.mrf.mxu3 }
 0x105   : > { %3964 = vst [vmem:[#allocation9_spill] sm:$0xff] %v3451_v10  ;;  %v3476_v10 = vpack.c.bf16 %v1083_v57, %v1082_v56 }
 0x106   : > { %v3455_v12 = vpop.f32.mrf.mxu0 }
 0x107   : > { %2626 = vmatmul.msk.bf16.gmra.mxu2 %vm224_vm1, %v3449_v8  ;;  %3969 = vst [vmem:[#allocation14_spill] sm:$0xff] %v3476_v10 }
 0x108   : > { %v764_v25 = vpop.f32.mrf.mxu1 }
 0x109   : > { %2643 = vmatmul.msk.bf16.gmra.mxu3 %vm224_vm1, %v3453_v11 }
 0x10a   : > { %v3461_v17 = vpop.f32.mrf.mxu2 }
 0x10b   : > { %2610 = vmatmul.msk.bf16.gmra.mxu1 %vm224_vm1, %v3453_v11  ;;  %v765_v11 = vadd.f32 %v764_v25, %v3359_v4 }
 0x10c   : > { %v3465_v26 = vpop.f32.mrf.mxu3 }
 0x10d   : > { %3966 = vst [vmem:[#allocation11_spill] sm:$0xff] %v3465_v26 }
 0x10e   : > { %v1398_v29 = vpop.f32.mrf.mxu0 }
 0x110   : > { %v766_v43 = vpop.f32.mrf.mxu1 }
 0x111   : > { %2661 = vmatmul.msk.bf16.gmra.mxu0 %vm224_vm1, %v3219_v3  ;;  %v767_v46 = vadd.f32 %v766_v43, %v3369_v16 }
 0x112   : > { %v3470_v47 = vpop.f32.mrf.mxu2 }
 0x114   : > { %v3474_v63 = vpop.f32.mrf.mxu3 }
 0x115   : > { %3968 = vst [vmem:[#allocation13_spill] sm:$0xff] %v3474_v63  ;;  %v862_v63 = vld [vmem:[#allocation2 + $0x209] sm:$0xff] }
 0x116   : > { %v1400_v26 = vpop.f32.mrf.mxu0 }
 0x117   : > { %2627 = vmatmul.msk.bf16.gmra.mxu2 %vm224_vm1, %v3472_v62  ;;  %v863_v62 = vld [vmem:[#allocation2 + $0x211] sm:$0xff] }
 0x118   : > { %v769_v54 = vpop.f32.mrf.mxu1 }
 0x119   : > { %2644 = vmatmul.msk.bf16.gmra.mxu3 %vm224_vm1, %v3476_v10  ;;  %v770_v3 = vadd.f32 %v769_v54, %v3385_v23  ;;  %v1084_v23 = vld [vmem:[#allocation2 + $0x227] sm:$0xff]  ;;  %v1085_v54 = vld [vmem:[#allocation2 + $0x22f] sm:$0xff] }
 0x11a   : > { %v954_v16 = vpop.f32.mrf.mxu2 }
 0x11b   : > { %v1034_v43 = vadd.f32 %v954_v16, %v765_v11  ;;  %2611 = vmatmul.msk.bf16.gmra.mxu1 %vm224_vm1, %v3476_v10  ;;  %v3491_v16 = vpack.c.bf16 %v863_v62, %v862_v63 }
 0x11c   : > { %v1176_v31 = vpop.f32.mrf.mxu3 }
 0x11d   : > { %v1256_v42 = vadd.f32 %v1176_v31, %v1034_v43  ;;  %v3493_v43 = vpack.c.bf16 %v1085_v54, %v1084_v23  ;;  %v865_v23 = vld [vmem:[#allocation2 + $0x231] sm:$0xff] }
 0x11e   : > { %v1403_v56 = vpop.f32.mrf.mxu0 }
 0x11f   : > { %v3486_v57 = vadd.f32 %v1398_v29, %v1256_v42 }
 0x120   : > { %v771_v48 = vpop.f32.mrf.mxu1 }
 0x121   : > { %2662 = vmatmul.msk.bf16.gmra.mxu0 %vm224_vm1, %v3241_v15  ;;  %v772_v4 = vadd.f32 %v771_v48, %v3399_v36 }
 0x122   : > { %v956_v25 = vpop.f32.mrf.mxu2 }
 0x123   : > { %v1035_v11 = vadd.f32 %v956_v25, %v767_v46  ;;  %v864_v25 = vld [vmem:[#allocation2 + $0x229] sm:$0xff] }
 0x124   : > { %v1178_v10 = vpop.f32.mrf.mxu3 }
 0x125   : > { %v1257_v39 = vadd.f32 %v1178_v10, %v1035_v11  ;;  %v1087_v11 = vld [vmem:[#allocation2 + $0x24f] sm:$0xff] }
 0x126   : > { %v1405_v29 = vpop.f32.mrf.mxu0 }
 0x127   : > { %2628 = vmatmul.msk.bf16.gmra.mxu2 %vm224_vm1, %v3491_v16  ;;  %v3497_v31 = vadd.f32 %v1400_v26, %v1257_v39 }
 0x128   : > { %v774_v42 = vpop.f32.mrf.mxu1 }
 0x129   : > { %3970 = vst [vmem:[#allocation15_spill] sm:$0xff] %v3497_v31  ;;  %2645 = vmatmul.msk.bf16.gmra.mxu3 %vm224_vm1, %v3493_v43  ;;  %v775_v15 = vadd.f32 %v774_v42, %v3413_v40  ;;  %v1086_v40 = vld [vmem:[#allocation2 + $0x247] sm:$0xff]  ;;  %v3509_v42 = vpack.c.bf16 %v865_v23, %v864_v25 }
 0x12a   : > { %v959_v36 = vpop.f32.mrf.mxu2 }
 0x12b   : > { %v1036_v48 = vadd.f32 %v959_v36, %v770_v3  ;;  %2612 = vmatmul.msk.bf16.gmra.mxu1 %vm224_vm1, %v3493_v43 }
 0x12c   : > { %v1181_v10 = vpop.f32.mrf.mxu3 }
 0x12d   : > { %v1258_v46 = vadd.f32 %v1181_v10, %v1036_v48  ;;  %v3511_v48 = vpack.c.bf16 %v1087_v11, %v1086_v40  ;;  %v866_v40 = vld [vmem:[#allocation2 + $0x249] sm:$0xff]  ;;  %v867_v11 = vld [vmem:[#allocation2 + $0x251] sm:$0xff] }
 0x12e   : > { %v1408_v62 = vpop.f32.mrf.mxu0 }
 0x12f   : > { %v3504_v63 = vadd.f32 %v1403_v56, %v1258_v46 }
 0x130   : > { %v776_v39 = vpop.f32.mrf.mxu1 }
 0x131   : > { %2663 = vmatmul.msk.bf16.gmra.mxu0 %vm224_vm1, %v3305_v38  ;;  %v777_v26 = vadd.f32 %v776_v39, %v3427_v50 }
 0x132   : > { %v961_v54 = vpop.f32.mrf.mxu2 }
 0x133   : > { %v1037_v3 = vadd.f32 %v961_v54, %v772_v4 }
 0x134   : > { %v1183_v36 = vpop.f32.mrf.mxu3 }
 0x135   : > { %v1259_v31 = vadd.f32 %v1183_v36, %v1037_v3  ;;  %v1089_v36 = vld [vmem:[#allocation2 + $0x26f] sm:$0xff] }
 0x136   : > { %v1410_v56 = vpop.f32.mrf.mxu0 }
 0x137   : > { %2629 = vmatmul.msk.bf16.gmra.mxu2 %vm224_vm1, %v3509_v42  ;;  %v3515_v10 = vadd.f32 %v1405_v29, %v1259_v31 }
 0x138   : > { %v779_v46 = vpop.f32.mrf.mxu1 }
 0x139   : > { %3971 = vst [vmem:[#allocation16_spill] sm:$0xff] %v3515_v10  ;;  %2646 = vmatmul.msk.bf16.gmra.mxu3 %vm224_vm1, %v3511_v48  ;;  %v780_v38 = vadd.f32 %v779_v46, %v3441_v55  ;;  %v1088_v55 = vld [vmem:[#allocation2 + $0x267] sm:$0xff]  ;;  %v3527_v46 = vpack.c.bf16 %v867_v11, %v866_v40 }
 0x13a   : > { %v964_v50 = vpop.f32.mrf.mxu2 }
 0x13b   : > { %v1038_v4 = vadd.f32 %v964_v50, %v775_v15  ;;  %2613 = vmatmul.msk.bf16.gmra.mxu1 %vm224_vm1, %v3511_v48 }
 0x13c   : > { %v1186_v25 = vpop.f32.mrf.mxu3 }
 0x13d   : > { %v1260_v23 = vadd.f32 %v1186_v25, %v1038_v4  ;;  %v3529_v4 = vpack.c.bf16 %v1089_v36, %v1088_v55  ;;  %v869_v55 = vld [vmem:[#allocation2 + $0x271] sm:$0xff] }
 0x13e   : > { %v1413_v39 = vpop.f32.mrf.mxu0 }
 0x13f   : > { %v3522_v54 = vadd.f32 %v1408_v62, %v1260_v23 }
 0x140   : > { %v781_v29 = vpop.f32.mrf.mxu1 }
 0x141   : > { %2664 = vmatmul.msk.bf16.gmra.mxu0 %vm224_vm1, %v3166_v24  ;;  %v782_v31 = vadd.f32 %v781_v29, %v3455_v12 }
 0x142   : > { %v966_v3 = vpop.f32.mrf.mxu2 }
 0x143   : > { %v1039_v15 = vadd.f32 %v966_v3, %v777_v26  ;;  %v868_v3 = vld [vmem:[#allocation2 + $0x269] sm:$0xff] }
 0x144   : > { %v1188_v50 = vpop.f32.mrf.mxu3 }
 0x145   : > { %v1261_v10 = vadd.f32 %v1188_v50, %v1039_v15  ;;  %v1091_v15 = vld [vmem:[#allocation2 + $0x28f] sm:$0xff]  ;;  %v3543_v50 = vpack.c.bf16 %v869_v55, %v868_v3  ;;  %v357_v3 = vld [vmem:[%s2957_s13 + $0xf8] sm:$0xff] }
 0x146   : > { %v1415_v62 = vpop.f32.mrf.mxu0 }
 0x147   : > { %2630 = vmatmul.msk.bf16.gmra.mxu2 %vm224_vm1, %v3527_v46  ;;  %v3533_v25 = vadd.f32 %v1410_v56, %v1261_v10  ;;  %v1090_v10 = vld [vmem:[#allocation2 + $0x287] sm:$0xff] }
 0x148   : > { %v784_v23 = vpop.f32.mrf.mxu1 }
 0x149   : > { %3972 = vst [vmem:[#allocation17_spill] sm:$0xff] %v3533_v25  ;;  %2647 = vmatmul.msk.bf16.gmra.mxu3 %vm224_vm1, %v3529_v4 }
 0x14a   : > { %v969_v24 = vpop.f32.mrf.mxu2 }
 0x14b   : > { %v1040_v12 = vadd.f32 %v969_v24, %v780_v38  ;;  %2614 = vmatmul.msk.bf16.gmra.mxu1 %vm224_vm1, %v3529_v4 }
 0x14c   : > { %v1191_v26 = vpop.f32.mrf.mxu3 }
 0x14d   : > { %v1262_v40 = vadd.f32 %v1191_v26, %v1040_v12  ;;  %v3545_v12 = vpack.c.bf16 %v1091_v15, %v1090_v10 }
 0x14e   : > { %v1418_v11 = vpop.f32.mrf.mxu0 }
 0x14f   : > { %v3539_v29 = vadd.f32 %v1413_v39, %v1262_v40  ;;  %3974 = vst [vmem:[#allocation19_spill] sm:$0xff] %v3545_v12 }
 0x150   : > { %v786_v36 = vpop.f32.mrf.mxu1 }
 0x151   : > { %3973 = vst [vmem:[#allocation18_spill] sm:$0xff] %v3539_v29  ;;  %2665 = vmatmul.msk.bf16.gmra.mxu0 %vm224_vm1, %v3224_v6  ;;  %v785_v6 = vadd.f32 %v784_v23, %v3351_v1  ;;  %v2793_v1 = vld [vmem:[%s3949_s2] ss:$0 sm:$0xff] }
 0x152   : > { %v971_v56 = vpop.f32.mrf.mxu2 }
 0x153   : > { %v1041_v38 = vadd.f32 %v971_v56, %v782_v31  ;;  %v356_v31 = vld [vmem:[%s2957_s13 + $0xf0] sm:$0xff]  ;;  %v2792_v56 = vld [vmem:[%s3948_s1] ss:$0 sm:$0xff]  ;;  %s215_s13 = sand.u32 1, %s2848_s19  }
 0x154   : > { %v1193_v24 = vpop.f32.mrf.mxu3  ;;  %v392_v10 = vmul.f32 %v2792_v56, %v356_v31  ;;  %v787_v31 = vadd.f32 %v786_v36, %v3363_v13  ;;  %s2582_s7 = sshll.u32 %s215_s13, 8  ;;  %s2501_s22 = scalar_lea.sflag [#allocation4], %s215_s13 }
 0x155   : > { %v1263_v25 = vadd.f32 %v1193_v24, %v1041_v38  ;;  %s3747_s8 = scalar_lea.vmem [#allocation3], %s2582_s7 }
 0x156   : > { %v1420_v39 = vpop.f32.mrf.mxu0  ;;  %v428_v23 = vadd.f32 %v2793_v1, %v392_v10  ;;  %s2513_s14 = sshll.u32 %s3747_s8, 4  ;;  %s2514_s14 = int_to_ptr.vmem [resolvable:$true] %s2513_s14 }
 0x157   : > { %2631 = vmatmul.msk.bf16.gmra.mxu2 %vm224_vm1, %v3543_v50  ;;  %v3549_v26 = vadd.f32 %v1415_v62, %v1263_v25  ;;  %v393_v62 = vmul.f32 %v2792_v56, %v357_v3  ;;  %v1093_v56 = vld [vmem:[#allocation2 + $0x2af] sm:$0xff] }
 0x158   : > { %v789_v40 = vpop.f32.mrf.mxu1  ;;  %461 = vst.msk [vmem:[#allocation2 + $0x2e8] sm:$0xff] %vm224_vm1, %v428_v23 }
 0x159   : > { %3975 = vst [vmem:[#allocation20_spill] sm:$0xff] %v3549_v26  ;;  %2648 = vmatmul.msk.bf16.gmra.mxu3 %vm224_vm1, %v3545_v12  ;;  %v429_v38 = vadd.f32 %v2793_v1, %v393_v62  ;;  %v871_v26 = vld [vmem:[#allocation2 + $0x291] sm:$0xff]  ;;  %v790_v36 = vadd.f32 %v789_v40, %v3375_v21  ;;  %v1094_v40 = vld [vmem:[#allocation2 + $0x2c7] sm:$0xff] }
 0x15a   : > { %v974_v29 = vpop.f32.mrf.mxu2 }
 0x15b   : > { %v1042_v55 = vadd.f32 %v974_v29, %v785_v6  ;;  %2615 = vmatmul.msk.bf16.gmra.mxu1 %vm224_vm1, %v3545_v12  ;;  %v870_v6 = vld [vmem:[#allocation2 + $0x289] sm:$0xff]  ;;  %462 = vst.msk [vmem:[#allocation2 + $0x2f0] sm:$0xff] %vm224_vm1, %v429_v38 }
 0x15c   : > { %v1196_v25 = vpop.f32.mrf.mxu3  ;;  %v3571_v62 = vpack.c.bf16 %v871_v26, %v870_v6 }
 0x15d   : > { %v1264_v15 = vadd.f32 %v1196_v25, %v1042_v55  ;;  %v1092_v55 = vld [vmem:[#allocation2 + $0x2a7] sm:$0xff] }
 0x15e   : > { %v1423_v24 = vpop.f32.mrf.mxu0 }
 0x15f   : > { %v3565_v29 = vadd.f32 %v1418_v11, %v1264_v15  ;;  %v3573_v11 = vpack.c.bf16 %v1093_v56, %v1092_v55  ;;  %v872_v55 = vld [vmem:[#allocation2 + $0x2a9] sm:$0xff]  ;;  %v873_v56 = vld [vmem:[#allocation2 + $0x2b1] sm:$0xff] }
 0x160   : > { %v791_v12 = vpop.f32.mrf.mxu1 }
 0x161   : > { %3976 = vst [vmem:[#allocation21_spill] sm:$0xff] %v3565_v29  ;;  %2666 = vmatmul.msk.bf16.gmra.mxu0 %vm224_vm1, %v3247_v19 }
 0x162   : > { %v976_v3 = vpop.f32.mrf.mxu2 }
 0x163   : > { %v1043_v10 = vadd.f32 %v976_v3, %v787_v31 }
 0x164   : > { %v1198_v25 = vpop.f32.mrf.mxu3 }
 0x165   : > { %v1265_v1 = vadd.f32 %v1198_v25, %v1043_v10  ;;  %v792_v10 = vadd.f32 %v791_v12, %v3387_v27  ;;  %v1095_v25 = vld [vmem:[#allocation2 + $0x2cf] sm:$0xff] }
 0x166   : > { %v1425_v15 = vpop.f32.mrf.mxu0 }
 0x167   : > { %2632 = vmatmul.msk.bf16.gmra.mxu2 %vm224_vm1, %v3571_v62  ;;  %v3577_v23 = vadd.f32 %v1420_v39, %v1265_v1 }
 0x168   : > { %v794_v13 = vpop.f32.mrf.mxu1 }
 0x169   : > { %3977 = vst [vmem:[#allocation22_spill] sm:$0xff] %v3577_v23  ;;  %2649 = vmatmul.msk.bf16.gmra.mxu3 %vm224_vm1, %v3573_v11  ;;  %v795_v12 = vadd.f32 %v794_v13, %v3403_v37 }
 0x16a   : > { %v979_v19 = vpop.f32.mrf.mxu2 }
 0x16b   : > { %v1044_v38 = vadd.f32 %v979_v19, %v790_v36  ;;  %2616 = vmatmul.msk.bf16.gmra.mxu1 %vm224_vm1, %v3573_v11  ;;  %v3589_v36 = vpack.c.bf16 %v873_v56, %v872_v55  ;;  %v1319_v55 = vld [vmem:[#allocation2 + $0x2f0] sm:$0xff] }
 0x16c   : > { %v1201_v26 = vpop.f32.mrf.mxu3 }
 0x16d   : > { %v1266_v6 = vadd.f32 %v1201_v26, %v1044_v38  ;;  %v3591_v38 = vpack.c.bf16 %v1095_v25, %v1094_v40 }
 0x16e   : > { %v1428_v31 = vpop.f32.mrf.mxu0 }
 0x16f   : > { %v3584_v3 = vadd.f32 %v1423_v24, %v1266_v6  ;;  %3979 = vst [vmem:[#allocation24_spill] sm:$0xff] %v3591_v38  ;;  %v1318_v6 = vld [vmem:[#allocation2 + $0x2e8] sm:$0xff] }
 0x170   : > { %v796_v39 = vpop.f32.mrf.mxu1  ;;  %v1335_v40 = vpack.c.bf16 %v1319_v55, %v1318_v6 }
 0x171   : > { %3978 = vst [vmem:[#allocation23_spill] sm:$0xff] %v3584_v3  ;;  %2667 = vmatmul.msk.bf16.gmra.mxu0 %vm224_vm1, %v3311_v41  ;;  %v797_v37 = vadd.f32 %v796_v39, %v3415_v44  ;;  %v1097_v3 = vld [vmem:[#allocation2 + $0x2ef] sm:$0xff] }
 0x172   : > { %v981_v21 = vpop.f32.mrf.mxu2 }
 0x173   : > { %v1045_v1 = vadd.f32 %v981_v21, %v792_v10 }
 0x174   : > { %v1203_v19 = vpop.f32.mrf.mxu3 }
 0x175   : > { %v1267_v23 = vadd.f32 %v1203_v19, %v1045_v1 }
 0x176   : > { %v1430_v24 = vpop.f32.mrf.mxu0 }
 0x177   : > { %2633 = vmatmul.msk.bf16.gmra.mxu2 %vm224_vm1, %v3589_v36  ;;  %v3595_v26 = vadd.f32 %v1425_v15, %v1267_v23  ;;  %v874_v15 = vld [vmem:[#allocation2 + $0x2c9] sm:$0xff]  ;;  %v875_v23 = vld [vmem:[#allocation2 + $0x2d1] sm:$0xff] }
 0x178   : > { %v799_v27 = vpop.f32.mrf.mxu1 }
 0x179   : > { %3980 = vst [vmem:[#allocation25_spill] sm:$0xff] %v3595_v26  ;;  %2650 = vmatmul.msk.bf16.gmra.mxu3 %vm224_vm1, %v3591_v38  ;;  %v1096_v26 = vld [vmem:[#allocation2 + $0x2e7] sm:$0xff]  ;;  %v800_v44 = vadd.f32 %v799_v27, %v3431_v51 }
 0x17a   : > { %v984_v41 = vpop.f32.mrf.mxu2 }
 0x17b   : > { %v1046_v56 = vadd.f32 %v984_v41, %v795_v12  ;;  %2617 = vmatmul.msk.bf16.gmra.mxu1 %vm224_vm1, %v3591_v38  ;;  %v3606_v41 = vpack.c.bf16 %v875_v23, %v874_v15 }
 0x17c   : > { %v1206_v10 = vpop.f32.mrf.mxu3 }
 0x17d   : > { %v1268_v21 = vadd.f32 %v1206_v10, %v1046_v56  ;;  %v1113_v56 = vpack.c.bf16 %v1097_v3, %v1096_v26 }
 0x17e   : > { %v1433_v25 = vpop.f32.mrf.mxu0 }
 0x17f   : > { %v3602_v1 = vadd.f32 %v1428_v31, %v1268_v21 }
 0x180   : > { %v801_v19 = vpop.f32.mrf.mxu1 }
 0x181   : > { %2668 = vmatmul.msk.bf16.gmra.mxu0 %vm224_vm1, %v1335_v40  ;;  %v802_v15 = vadd.f32 %v801_v19, %v3443_v60 }
 0x182   : > { %v986_v13 = vpop.f32.mrf.mxu2 }
 0x183   : > { %v1047_v12 = vadd.f32 %v986_v13, %v797_v37 }
 0x184   : > { %v1208_v38 = vpop.f32.mrf.mxu3 }
 0x185   : > { %v1269_v29 = vadd.f32 %v1208_v38, %v1047_v12 }
 0x186   : > { %v1435_v6 = vpop.f32.mrf.mxu0 }
 0x187   : > { %2634 = vmatmul.msk.bf16.gmra.mxu2 %vm224_vm1, %v3606_v41  ;;  %v3610_v31 = vadd.f32 %v1430_v24, %v1269_v29 }
 0x188   : > { %v804_v55 = vpop.f32.mrf.mxu1 }
 0x189   : > { %2651 = vmatmul.msk.bf16.gmra.mxu3 %vm224_vm1, %v1113_v56 }
 0x18a   : > { %v989_v39 = vpop.f32.mrf.mxu2 }
 0x18b   : > { %v1048_v10 = vadd.f32 %v989_v39, %v800_v44  ;;  %2670 = vmatmul.msk.bf16.vlgmr.msra.gmra.mxu1 %vm224_vm1, %v3325_v52 }
 0x18c   : > { %v1211_v21 = vpop.f32.mrf.mxu3 }
 0x18d   : > { %v1270_v40 = vadd.f32 %v1211_v21, %v1048_v10 }
 0x18e   : > { %v1438_v38 = vpop.f32.mrf.mxu0 }
 0x18f   : > { %v3616_v3 = vadd.f32 %v1433_v25, %v1270_v40  ;;  %v805_v25 = vadd.f32 %v804_v55, %v3379_v22 }
 0x190   : > { %v806_v26 = vpop.f32.mrf.mxu1 }
 0x191   : > { %2721 = vmatmul.msk.bf16.vlgmr.msra.gmra.mxu0 %vm224_vm1, %v3337_v58 }
 0x192   : > { %v991_v29 = vpop.f32.mrf.mxu2 }
 0x193   : > { %v1049_v51 = vadd.f32 %v991_v29, %v802_v15 }
 0x194   : > { %v1213_v24 = vpop.f32.mrf.mxu3 }
 0x195   : > { %v1271_v27 = vadd.f32 %v1213_v24, %v1049_v51 }
 0x196   : > { %v1440_v23 = vpop.f32.mrf.mxu0 }
 0x197   : > { %2687 = vmatmul.msk.bf16.vlgmr.msra.gmra.mxu2 %vm224_vm1, %v3327_v53  ;;  %v3623_v52 = vadd.f32 %v1435_v6, %v1271_v27  ;;  %v807_v53 = vadd.f32 %v806_v26, %v3391_v28  ;;  %v1959_v27 = vld [vmem:[#allocation2 + $0x168] sm:$0xff] }
 0x198   : > { %v809_v37 = vpop.f32.mrf.mxu1 }
 0x199   : > { %2704 = vmatmul.msk.bf16.vlgmr.msra.gmra.mxu3 %vm224_vm1, %v3237_v9  ;;  %v810_v40 = vadd.f32 %v809_v37, %v3407_v7 }
 0x19a   : > { %v994_v60 = vpop.f32.mrf.mxu2 }
 0x19b   : > { %v1050_v19 = vadd.f32 %v994_v60, %v805_v25  ;;  %2671 = vmatmul.msk.bf16.gmra.mxu1 %vm224_vm1, %v3337_v58 }
 0x19c   : > { %v1216_v13 = vpop.f32.mrf.mxu3 }
 0x19d   : > { %v1272_v12 = vadd.f32 %v1216_v13, %v1050_v19 }
 0x19e   : > { %v1443_v56 = vpop.f32.mrf.mxu0 }
 0x19f   : > { %v3630_v44 = vadd.f32 %v1438_v38, %v1272_v12 }
 0x1a0   : > { %v811_v39 = vpop.f32.mrf.mxu1 }
 0x1a1   : > { %2722 = vmatmul.msk.bf16.gmra.mxu0 %vm224_vm1, %v3349_v0 }
 0x1a2   : > { %v996_v22 = vpop.f32.mrf.mxu2 }
 0x1a3   : > { %v1051_v6 = vadd.f32 %v996_v22, %v807_v53 }
 0x1a4   : > { %v1218_v55 = vpop.f32.mrf.mxu3 }
 0x1a5   : > { %v1273_v9 = vadd.f32 %v1218_v55, %v1051_v6 }
 0x1a6   : > { %v1445_v10 = vpop.f32.mrf.mxu0 }
 0x1a7   : > { %2688 = vmatmul.msk.bf16.gmra.mxu2 %vm224_vm1, %v3339_v59  ;;  %v3637_v58 = vadd.f32 %v1440_v23, %v1273_v9  ;;  %v812_v59 = vadd.f32 %v811_v39, %v3419_v45  ;;  %v1960_v23 = vld [vmem:[#allocation2 + $0x170] sm:$0xff] }
 0x1a8   : > { %v814_v21 = vpop.f32.mrf.mxu1  ;;  %v1989_v60 = vpack.c.bf16 %v1960_v23, %v1959_v27 }
 0x1a9   : > { %2705 = vmatmul.msk.bf16.gmra.mxu3 %vm224_vm1, %v3289_v33  ;;  %v815_v12 = vadd.f32 %v814_v21, %v3435_v20  ;;  %v1961_v20 = vld [vmem:[#allocation2 + $0x188] sm:$0xff] }
 0x1aa   : > { %v999_v28 = vpop.f32.mrf.mxu2 }
 0x1ab   : > { %v1052_v38 = vadd.f32 %v999_v28, %v810_v40  ;;  %2672 = vmatmul.msk.bf16.gmra.mxu1 %vm224_vm1, %v3349_v0 }
 0x1ac   : > { %v1221_v26 = vpop.f32.mrf.mxu3 }
 0x1ad   : > { %v1274_v15 = vadd.f32 %v1221_v26, %v1052_v38 }
 0x1ae   : > { %v1448_v29 = vpop.f32.mrf.mxu0 }
 0x1af   : > { %v3644_v51 = vadd.f32 %v1443_v56, %v1274_v15 }
 0x1b0   : > { %v816_v24 = vpop.f32.mrf.mxu1 }
 0x1b1   : > { %2723 = vmatmul.msk.bf16.gmra.mxu0 %vm224_vm1, %v3367_v14 }
 0x1b2   : > { %v1001_v7 = vpop.f32.mrf.mxu2 }
 0x1b3   : > { %v1053_v33 = vadd.f32 %v1001_v7, %v812_v59 }
 0x1b4   : > { %v1223_v37 = vpop.f32.mrf.mxu3 }
 0x1b5   : > { %v1275_v25 = vadd.f32 %v1223_v37, %v1053_v33 }
 0x1b6   : > { %v1450_v19 = vpop.f32.mrf.mxu0 }
 0x1b7   : > { %2689 = vmatmul.msk.bf16.gmra.mxu2 %vm224_vm1, %v3353_v5  ;;  %v3651_v0 = vadd.f32 %v1445_v10, %v1275_v25  ;;  %v817_v5 = vadd.f32 %v816_v24, %v3447_v61  ;;  %v1962_v10 = vld [vmem:[#allocation2 + $0x190] sm:$0xff] }
 0x1b8   : > { %v819_v13 = vpop.f32.mrf.mxu1  ;;  %v1990_v38 = vpack.c.bf16 %v1962_v10, %v1961_v20  ;;  %v1964_v25 = vld [vmem:[#allocation2 + $0x1b0] sm:$0xff] }
 0x1b9   : > { %2706 = vmatmul.msk.bf16.gmra.mxu3 %vm224_vm1, %v1989_v60 }
 0x1ba   : > { %v1004_v45 = vpop.f32.mrf.mxu2 }
 0x1bb   : > { %v1054_v56 = vadd.f32 %v1004_v45, %v815_v12  ;;  %2673 = vmatmul.msk.bf16.gmra.mxu1 %vm224_vm1, %v3367_v14 }
 0x1bc   : > { %v1226_v39 = vpop.f32.mrf.mxu3 }
 0x1bd   : > { %v1276_v53 = vadd.f32 %v1226_v39, %v1054_v56 }
 0x1be   : > { %v1453_v22 = vpop.f32.mrf.mxu0 }
 0x1bf   : > { %v3657_v6 = vadd.f32 %v1448_v29, %v1276_v53  ;;  %v820_v29 = vadd.f32 %v819_v13, %v3461_v17  ;;  %v1963_v17 = vld [vmem:[#allocation2 + $0x1a8] sm:$0xff] }
 0x1c0   : > { %v821_v55 = vpop.f32.mrf.mxu1  ;;  %v1991_v12 = vpack.c.bf16 %v1964_v25, %v1963_v17  ;;  %v3982_v17 = vld [vmem:[#allocation7_spill] sm:$0xff]  ;;  %v3983_v25 = vld [vmem:[#allocation12_spill] sm:$0xff] }
 0x1c1   : > { %2724 = vmatmul.msk.bf16.gmra.mxu0 %vm224_vm1, %v3393_v32 }
 0x1c2   : > { %v1006_v9 = vpop.f32.mrf.mxu2 }
 0x1c3   : > { %v1055_v21 = vadd.f32 %v1006_v9, %v817_v5 }
 0x1c4   : > { %v1228_v40 = vpop.f32.mrf.mxu3 }
 0x1c5   : > { %v1277_v28 = vadd.f32 %v1228_v40, %v1055_v21  ;;  %v1966_v21 = vld [vmem:[#allocation2 + $0x1d0] sm:$0xff] }
 0x1c6   : > { %v1455_v26 = vpop.f32.mrf.mxu0 }
 0x1c7   : > { %2690 = vmatmul.msk.bf16.gmra.mxu2 %vm224_vm1, %v3371_v18  ;;  %v3664_v14 = vadd.f32 %v1450_v19, %v1277_v28  ;;  %v822_v18 = vadd.f32 %v821_v55, %v3470_v47 }
 0x1c8   : > { %v824_v15 = vpop.f32.mrf.mxu1 }
 0x1c9   : > { %2707 = vmatmul.msk.bf16.gmra.mxu3 %vm224_vm1, %v1990_v38  ;;  %v825_v39 = vadd.f32 %v824_v15, %v3383_v30  ;;  %v1965_v30 = vld [vmem:[#allocation2 + $0x1c8] sm:$0xff] }
 0x1ca   : > { %v1009_v61 = vpop.f32.mrf.mxu2 }
 0x1cb   : > { %v1056_v24 = vadd.f32 %v1009_v61, %v820_v29  ;;  %2674 = vmatmul.msk.bf16.gmra.mxu1 %vm224_vm1, %v3393_v32  ;;  %v3981_v61 = vld [vmem:[#allocation6_spill] sm:$0xff] }
 0x1cc   : > { %v1231_v59 = vpop.f32.mrf.mxu3 }
 0x1cd   : > { %v1278_v7 = vadd.f32 %v1231_v59, %v1056_v24 }
 0x1ce   : > { %v1458_v27 = vpop.f32.mrf.mxu0 }
 0x1cf   : > { %v3670_v23 = vadd.f32 %v1453_v22, %v1278_v7 }
 0x1d0   : > { %v826_v33 = vpop.f32.mrf.mxu1 }
 0x1d1   : > { %2725 = vmatmul.msk.bf16.gmra.mxu0 %vm224_vm1, %v3421_v2 }
 0x1d2   : > { %v1011_v37 = vpop.f32.mrf.mxu2 }
 0x1d3   : > { %v1057_v60 = vadd.f32 %v1011_v37, %v822_v18 }
 0x1d4   : > { %v1233_v19 = vpop.f32.mrf.mxu3 }
 0x1d5   : > { %v1279_v13 = vadd.f32 %v1233_v19, %v1057_v60  ;;  %v1967_v19 = vld [vmem:[#allocation2 + $0x1e8] sm:$0xff] }
 0x1d6   : > { %v1460_v45 = vpop.f32.mrf.mxu0 }
 0x1d7   : > { %2691 = vmatmul.msk.bf16.gmra.mxu2 %vm224_vm1, %v3397_v35  ;;  %v3677_v32 = vadd.f32 %v1455_v26, %v1279_v13  ;;  %v827_v35 = vadd.f32 %v826_v33, %v3395_v34  ;;  %v1992_v26 = vpack.c.bf16 %v1966_v21, %v1965_v30  ;;  %v1968_v13 = vld [vmem:[#allocation2 + $0x1f0] sm:$0xff] }
 0x1d8   : > { %v829_v56 = vpop.f32.mrf.mxu1 }
 0x1d9   : > { %2708 = vmatmul.msk.bf16.gmra.mxu3 %vm224_vm1, %v1991_v12  ;;  %v830_v24 = vadd.f32 %v829_v56, %v3981_v61  ;;  %v1970_v61 = vld [vmem:[#allocation2 + $0x210] sm:$0xff] }
 0x1da   : > { %v1014_v47 = vpop.f32.mrf.mxu2 }
 0x1db   : > { %v1058_v53 = vadd.f32 %v1014_v47, %v825_v39  ;;  %2675 = vmatmul.msk.bf16.gmra.mxu1 %vm224_vm1, %v3421_v2  ;;  %v1993_v39 = vpack.c.bf16 %v1968_v13, %v1967_v19 }
 0x1dc   : > { %v1236_v22 = vpop.f32.mrf.mxu3 }
 0x1dd   : > { %v1280_v55 = vadd.f32 %v1236_v22, %v1058_v53 }
 0x1de   : > { %v1463_v5 = vpop.f32.mrf.mxu0 }
 0x1df   : > { %v3683_v9 = vadd.f32 %v1458_v27, %v1280_v55  ;;  %v3985_v55 = vld [vmem:[#allocation8_spill] sm:$0xff] }
 0x1e0   : > { %v831_v20 = vpop.f32.mrf.mxu1 }
 0x1e1   : > { %2726 = vmatmul.msk.bf16.gmra.mxu0 %vm224_vm1, %v3449_v8 }
 0x1e2   : > { %v1016_v10 = vpop.f32.mrf.mxu2 }
 0x1e3   : > { %v1059_v40 = vadd.f32 %v1016_v10, %v827_v35 }
 0x1e4   : > { %v1238_v28 = vpop.f32.mrf.mxu3 }
 0x1e5   : > { %v1281_v38 = vadd.f32 %v1238_v28, %v1059_v40 }
 0x1e6   : > { %v1465_v15 = vpop.f32.mrf.mxu0 }
 0x1e7   : > { %2692 = vmatmul.msk.bf16.gmra.mxu2 %vm224_vm1, %v3425_v49  ;;  %v3690_v2 = vadd.f32 %v1460_v45, %v1281_v38  ;;  %v832_v49 = vadd.f32 %v831_v20, %v3982_v17  ;;  %v3986_v38 = vld [vmem:[#allocation9_spill] sm:$0xff]  ;;  %v3987_v17 = vld [vmem:[#allocation14_spill] sm:$0xff] }
 0x1e8   : > { %v834_v29 = vpop.f32.mrf.mxu1 }
 0x1e9   : > { %2709 = vmatmul.msk.bf16.gmra.mxu3 %vm224_vm1, %v1992_v26 }
 0x1ea   : > { %v1019_v34 = vpop.f32.mrf.mxu2 }
 0x1eb   : > { %v1060_v59 = vadd.f32 %v1019_v34, %v830_v24  ;;  %2676 = vmatmul.msk.bf16.gmra.mxu1 %vm224_vm1, %v3449_v8  ;;  %v3984_v8 = vld [vmem:[#allocation10_spill] sm:$0xff] }
 0x1ec   : > { %v1241_v7 = vpop.f32.mrf.mxu3 }
 0x1ed   : > { %v1282_v27 = vadd.f32 %v1241_v7, %v1060_v59 }
 0x1ee   : > { %v1468_v33 = vpop.f32.mrf.mxu0 }
 0x1ef   : > { %v3696_v18 = vadd.f32 %v1463_v5, %v1282_v27  ;;  %v835_v5 = vadd.f32 %v834_v29, %v3985_v55  ;;  %v1969_v29 = vld [vmem:[#allocation2 + $0x208] sm:$0xff] }
 0x1f0   : > { %v836_v37 = vpop.f32.mrf.mxu1  ;;  %v1994_v7 = vpack.c.bf16 %v1970_v61, %v1969_v29 }
 0x1f1   : > { %2727 = vmatmul.msk.bf16.gmra.mxu0 %vm224_vm1, %v3983_v25  ;;  %v837_v26 = vadd.f32 %v836_v37, %v3986_v38 }
 0x1f2   : > { %v1021_v60 = vpop.f32.mrf.mxu2 }
 0x1f3   : > { %v1061_v12 = vadd.f32 %v1021_v60, %v832_v49 }
 0x1f4   : > { %v1243_v45 = vpop.f32.mrf.mxu3 }
 0x1f5   : > { %v1283_v56 = vadd.f32 %v1243_v45, %v1061_v12 }
 0x1f6   : > { %v1470_v47 = vpop.f32.mrf.mxu0 }
 0x1f7   : > { %2693 = vmatmul.msk.bf16.gmra.mxu2 %vm224_vm1, %v3984_v8  ;;  %v3703_v53 = vadd.f32 %v1465_v15, %v1283_v56  ;;  %v3989_v8 = vld [vmem:[#allocation13_spill] sm:$0xff] }
 0x1f8   : > { %v839_v22 = vpop.f32.mrf.mxu1 }
 0x1f9   : > { %2710 = vmatmul.msk.bf16.gmra.mxu3 %vm224_vm1, %v1993_v39 }
 0x1fa   : > { %v1024_v20 = vpop.f32.mrf.mxu2 }
 0x1fb   : > { %v1062_v35 = vadd.f32 %v1024_v20, %v835_v5  ;;  %2677 = vmatmul.msk.bf16.gmra.mxu1 %vm224_vm1, %v3983_v25  ;;  %v3988_v25 = vld [vmem:[#allocation11_spill] sm:$0xff]  ;;  %v1972_v5 = vld [vmem:[#allocation2 + $0x230] sm:$0xff] }
 0x1fc   : > { %v1246_v10 = vpop.f32.mrf.mxu3  ;;  %v840_v60 = vadd.f32 %v839_v22, %v3988_v25  ;;  %v1971_v22 = vld [vmem:[#allocation2 + $0x228] sm:$0xff] }
 0x1fd   : > { %v1284_v30 = vadd.f32 %v1246_v10, %v1062_v35 }
 0x1fe   : > { %v1473_v21 = vpop.f32.mrf.mxu0 }
 0x1ff   : > { %v3709_v40 = vadd.f32 %v1468_v33, %v1284_v30 }
 0x200   : > { %v841_v28 = vpop.f32.mrf.mxu1 }
 0x201   : > { %2728 = vmatmul.msk.bf16.gmra.mxu0 %vm224_vm1, %v3491_v16  ;;  %v842_v55 = vadd.f32 %v841_v28, %v3989_v8 }
 0x202   : > { %v1026_v15 = vpop.f32.mrf.mxu2 }
 0x203   : > { %v1063_v24 = vadd.f32 %v1026_v15, %v837_v26 }
 0x204   : > { %v1248_v34 = vpop.f32.mrf.mxu3 }
 0x205   : > { %v1285_v59 = vadd.f32 %v1248_v34, %v1063_v24  ;;  %v3739_v24 = vld [vmem:[%s3951_s4] ss:$0 sm:$0xff] }
 0x206   : > { %v1475_v27 = vpop.f32.mrf.mxu0 }
 0x207   : > { %2694 = vmatmul.msk.bf16.gmra.mxu2 %vm224_vm1, %v3987_v17  ;;  %v3716_v49 = vadd.f32 %v1470_v47, %v1285_v59  ;;  %v1973_v17 = vld [vmem:[#allocation2 + $0x248] sm:$0xff] }
 0x208   : > { %v1620_v33 = vpop.f32.mrf.mxu1 }
 0x209   : > { %2711 = vmatmul.msk.bf16.gmra.mxu3 %vm224_vm1, %v1994_v7  ;;  %v1700_v28 = vadd.f32 %v1620_v33, %v3486_v57  ;;  %v3990_v7 = vld [vmem:[#allocation15_spill] sm:$0xff]  ;;  %v1974_v33 = vld [vmem:[#allocation2 + $0x250] sm:$0xff] }
 0x20a   : > { %v1029_v37 = vpop.f32.mrf.mxu2 }
 0x20b   : > { %v1064_v19 = vadd.f32 %v1029_v37, %v840_v60  ;;  %2678 = vmatmul.msk.bf16.gmra.mxu1 %vm224_vm1, %v3491_v16  ;;  %v1995_v16 = vpack.c.bf16 %v1972_v5, %v1971_v22 }
 0x20c   : > { %v1251_v13 = vpop.f32.mrf.mxu3 }
 0x20d   : > { %v1286_v12 = vadd.f32 %v1251_v13, %v1064_v19  ;;  %v1996_v13 = vpack.c.bf16 %v1974_v33, %v1973_v17 }
 0x20e   : > { %v2287_v45 = vpop.f32.mrf.mxu0 }
 0x20f   : > { %v3722_v56 = vadd.f32 %v1473_v21, %v1286_v12 }
 0x210   : > { %v1622_v39 = vpop.f32.mrf.mxu1 }
 0x211   : > { %2729 = vmatmul.msk.bf16.gmra.mxu0 %vm224_vm1, %v3509_v42 }
 0x212   : > { %v1031_v47 = vpop.f32.mrf.mxu2 }
 0x213   : > { %v1065_v20 = vadd.f32 %v1031_v47, %v842_v55 }
 0x214   : > { %v1253_v35 = vpop.f32.mrf.mxu3 }
 0x215   : > { %v1287_v10 = vadd.f32 %v1253_v35, %v1065_v20 }
 0x216   : > { %v2289_v30 = vpop.f32.mrf.mxu0 }
 0x217   : > { %2695 = vmatmul.msk.bf16.gmra.mxu2 %vm224_vm1, %v3493_v43  ;;  %v3729_v21 = vadd.f32 %v1475_v27, %v1287_v10  ;;  %v1701_v27 = vadd.f32 %v1622_v39, %v3990_v7 }
 0x218   : > { %v1625_v38 = vpop.f32.mrf.mxu1 }
 0x219   : > { %2712 = vmatmul.msk.bf16.gmra.mxu3 %vm224_vm1, %v1995_v16  ;;  %v1702_v55 = vadd.f32 %v1625_v38, %v3504_v63 }
 0x21a   : > { %v1843_v26 = vpop.f32.mrf.mxu2 }
 0x21b   : > { %v1923_v15 = vadd.f32 %v1843_v26, %v1700_v28  ;;  %2679 = vmatmul.msk.bf16.gmra.mxu1 %vm224_vm1, %v3509_v42  ;;  %v3991_v28 = vld [vmem:[#allocation16_spill] sm:$0xff]  ;;  %v1975_v26 = vld [vmem:[#allocation2 + $0x268] sm:$0xff] }
 0x21c   : > { %v2065_v29 = vpop.f32.mrf.mxu3 }
 0x21d   : > { %v2145_v61 = vadd.f32 %v2065_v29, %v1923_v15  ;;  %v1976_v15 = vld [vmem:[#allocation2 + $0x270] sm:$0xff] }
 0x21e   : > { %v2292_v43 = vpop.f32.mrf.mxu0 }
 0x21f   : > { %v2367_v34 = vadd.f32 %v2287_v45, %v2145_v61 }
 0x220   : > { %v1627_v57 = vpop.f32.mrf.mxu1 }
 0x221   : > { %v2403_v59 = vadd.f32 %v3739_v24, %v2367_v34  ;;  %2730 = vmatmul.msk.bf16.gmra.mxu0 %vm224_vm1, %v3527_v46  ;;  %v1703_v63 = vadd.f32 %v1627_v57, %v3991_v28  ;;  %v3994_v28 = vld [vmem:[#allocation18_spill] sm:$0xff] }
 0x222   : > { %v1845_v42 = vpop.f32.mrf.mxu2 }
 0x223   : > { %v2435_v25 = vmax.f32 %v2403_v59, 0.0  ;;  %v1924_v60 = vadd.f32 %v1845_v42, %v1701_v27  ;;  %v1997_v59 = vpack.c.bf16 %v1976_v15, %v1975_v26 }
 0x224   : > { %v2067_v37 = vpop.f32.mrf.mxu3 }
 0x225   : > { %2468 = vst.msk [vmem:[%s3747_s8] sm:$0xff] %vm2467_vm3, %v2435_v25  ;;  %v2146_v19 = vadd.f32 %v2067_v37, %v1924_v60 }
 0x226   : > { %v2294_v12 = vpop.f32.mrf.mxu0 }
 0x227   : > { %v2368_v45 = vadd.f32 %v2289_v30, %v2146_v19  ;;  %2696 = vmatmul.msk.bf16.gmra.mxu2 %vm224_vm1, %v3511_v48 }
 0x228   : > { %v1630_v39 = vpop.f32.mrf.mxu1 }
 0x229   : > { %v2404_v8 = vadd.f32 %v3739_v24, %v2368_v45  ;;  %2713 = vmatmul.msk.bf16.gmra.mxu3 %vm224_vm1, %v1996_v13  ;;  %v1704_v42 = vadd.f32 %v1630_v39, %v3522_v54  ;;  %v3992_v45 = vld [vmem:[#allocation17_spill] sm:$0xff] }
 0x22a   : > { %v1848_v47 = vpop.f32.mrf.mxu2 }
 0x22b   : > { %v2436_v22 = vmax.f32 %v2404_v8, 0.0  ;;  %v1925_v5 = vadd.f32 %v1848_v47, %v1702_v55  ;;  %2680 = vmatmul.msk.bf16.gmra.mxu1 %vm224_vm1, %v3527_v46  ;;  %v1977_v8 = vld [vmem:[#allocation2 + $0x288] sm:$0xff]  ;;  %v1978_v55 = vld [vmem:[#allocation2 + $0x290] sm:$0xff] }
 0x22c   : > { %v2070_v20 = vpop.f32.mrf.mxu3 }
 0x22d   : > { %2469 = vst.msk [vmem:[%s3747_s8 + $0x8] sm:$0xff] %vm2467_vm3, %v2436_v22  ;;  %v2147_v35 = vadd.f32 %v2070_v20, %v1925_v5  ;;  %v1998_v20 = vpack.c.bf16 %v1978_v55, %v1977_v8 }
 0x22e   : > { %v2297_v10 = vpop.f32.mrf.mxu0 }
 0x22f   : > { %v2369_v48 = vadd.f32 %v2292_v43, %v2147_v35 }
 0x230   : > { %v1632_v16 = vpop.f32.mrf.mxu1 }
 0x231   : > { %v2405_v30 = vadd.f32 %v3739_v24, %v2369_v48  ;;  %2731 = vmatmul.msk.bf16.gmra.mxu0 %vm224_vm1, %v3543_v50  ;;  %v1705_v54 = vadd.f32 %v1632_v16, %v3992_v45  ;;  %v3993_v48 = vld [vmem:[#allocation19_spill] sm:$0xff]  ;;  %v3996_v45 = vld [vmem:[#allocation21_spill] sm:$0xff] }
 0x232   : > { %v1850_v38 = vpop.f32.mrf.mxu2 }
 0x233   : > { %v2437_v29 = vmax.f32 %v2405_v30, 0.0  ;;  %v1926_v46 = vadd.f32 %v1850_v38, %v1703_v63 }
 0x234   : > { %v2072_v61 = vpop.f32.mrf.mxu3 }
 0x235   : > { %2470 = vst.msk [vmem:[%s3747_s8 + $0x10] sm:$0xff] %vm2467_vm3, %v2437_v29  ;;  %v2148_v34 = vadd.f32 %v2072_v61, %v1926_v46 }
 0x236   : > { %v2299_v43 = vpop.f32.mrf.mxu0 }
 0x237   : > { %v2370_v7 = vadd.f32 %v2294_v12, %v2148_v34  ;;  %2697 = vmatmul.msk.bf16.gmra.mxu2 %vm224_vm1, %v3529_v4 }
 0x238   : > { %v1635_v57 = vpop.f32.mrf.mxu1 }
 0x239   : > { %v2406_v27 = vadd.f32 %v3739_v24, %v2370_v7  ;;  %2714 = vmatmul.msk.bf16.gmra.mxu3 %vm224_vm1, %v1997_v59  ;;  %v1706_v63 = vadd.f32 %v1635_v57, %v3994_v28  ;;  %v3995_v7 = vld [vmem:[#allocation20_spill] sm:$0xff] }
 0x23a   : > { %v1853_v17 = vpop.f32.mrf.mxu2 }
 0x23b   : > { %v2438_v33 = vmax.f32 %v2406_v27, 0.0  ;;  %v1927_v25 = vadd.f32 %v1853_v17, %v1704_v42  ;;  %2681 = vmatmul.msk.bf16.gmra.mxu1 %vm224_vm1, %v3543_v50  ;;  %v1979_v42 = vld [vmem:[#allocation2 + $0x2a8] sm:$0xff]  ;;  %v1980_v17 = vld [vmem:[#allocation2 + $0x2b0] sm:$0xff] }
 0x23c   : > { %v2075_v60 = vpop.f32.mrf.mxu3 }
 0x23d   : > { %2471 = vst.msk [vmem:[%s3747_s8 + $0x18] sm:$0xff] %vm2467_vm3, %v2438_v33  ;;  %v2149_v37 = vadd.f32 %v2075_v60, %v1927_v25 }
 0x23e   : > { %v2302_v19 = vpop.f32.mrf.mxu0 }
 0x23f   : > { %v2371_v4 = vadd.f32 %v2297_v10, %v2149_v37  ;;  %v1999_v37 = vpack.c.bf16 %v1980_v17, %v1979_v42  ;;  %v2205_v42 = vld [vmem:[#allocation2 + $0x2e9] sm:$0xff]  ;;  %v2206_v17 = vld [vmem:[#allocation2 + $0x2f1] sm:$0xff] }
 0x240   : > { %v1637_v13 = vpop.f32.mrf.mxu1 }
 0x241   : > { %v2407_v12 = vadd.f32 %v3739_v24, %v2371_v4  ;;  %2732 = vmatmul.msk.bf16.gmra.mxu0 %vm224_vm1, %v3571_v62  ;;  %v1707_v57 = vadd.f32 %v1637_v13, %v3995_v7  ;;  %v3999_v7 = vld [vmem:[#allocation23_spill] sm:$0xff] }
 0x242   : > { %v1855_v39 = vpop.f32.mrf.mxu2 }
 0x243   : > { %v2439_v47 = vmax.f32 %v2407_v12, 0.0  ;;  %v1928_v50 = vadd.f32 %v1855_v39, %v1705_v54 }
 0x244   : > { %v2077_v22 = vpop.f32.mrf.mxu3 }
 0x245   : > { %2472 = vst.msk [vmem:[%s3747_s8 + $0x20] sm:$0xff] %vm2467_vm3, %v2439_v47  ;;  %v2150_v5 = vadd.f32 %v2077_v22, %v1928_v50 }
 0x246   : > { %v2304_v35 = vpop.f32.mrf.mxu0 }
 0x247   : > { %v2372_v10 = vadd.f32 %v2299_v43, %v2150_v5  ;;  %2698 = vmatmul.msk.bf16.gmra.mxu2 %vm224_vm1, %v3993_v48 }
 0x248   : > { %v1640_v16 = vpop.f32.mrf.mxu1 }
 0x249   : > { %v2408_v30 = vadd.f32 %v3739_v24, %v2372_v10  ;;  %2715 = vmatmul.msk.bf16.gmra.mxu3 %vm224_vm1, %v1998_v20  ;;  %v1708_v54 = vadd.f32 %v1640_v16, %v3996_v45  ;;  %v1981_v16 = vld [vmem:[#allocation2 + $0x2c8] sm:$0xff] }
 0x24a   : > { %v1858_v38 = vpop.f32.mrf.mxu2  ;;  %v1762_v45 = vld [vmem:[#allocation2 + $0x2ef] sm:$0xff] }
 0x24b   : > { %v2440_v26 = vmax.f32 %v2408_v30, 0.0  ;;  %v1929_v15 = vadd.f32 %v1858_v38, %v1706_v63  ;;  %2682 = vmatmul.msk.bf16.gmra.mxu1 %vm224_vm1, %v3571_v62  ;;  %v1982_v30 = vld [vmem:[#allocation2 + $0x2d0] sm:$0xff] }
 0x24c   : > { %v2080_v29 = vpop.f32.mrf.mxu3  ;;  %v1538_v38 = vld [vmem:[#allocation2 + $0x2c9] sm:$0xff] }
 0x24d   : > { %2473 = vst.msk [vmem:[%s3747_s8 + $0x28] sm:$0xff] %vm2467_vm3, %v2440_v26  ;;  %v2151_v46 = vadd.f32 %v2080_v29, %v1929_v15  ;;  %v1539_v26 = vld [vmem:[#allocation2 + $0x2d1] sm:$0xff]  ;;  %v2000_v29 = vpack.c.bf16 %v1982_v30, %v1981_v16 }
 0x24e   : > { %v2307_v61 = vpop.f32.mrf.mxu0 }
 0x24f   : > { %v2373_v34 = vadd.f32 %v2302_v19, %v2151_v46 }
 0x250   : > { %v1642_v59 = vpop.f32.mrf.mxu1 }
 0x251   : > { %v2409_v43 = vadd.f32 %v3739_v24, %v2373_v34  ;;  %2733 = vmatmul.msk.bf16.gmra.mxu0 %vm224_vm1, %v3589_v36  ;;  %v3998_v34 = vld [vmem:[#allocation24_spill] sm:$0xff] }
 0x252   : > { %v1860_v27 = vpop.f32.mrf.mxu2 }
 0x253   : > { %v2441_v33 = vmax.f32 %v2409_v43, 0.0  ;;  %v1930_v62 = vadd.f32 %v1860_v27, %v1707_v57 }
 0x254   : > { %v2082_v25 = vpop.f32.mrf.mxu3 }
 0x255   : > { %2474 = vst.msk [vmem:[%s3747_s8 + $0x30] sm:$0xff] %vm2467_vm3, %v2441_v33  ;;  %v2152_v60 = vadd.f32 %v2082_v25, %v1930_v62 }
 0x256   : > { %v2309_v19 = vpop.f32.mrf.mxu0 }
 0x257   : > { %v2374_v4 = vadd.f32 %v2304_v35, %v2152_v60  ;;  %2699 = vmatmul.msk.bf16.gmra.mxu2 %vm224_vm1, %v3573_v11  ;;  %v3997_v35 = vld [vmem:[#allocation22_spill] sm:$0xff] }
 0x258   : > { %v1645_v13 = vpop.f32.mrf.mxu1  ;;  %v1709_v10 = vadd.f32 %v1642_v59, %v3997_v35  ;;  %v1556_v59 = vpack.c.bf16 %v1539_v26, %v1538_v38  ;;  %v2207_v38 = vld [vmem:[#allocation2 + $0x309] sm:$0xff]  ;;  %v2208_v26 = vld [vmem:[#allocation2 + $0x311] sm:$0xff] }
 0x259   : > { %v2410_v12 = vadd.f32 %v3739_v24, %v2374_v4  ;;  %2716 = vmatmul.msk.bf16.gmra.mxu3 %vm224_vm1, %v1999_v37  ;;  %v1710_v57 = vadd.f32 %v1645_v13, %v3999_v7  ;;  %v2223_v37 = vpack.c.bf16 %v2206_v17, %v2205_v42  ;;  %v1763_v7 = vld [vmem:[#allocation2 + $0x307] sm:$0xff] }
 0x25a   : > { %v1863_v39 = vpop.f32.mrf.mxu2  ;;  %v1985_v17 = vld [vmem:[#allocation2 + $0x308] sm:$0xff] }
 0x25b   : > { %v2442_v8 = vmax.f32 %v2410_v12, 0.0  ;;  %v1931_v55 = vadd.f32 %v1863_v39, %v1708_v54  ;;  %2683 = vmatmul.msk.bf16.gmra.mxu1 %vm224_vm1, %v3589_v36  ;;  %v1761_v12 = vld [vmem:[#allocation2 + $0x2e7] sm:$0xff]  ;;  %v4000_v39 = vld [vmem:[#allocation25_spill] sm:$0xff] }
 0x25c   : > { %v2085_v47 = vpop.f32.mrf.mxu3  ;;  %v1779_v35 = vpack.c.bf16 %v1762_v45, %v1761_v12 }
 0x25d   : > { %2475 = vst.msk [vmem:[%s3747_s8 + $0x38] sm:$0xff] %vm2467_vm3, %v2442_v8  ;;  %v2153_v50 = vadd.f32 %v2085_v47, %v1931_v55  ;;  %v1983_v47 = vld [vmem:[#allocation2 + $0x2e8] sm:$0xff] }
 0x25e   : > { %v2312_v22 = vpop.f32.mrf.mxu0 }
 0x25f   : > { %v2375_v11 = vadd.f32 %v2307_v61, %v2153_v50  ;;  %v1984_v50 = vld [vmem:[#allocation2 + $0x2f0] sm:$0xff] }
 0x260   : > { %v1647_v5 = vpop.f32.mrf.mxu1 }
 0x261   : > { %v2411_v20 = vadd.f32 %v3739_v24, %v2375_v11  ;;  %2734 = vmatmul.msk.bf16.gmra.mxu0 %vm224_vm1, %v3606_v41  ;;  %v1711_v8 = vadd.f32 %v1647_v5, %v4000_v39 }
 0x262   : > { %v1865_v48 = vpop.f32.mrf.mxu2 }
 0x263   : > { %v2443_v28 = vmax.f32 %v2411_v20, 0.0  ;;  %v1932_v36 = vadd.f32 %v1865_v48, %v1709_v10 }
 0x264   : > { %v2087_v63 = vpop.f32.mrf.mxu3 }
 0x265   : > { %2476 = vst.msk [vmem:[%s3747_s8 + $0x40] sm:$0xff] %vm2467_vm3, %v2443_v28  ;;  %v2154_v15 = vadd.f32 %v2087_v63, %v1932_v36 }
 0x266   : > { %v2314_v46 = vpop.f32.mrf.mxu0 }
 0x267   : > { %v2376_v61 = vadd.f32 %v2309_v19, %v2154_v15  ;;  %2700 = vmatmul.msk.bf16.gmra.mxu2 %vm224_vm1, %v3998_v34  ;;  %v2224_v34 = vpack.c.bf16 %v2208_v26, %v2207_v38 }
 0x268   : > { %v1650_v41 = vpop.f32.mrf.mxu1 }
 0x269   : > { %v2412_v43 = vadd.f32 %v3739_v24, %v2376_v61  ;;  %2717 = vmatmul.msk.bf16.gmra.mxu3 %vm224_vm1, %v2000_v29  ;;  %v1712_v36 = vadd.f32 %v1650_v41, %v3602_v1 }
 0x26a   : > { %v1868_v27 = vpop.f32.mrf.mxu2 }
 0x26b   : > { %v2444_v33 = vmax.f32 %v2412_v43, 0.0  ;;  %v1933_v62 = vadd.f32 %v1868_v27, %v1710_v57  ;;  %2684 = vmatmul.msk.bf16.gmra.mxu1 %vm224_vm1, %v1556_v59  ;;  %v1764_v57 = vld [vmem:[#allocation2 + $0x30f] sm:$0xff] }
 0x26c   : > { %v2090_v25 = vpop.f32.mrf.mxu3 }
 0x26d   : > { %2477 = vst.msk [vmem:[%s3747_s8 + $0x48] sm:$0xff] %vm2467_vm3, %v2444_v33  ;;  %v2155_v60 = vadd.f32 %v2090_v25, %v1933_v62  ;;  %v1986_v33 = vld [vmem:[#allocation2 + $0x310] sm:$0xff] }
 0x26e   : > { %v2317_v19 = vpop.f32.mrf.mxu0 }
 0x26f   : > { %v2377_v4 = vadd.f32 %v2312_v22, %v2155_v60  ;;  %v2001_v22 = vpack.c.bf16 %v1984_v50, %v1983_v47  ;;  %v1780_v60 = vpack.c.bf16 %v1764_v57, %v1763_v7 }
 0x270   : > { %v1652_v13 = vpop.f32.mrf.mxu1 }
 0x271   : > { %v2413_v54 = vadd.f32 %v3739_v24, %v2377_v4  ;;  %2735 = vmatmul.msk.bf16.gmra.mxu0 %vm224_vm1, %v2223_v37  ;;  %v1713_v27 = vadd.f32 %v1652_v13, %v3610_v31  ;;  %v2002_v4 = vpack.c.bf16 %v1986_v33, %v1985_v17 }
 0x272   : > { %v1870_v55 = vpop.f32.mrf.mxu2 }
 0x273   : > { %v2445_v11 = vmax.f32 %v2413_v54, 0.0  ;;  %v1934_v20 = vadd.f32 %v1870_v55, %v1711_v8 }
 0x274   : > { %v2092_v10 = vpop.f32.mrf.mxu3 }
 0x275   : > { %2478 = vst.msk [vmem:[%s3747_s8 + $0x50] sm:$0xff] %vm2467_vm3, %v2445_v11  ;;  %v2156_v48 = vadd.f32 %v2092_v10, %v1934_v20 }
 0x276   : > { %v2319_v16 = vpop.f32.mrf.mxu0 }
 0x277   : > { %v2378_v30 = vadd.f32 %v2314_v46, %v2156_v48  ;;  %2701 = vmatmul.msk.bf16.gmra.mxu2 %vm224_vm1, %v1779_v35 }
 0x278   : > { %v1655_v28 = vpop.f32.mrf.mxu1 }
 0x279   : > { %v2414_v5 = vadd.f32 %v3739_v24, %v2378_v30  ;;  %2718 = vmatmul.msk.bf16.gmra.mxu3 %vm224_vm1, %v2001_v22  ;;  %v1714_v13 = vadd.f32 %v1655_v28, %v3616_v3 }
 0x27a   : > { %v1873_v63 = vpop.f32.mrf.mxu2 }
 0x27b   : > { %v2446_v15 = vmax.f32 %v2414_v5, 0.0  ;;  %v1935_v29 = vadd.f32 %v1873_v63, %v1712_v36  ;;  %2685 = vmatmul.msk.bf16.gmra.mxu1 %vm224_vm1, %v2223_v37 }
 0x27c   : > { %v2095_v61 = vpop.f32.mrf.mxu3 }
 0x27d   : > { %2479 = vst.msk [vmem:[%s3747_s8 + $0x58] sm:$0xff] %vm2467_vm3, %v2446_v15  ;;  %v2157_v46 = vadd.f32 %v2095_v61, %v1935_v29 }
 0x27e   : > { %v2322_v59 = vpop.f32.mrf.mxu0 }
 0x27f   : > { %v2379_v43 = vadd.f32 %v2317_v19, %v2157_v46 }
 0x280   : > { %v1657_v1 = vpop.f32.mrf.mxu1 }
 0x281   : > { %v2415_v41 = vadd.f32 %v3739_v24, %v2379_v43  ;;  %2736 = vmatmul.msk.bf16.gmra.mxu0 %vm224_vm1, %v2224_v34  ;;  %v1715_v48 = vadd.f32 %v1657_v1, %v3623_v52 }
 0x282   : > { %v1875_v42 = vpop.f32.mrf.mxu2 }
 0x283   : > { %v2447_v62 = vmax.f32 %v2415_v41, 0.0  ;;  %v1936_v25 = vadd.f32 %v1875_v42, %v1713_v27 }
 0x284   : > { %v2097_v37 = vpop.f32.mrf.mxu3 }
 0x285   : > { %2480 = vst.msk [vmem:[%s3747_s8 + $0x60] sm:$0xff] %vm2467_vm3, %v2447_v62  ;;  %v2158_v19 = vadd.f32 %v2097_v37, %v1936_v25 }
 0x286   : > { %v2324_v12 = vpop.f32.mrf.mxu0 }
 0x287   : > { %v2380_v45 = vadd.f32 %v2319_v16, %v2158_v19  ;;  %2702 = vmatmul.msk.bf16.gmra.mxu2 %vm224_vm1, %v1780_v60 }
 0x288   : > { %v1660_v54 = vpop.f32.mrf.mxu1 }
 0x289   : > { %v2416_v31 = vadd.f32 %v3739_v24, %v2380_v45  ;;  %2719 = vmatmul.msk.bf16.gmra.mxu3 %vm224_vm1, %v2002_v4  ;;  %v1716_v26 = vadd.f32 %v1660_v54, %v3630_v44 }
 0x28a   : > { %v1878_v39 = vpop.f32.mrf.mxu2 }
 0x28b   : > { %v2448_v8 = vmax.f32 %v2416_v31, 0.0  ;;  %v1937_v55 = vadd.f32 %v1878_v39, %v1714_v13 }
 0x28c   : > { %v2100_v47 = vpop.f32.mrf.mxu3 }
 0x28d   : > { %2481 = vst.msk [vmem:[%s3747_s8 + $0x68] sm:$0xff] %vm2467_vm3, %v2448_v8  ;;  %v2159_v50 = vadd.f32 %v2100_v47, %v1937_v55 }
 0x28e   : > { %v2327_v11 = vpop.f32.mrf.mxu0 }
 0x28f   : > { %v2381_v20 = vadd.f32 %v2322_v59, %v2159_v50 }
 0x290   : > { %v1662_v35 = vpop.f32.mrf.mxu1 }
 0x291   : > { %v2417_v10 = vadd.f32 %v3739_v24, %v2381_v20  ;;  %v1717_v57 = vadd.f32 %v1662_v35, %v3637_v58 }
 0x292   : > { %v1880_v22 = vpop.f32.mrf.mxu2 }
 0x293   : > { %v2449_v3 = vmax.f32 %v2417_v10, 0.0  ;;  %v1938_v16 = vadd.f32 %v1880_v22, %v1715_v48 }
 0x294   : > { %v2102_v30 = vpop.f32.mrf.mxu3 }
 0x295   : > { %2482 = vst.msk [vmem:[%s3747_s8 + $0x70] sm:$0xff] %vm2467_vm3, %v2449_v3  ;;  %v2160_v28 = vadd.f32 %v2102_v30, %v1938_v16 }
 0x296   : > { %v2329_v5 = vpop.f32.mrf.mxu0 }
 0x297   : > { %v2382_v36 = vadd.f32 %v2324_v12, %v2160_v28 }
 0x298   : > { %v1665_v63 = vpop.f32.mrf.mxu1 }
 0x299   : > { %v2418_v38 = vadd.f32 %v3739_v24, %v2382_v36  ;;  %v1718_v60 = vadd.f32 %v1665_v63, %v3644_v51 }
 0x29a   : > { %v1883_v15 = vpop.f32.mrf.mxu2 }
 0x29b   : > { %v2450_v29 = vmax.f32 %v2418_v38, 0.0  ;;  %v1939_v61 = vadd.f32 %v1883_v15, %v1716_v26 }
 0x29c   : > { %v2105_v52 = vpop.f32.mrf.mxu3 }
 0x29d   : > { %2483 = vst.msk [vmem:[%s3747_s8 + $0x78] sm:$0xff] %vm2467_vm3, %v2450_v29  ;;  %v2161_v46 = vadd.f32 %v2105_v52, %v1939_v61 }
 0x29e   : > { %v2332_v34 = vpop.f32.mrf.mxu0 }
 0x29f   : > { %v2383_v59 = vadd.f32 %v2327_v11, %v2161_v46 }
 0x2a0   : > { %v1667_v43 = vpop.f32.mrf.mxu1 }
 0x2a1   : > { %v2419_v7 = vadd.f32 %v3739_v24, %v2383_v59  ;;  %v1719_v39 = vadd.f32 %v1667_v43, %v3651_v0 }
 0x2a2   : > { %v1885_v1 = vpop.f32.mrf.mxu2 }
 0x2a3   : > { %v2451_v41 = vmax.f32 %v2419_v7, 0.0  ;;  %v1940_v27 = vadd.f32 %v1885_v1, %v1717_v57 }
 0x2a4   : > { %v2107_v44 = vpop.f32.mrf.mxu3 }
 0x2a5   : > { %2484 = vst.msk [vmem:[%s3747_s8 + $0x80] sm:$0xff] %vm2467_vm3, %v2451_v41  ;;  %v2162_v42 = vadd.f32 %v2107_v44, %v1940_v27 }
 0x2a6   : > { %v2334_v17 = vpop.f32.mrf.mxu0 }
 0x2a7   : > { %v2384_v33 = vadd.f32 %v2329_v5, %v2162_v42 }
 0x2a8   : > { %v1670_v62 = vpop.f32.mrf.mxu1 }
 0x2a9   : > { %v2420_v25 = vadd.f32 %v3739_v24, %v2384_v33  ;;  %v1720_v48 = vadd.f32 %v1670_v62, %v3657_v6 }
 0x2aa   : > { %v1888_v37 = vpop.f32.mrf.mxu2 }
 0x2ab   : > { %v2452_v19 = vmax.f32 %v2420_v25, 0.0  ;;  %v1941_v4 = vadd.f32 %v1888_v37, %v1718_v60 }
 0x2ac   : > { %v2110_v58 = vpop.f32.mrf.mxu3 }
 0x2ad   : > { %2485 = vst.msk [vmem:[%s3747_s8 + $0x88] sm:$0xff] %vm2467_vm3, %v2452_v19  ;;  %v2163_v12 = vadd.f32 %v2110_v58, %v1941_v4 }
 0x2ae   : > { %v2337_v45 = vpop.f32.mrf.mxu0 }
 0x2af   : > { %v2385_v54 = vadd.f32 %v2332_v34, %v2163_v12 }
 0x2b0   : > { %v1672_v31 = vpop.f32.mrf.mxu1 }
 0x2b1   : > { %v2421_v13 = vadd.f32 %v3739_v24, %v2385_v54  ;;  %v1721_v38 = vadd.f32 %v1672_v31, %v3664_v14 }
 0x2b2   : > { %v1890_v8 = vpop.f32.mrf.mxu2 }
 0x2b3   : > { %v2453_v55 = vmax.f32 %v2421_v13, 0.0  ;;  %v1942_v47 = vadd.f32 %v1890_v8, %v1719_v39 }
 0x2b4   : > { %v2112_v51 = vpop.f32.mrf.mxu3 }
 0x2b5   : > { %2486 = vst.msk [vmem:[%s3747_s8 + $0x90] sm:$0xff] %vm2467_vm3, %v2453_v55  ;;  %v2164_v50 = vadd.f32 %v2112_v51, %v1942_v47 }
 0x2b6   : > { %v2339_v11 = vpop.f32.mrf.mxu0 }
 0x2b7   : > { %v2386_v20 = vadd.f32 %v2334_v17, %v2164_v50 }
 0x2b8   : > { %v1675_v35 = vpop.f32.mrf.mxu1 }
 0x2b9   : > { %v2422_v10 = vadd.f32 %v3739_v24, %v2386_v20  ;;  %v1722_v43 = vadd.f32 %v1675_v35, %v3670_v23 }
 0x2ba   : > { %v1893_v22 = vpop.f32.mrf.mxu2 }
 0x2bb   : > { %v2454_v3 = vmax.f32 %v2422_v10, 0.0  ;;  %v1943_v16 = vadd.f32 %v1893_v22, %v1720_v48 }
 0x2bc   : > { %v2115_v0 = vpop.f32.mrf.mxu3 }
 0x2bd   : > { %2487 = vst.msk [vmem:[%s3747_s8 + $0x98] sm:$0xff] %vm2467_vm3, %v2454_v3  ;;  %v2165_v30 = vadd.f32 %v2115_v0, %v1943_v16 }
 0x2be   : > { %v2342_v28 = vpop.f32.mrf.mxu0 }
 0x2bf   : > { %v2387_v5 = vadd.f32 %v2337_v45, %v2165_v30 }
 0x2c0   : > { %v1677_v36 = vpop.f32.mrf.mxu1 }
 0x2c1   : > { %v2423_v63 = vadd.f32 %v3739_v24, %v2387_v5  ;;  %v1723_v17 = vadd.f32 %v1677_v36, %v3677_v32 }
 0x2c2   : > { %v1895_v26 = vpop.f32.mrf.mxu2 }
 0x2c3   : > { %v2455_v15 = vmax.f32 %v2423_v63, 0.0  ;;  %v1944_v29 = vadd.f32 %v1895_v26, %v1721_v38 }
 0x2c4   : > { %v2117_v6 = vpop.f32.mrf.mxu3 }
 0x2c5   : > { %2488 = vst.msk [vmem:[%s3747_s8 + $0xa0] sm:$0xff] %vm2467_vm3, %v2455_v15  ;;  %v2166_v61 = vadd.f32 %v2117_v6, %v1944_v29 }
 0x2c6   : > { %v2344_v52 = vpop.f32.mrf.mxu0 }
 0x2c7   : > { %v2388_v46 = vadd.f32 %v2339_v11, %v2166_v61 }
 0x2c8   : > { %v1680_v34 = vpop.f32.mrf.mxu1 }
 0x2c9   : > { %v2424_v59 = vadd.f32 %v3739_v24, %v2388_v46  ;;  %v1724_v58 = vadd.f32 %v1680_v34, %v3683_v9 }
 0x2ca   : > { %v1898_v7 = vpop.f32.mrf.mxu2 }
 0x2cb   : > { %v2456_v57 = vmax.f32 %v2424_v59, 0.0  ;;  %v1945_v1 = vadd.f32 %v1898_v7, %v1722_v43 }
 0x2cc   : > { %v2120_v14 = vpop.f32.mrf.mxu3 }
 0x2cd   : > { %2489 = vst.msk [vmem:[%s3747_s8 + $0xa8] sm:$0xff] %vm2467_vm3, %v2456_v57  ;;  %v2167_v41 = vadd.f32 %v2120_v14, %v1945_v1 }
 0x2ce   : > { %v2347_v44 = vpop.f32.mrf.mxu0 }
 0x2cf   : > { %v2389_v27 = vadd.f32 %v2342_v28, %v2167_v41 }
 0x2d0   : > { %v1682_v62 = vpop.f32.mrf.mxu1 }
 0x2d1   : > { %v2425_v42 = vadd.f32 %v3739_v24, %v2389_v27  ;;  %v1725_v47 = vadd.f32 %v1682_v62, %v3690_v2 }
 0x2d2   : > { %v1900_v33 = vpop.f32.mrf.mxu2 }
 0x2d3   : > { %v2457_v25 = vmax.f32 %v2425_v42, 0.0  ;;  %v1946_v60 = vadd.f32 %v1900_v33, %v1723_v17 }
 0x2d4   : > { %v2122_v23 = vpop.f32.mrf.mxu3 }
 0x2d5   : > { %2490 = vst.msk [vmem:[%s3747_s8 + $0xb0] sm:$0xff] %vm2467_vm3, %v2457_v25  ;;  %v2168_v37 = vadd.f32 %v2122_v23, %v1946_v60 }
 0x2d6   : > { %v2349_v45 = vpop.f32.mrf.mxu0 }
 0x2d7   : > { %v2390_v19 = vadd.f32 %v2344_v52, %v2168_v37 }
 0x2d8   : > { %v1685_v13 = vpop.f32.mrf.mxu1 }
 0x2d9   : > { %v2426_v4 = vadd.f32 %v3739_v24, %v2390_v19  ;;  %v1726_v3 = vadd.f32 %v1685_v13, %v3696_v18 }
 0x2da   : > { %v1903_v12 = vpop.f32.mrf.mxu2 }
 0x2db   : > { %v2458_v54 = vmax.f32 %v2426_v4, 0.0  ;;  %v1947_v31 = vadd.f32 %v1903_v12, %v1724_v58 }
 0x2dc   : > { %v2125_v32 = vpop.f32.mrf.mxu3 }
 0x2dd   : > { %2491 = vst.msk [vmem:[%s3747_s8 + $0xb8] sm:$0xff] %vm2467_vm3, %v2458_v54  ;;  %v2169_v39 = vadd.f32 %v2125_v32, %v1947_v31 }
 0x2de   : > { %v2352_v20 = vpop.f32.mrf.mxu0 }
 0x2df   : > { %v2391_v8 = vadd.f32 %v2347_v44, %v2169_v39 }
 0x2e0   : > { %v1687_v10 = vpop.f32.mrf.mxu1 }
 0x2e1   : > { %v2427_v55 = vadd.f32 %v3739_v24, %v2391_v8  ;;  %v1727_v26 = vadd.f32 %v1687_v10, %v3703_v53 }
 0x2e2   : > { %v1905_v51 = vpop.f32.mrf.mxu2 }
 0x2e3   : > { %v2459_v50 = vmax.f32 %v2427_v55, 0.0  ;;  %v1948_v11 = vadd.f32 %v1905_v51, %v1725_v47 }
 0x2e4   : > { %v2127_v9 = vpop.f32.mrf.mxu3 }
 0x2e5   : > { %2492 = vst.msk [vmem:[%s3747_s8 + $0xc0] sm:$0xff] %vm2467_vm3, %v2459_v50  ;;  %v2170_v35 = vadd.f32 %v2127_v9, %v1948_v11 }
 0x2e6   : > { %v2354_v5 = vpop.f32.mrf.mxu0 }
 0x2e7   : > { %v2392_v48 = vadd.f32 %v2349_v45, %v2170_v35 }
 0x2e8   : > { %v1690_v63 = vpop.f32.mrf.mxu1 }
 0x2e9   : > { %v2428_v22 = vadd.f32 %v3739_v24, %v2392_v48  ;;  %v1728_v59 = vadd.f32 %v1690_v63, %v3709_v40 }
 0x2ea   : > { %v1908_v16 = vpop.f32.mrf.mxu2 }
 0x2eb   : > { %v2460_v0 = vmax.f32 %v2428_v22, 0.0  ;;  %v1949_v30 = vadd.f32 %v1908_v16, %v1726_v3 }
 0x2ec   : > { %v2130_v2 = vpop.f32.mrf.mxu3 }
 0x2ed   : > { %2493 = vst.msk [vmem:[%s3747_s8 + $0xc8] sm:$0xff] %vm2467_vm3, %v2460_v0  ;;  %v2171_v28 = vadd.f32 %v2130_v2, %v1949_v30 }
 0x2ee   : > { %v2357_v46 = vpop.f32.mrf.mxu0 }
 0x2ef   : > { %v2393_v36 = vadd.f32 %v2352_v20, %v2171_v28 }
 0x2f0   : > { %v1692_v7 = vpop.f32.mrf.mxu1 }
 0x2f1   : > { %v2429_v38 = vadd.f32 %v3739_v24, %v2393_v36  ;;  %v1729_v44 = vadd.f32 %v1692_v7, %v3716_v49 }
 0x2f2   : > { %v1910_v15 = vpop.f32.mrf.mxu2 }
 0x2f3   : > { %v2461_v29 = vmax.f32 %v2429_v38, 0.0  ;;  %v1950_v6 = vadd.f32 %v1910_v15, %v1727_v26 }
 0x2f4   : > { %v2132_v18 = vpop.f32.mrf.mxu3 }
 0x2f5   : > { %2494 = vst.msk [vmem:[%s3747_s8 + $0xd0] sm:$0xff] %vm2467_vm3, %v2461_v29  ;;  %v2172_v61 = vadd.f32 %v2132_v18, %v1950_v6 }
 0x2f6   : > { %v2359_v42 = vpop.f32.mrf.mxu0 }
 0x2f7   : > { %v2394_v52 = vadd.f32 %v2354_v5, %v2172_v61 }
 0x2f8   : > { %v1695_v25 = vpop.f32.mrf.mxu1 }
 0x2f9   : > { %v2430_v34 = vadd.f32 %v3739_v24, %v2394_v52  ;;  %v1730_v19 = vadd.f32 %v1695_v25, %v3722_v56 }
 0x2fa   : > { %v1913_v43 = vpop.f32.mrf.mxu2 }
 0x2fb   : > { %v2462_v57 = vmax.f32 %v2430_v34, 0.0  ;;  %v1951_v1 = vadd.f32 %v1913_v43, %v1728_v59 }
 0x2fc   : > { %v2135_v53 = vpop.f32.mrf.mxu3 }
 0x2fd   : > { %2495 = vst.msk [vmem:[%s3747_s8 + $0xd8] sm:$0xff] %vm2467_vm3, %v2462_v57  ;;  %v2173_v14 = vadd.f32 %v2135_v53, %v1951_v1 }
 0x2fe   : > { %v2362_v12 = vpop.f32.mrf.mxu0 }
 0x2ff   : > { %v2395_v41 = vadd.f32 %v2357_v46, %v2173_v14 }
 0x300   : > { %v1697_v31 = vpop.f32.mrf.mxu1 }
 0x301   : > { %v2431_v27 = vadd.f32 %v3739_v24, %v2395_v41  ;;  %v1731_v39 = vadd.f32 %v1697_v31, %v3729_v21 }
 0x302   : > { %v1915_v17 = vpop.f32.mrf.mxu2 }
 0x303   : > { %v2463_v33 = vmax.f32 %v2431_v27, 0.0  ;;  %v1952_v62 = vadd.f32 %v1915_v17, %v1729_v44 }
 0x304   : > { %v2137_v40 = vpop.f32.mrf.mxu3 }
 0x305   : > { %2496 = vst.msk [vmem:[%s3747_s8 + $0xe0] sm:$0xff] %vm2467_vm3, %v2463_v33  ;;  %v2174_v60 = vadd.f32 %v2137_v40, %v1952_v62 }
 0x306   : > { %v2364_v50 = vpop.f32.mrf.mxu0 }
 0x307   : > { %v2396_v23 = vadd.f32 %v2359_v42, %v2174_v60 }
 0x309   : > { %v2432_v37 = vadd.f32 %v3739_v24, %v2396_v23 }
 0x30a   : > { %v1918_v4 = vpop.f32.mrf.mxu2 }
 0x30b   : > { %v2464_v58 = vmax.f32 %v2432_v37, 0.0  ;;  %v1953_v49 = vadd.f32 %v1918_v4, %v1730_v19 }
 0x30c   : > { %v2140_v45 = vpop.f32.mrf.mxu3 }
 0x30d   : > { %2497 = vst.msk [vmem:[%s3747_s8 + $0xe8] sm:$0xff] %vm2467_vm3, %v2464_v58  ;;  %v2175_v54 = vadd.f32 %v2140_v45, %v1953_v49 }
 0x30f   : > { %v2397_v32 = vadd.f32 %v2362_v12, %v2175_v54 }
 0x311   : > { %v2433_v13 = vadd.f32 %v3739_v24, %v2397_v32 }
 0x312   : > { %v1920_v8 = vpop.f32.mrf.mxu2 }
 0x313   : > { %v2465_v56 = vmax.f32 %v2433_v13, 0.0  ;;  %v1954_v55 = vadd.f32 %v1920_v8, %v1731_v39 }
 0x314   : > { %v2142_v47 = vpop.f32.mrf.mxu3 }
 0x315   : > { %2498 = vst.msk [vmem:[%s3747_s8 + $0xf0] sm:$0xff] %vm2467_vm3, %v2465_v56  ;;  %v2176_v51 = vadd.f32 %v2142_v47, %v1954_v55 }
 0x317   : > { %v2398_v11 = vadd.f32 %v2364_v50, %v2176_v51 }
 0x319   : > { %v2434_v21 = vadd.f32 %v3739_v24, %v2398_v11 }
 0x31b   : > { %v2466_v9 = vmax.f32 %v2434_v21, 0.0 }
 0x31d   : > { %2499 = vst.msk [vmem:[%s3747_s8 + $0xf8] sm:$0xff] %vm2467_vm3, %v2466_v9 }
 0x31e   : > { %2821 = shalt.err (!%p2818_p3)
}
 0x31f   : > { %s2859_s13 = smov 128   ;;  %s2860_s7 = smov 8  }
 0x320   : > { %2747 = dma.vmem_to_hbm [thread:$0]  (%p2929_p5), %s2514_s14, 4096, %s2516_s15, %s2501_s22, %s2859_s13, %s2859_s13, %s2860_s7  }
 0x321 PF: > { %p2753_p4 = scmp.ge.s32.totalorder %s2856_s21, 2  ;;  %s2530_s8 = sand.u32 1, %s2844_s18  }
 0x322   : > { %s2531_s9 = scalar_lea.sflag [#allocation4], %s2530_s8 }
 0x323   : > { %p2750_p7 = pnand %p2753_p4, %p2933_p6 }
 0x325   : > { %p2751_p8 = pneg %p2750_p7 }
 0x327   : > { %2839 = dma.done.wait (%p2751_p8), %s2531_s9, 4096  }
 0x328   : > { %2841 = vsyncadd (%p2751_p8), %s2531_s9, 4294963200  ;;  %p15_p9 = scmp.ge.s32.totalorder %s2916_s24, 4   ;;  %s4001_s18 = smov %s2848_s19 }
 0x329   : > { %s4002_s19 = smov %s2852_s20  ;;  %s4003_s20 = smov %s2927_s27 }
 0x32a   : > { %s4004_s21 = smov %s2916_s24  ;;  %17 = sbr.rel (!%p15_p9) target bundleno = 3 (0x3), region = 86 }
 0x32f   :  { %2537 = vsyncpa [#allocation4], 1 }
 0x330   :  { %2539 = vsyncpa [#allocation4 + $0x1], 1 }

</bundles_post_ra>
